<compile_context>
chip_gen: v7x
topology: tpu7x:2x2x1
jax: 0.10.0
libtpu: 0.0.40
codegen_flags: <defaults>
</compile_context>

<pallas_src>
import functools
import math

import jax
import jax.numpy as jnp
from jax.experimental import pallas as pl
from jax.experimental.pallas import tpu as pltpu


def _encoder_kernel(x_ref, bias_ref, wqkv_ref, bqkv_ref, wp_ref, bp_ref, qv_ref,
                    out_ref, *, n_heads):
    T, L, D = x_ref.shape
    dq = D // n_heads
    dp = wp_ref.shape[-1]

    # ---- fused Q/K/V projection: one big MXU matmul, bf16 in / f32 accumulate ----
    x2 = x_ref[...].reshape(T * L, D)                                   # bf16 (T*L, D)
    qkv = jnp.dot(x2, wqkv_ref[...],
                  preferred_element_type=jnp.float32) + bqkv_ref[...]   # f32 (T*L, 3D)
    # 1/sqrt(d_query) is folded into Wq / bq in prepare_params().
    qkv = qkv.astype(jnp.bfloat16)      # everything downstream of qkv feeds the MXU

    bias = bias_ref[...]                # (T, 1, L) f32 additive key bias (precomputed)

    # ---- per-head attention, batched over the T news items -----------------------
    # Static unroll over heads (n_heads is small). The (T, L, D) concat of head
    # outputs is never materialized: the additive-attention pre-activation is
    # accumulated per head instead.
    ctx = []
    proj = jnp.zeros((T * L, dp), jnp.float32)
    for h in range(n_heads):
        off = h * dq
        qh = qkv[:, off:off + dq].reshape(T, L, dq)                     # bf16
        kh = qkv[:, D + off:D + off + dq].reshape(T, L, dq)
        vh = qkv[:, 2 * D + off:2 * D + off + dq].reshape(T, L, dq)
        s = jnp.einsum('tld,tmd->tlm', qh, kh,
                       preferred_element_type=jnp.float32) + bias       # f32 (T, L, L)
        s = s - jnp.max(s, axis=-1, keepdims=True)
        p = jnp.exp(s)
        p = p * pl.reciprocal(jnp.sum(p, axis=-1, keepdims=True), approx=True)
        oh = jnp.einsum('tlm,tmd->tld', p.astype(jnp.bfloat16), vh,
                        preferred_element_type=jnp.float32)             # f32 (T, L, dq)
        oh = oh.astype(jnp.bfloat16)
        ctx.append(oh)
        proj = proj + jnp.dot(oh.reshape(T * L, dq), wp_ref[h],
                              preferred_element_type=jnp.float32)       # (T*L, dp)

    # ---- additive attention pooling (softmax over the context axis) --------------
    # NOTE: pooling intentionally does NOT re-apply attn_mask, matching the
    # reference AdditiveAttention (it only takes `representations`).
    t_act = jnp.tanh(proj + bp_ref[...])                                # (T*L, dp) f32
    sc = jnp.sum(t_act * qv_ref[...], axis=-1, keepdims=True)           # (T*L, 1)
    sc = sc.reshape(T, L, 1)
    sc = sc - jnp.max(sc, axis=1, keepdims=True)
    a = jnp.exp(sc)
    a = a * pl.reciprocal(jnp.sum(a, axis=1, keepdims=True), approx=True)  # (T, L, 1)

    pooled = jnp.concatenate(
        [jnp.sum(ctx[h] * a, axis=1) for h in range(n_heads)], axis=-1)    # (T, D) f32
    out_ref[...] = pooled.astype(out_ref.dtype)


def prepare_params(params, n_heads):
    """One-time fusion / casting of the Encoder parameters (hoisted out of the hot path)."""
    wq, bq, wk, bk, wv, bv, wp, bp, qv = params
    d_embed = wq.shape[0]
    assert d_embed % n_heads == 0
    d_query = d_embed // n_heads
    d_pool = wp.shape[1]
    inv_sqrt_dq = 1.0 / math.sqrt(d_query)
    # Fold the attention scale into the Q projection (exact) and fuse Q/K/V.
    wqkv = jnp.concatenate([wq * inv_sqrt_dq, wk, wv], axis=1).astype(jnp.bfloat16)
    bqkv = jnp.concatenate([bq * inv_sqrt_dq, bk, bv], axis=1).astype(jnp.float32)
    wp_h = wp.reshape(n_heads, d_query, d_pool).astype(jnp.bfloat16)
    return {
        "wqkv": wqkv,                                   # (D, 3D)     bf16
        "bqkv": bqkv.reshape(1, 3 * d_embed),           # (1, 3D)     f32
        "wp_h": wp_h,                                   # (H, dq, dp) bf16
        "bp": bp.astype(jnp.float32).reshape(1, d_pool),
        "qv": qv.astype(jnp.float32).reshape(1, d_pool),
    }


def _choose_tiling(BN, L):
    """News items per grid step (multiple of 8) and grid size."""
    target_rows = 2048                        # projection rows per step (amortize overhead)
    t = max(8, pl.cdiv(target_rows, L))
    t = pl.cdiv(t, 8) * 8
    bn8 = pl.cdiv(BN, 8) * 8
    t = min(t, bn8)                           # don't pad far past the real problem size
    grid = pl.cdiv(BN, t)
    if grid < 2 and bn8 >= 16:                # give both v7x TensorCores work when possible
        t = pl.cdiv(pl.cdiv(bn8, 2), 8) * 8
        grid = pl.cdiv(BN, t)
    return t, grid


def nrms_encoder(embedding, attn_mask, prepared, category_embed=None, *, n_heads):
    """embedding: (B, N, L, D); attn_mask: (B, N, L); returns (B, N, D) float32."""
    B, N, L, D = embedding.shape
    BN = B * N
    d_pool = prepared["bp"].shape[-1]

    t_items, grid = _choose_tiling(BN, L)
    bn_pad = t_items * grid

    x = embedding.reshape(BN, L, D)
    # Precompute the additive key bias once (no per-step (1-m)*-1e9 VPU op).
    bias = (1.0 - attn_mask.reshape(BN, 1, L).astype(jnp.float32)) * (-1e9)
    if bn_pad != BN:
        x = jnp.pad(x, ((0, bn_pad - BN), (0, 0), (0, 0)))
        bias = jnp.pad(bias, ((0, bn_pad - BN), (0, 0), (0, 0)))
    x = x.astype(jnp.bfloat16)

    kernel = functools.partial(_encoder_kernel, n_heads=n_heads)
    invariant = lambda shape: pl.BlockSpec(shape, lambda i: (0,) * len(shape))

    out = pl.pallas_call(
        kernel,
        out_shape=jax.ShapeDtypeStruct((bn_pad, D), jnp.float32),
        grid=(grid,),
        in_specs=[
            pl.BlockSpec((t_items, L, D), lambda i: (i, 0, 0)),      # news-item block
            pl.BlockSpec((t_items, 1, L), lambda i: (i, 0, 0)),      # key-bias block
            invariant((D, 3 * D)),                                   # fused Wqkv (bf16)
            invariant((1, 3 * D)),                                   # fused bqkv (f32)
            invariant((n_heads, D // n_heads, d_pool)),              # per-head Wp (bf16)
            invariant((1, d_pool)),                                  # bp
            invariant((1, d_pool)),                                  # additive query vector
        ],
        out_specs=pl.BlockSpec((t_items, D), lambda i: (i, 0)),
        compiler_params=pltpu.CompilerParams(
            dimension_semantics=("parallel",)),                      # megacore-shardable
    )(x, bias, prepared["wqkv"], prepared["bqkv"], prepared["wp_h"],
      prepared["bp"], prepared["qv"])

    news_vector = out[:BN].reshape(B, N, D)
    if category_embed is not None:
        news_vector = (news_vector + category_embed) / 2.0
    return news_vector


def init_params(key, d_embed, n_heads):
    d_query = d_embed // n_heads
    ks = jax.random.split(key, 9)
    s = 1.0 / math.sqrt(d_embed)
    u = lambda k, shape, lo, hi: jax.random.uniform(k, shape, jnp.float32, lo, hi)
    wq = u(ks[0], (d_embed, d_embed), -s, s); bq = u(ks[1], (1, d_embed), -s, s)
    wk = u(ks[2], (d_embed, d_embed), -s, s); bk = u(ks[3], (1, d_embed), -s, s)
    wv = u(ks[4], (d_embed, d_embed), -s, s); bv = u(ks[5], (1, d_embed), -s, s)
    wp = u(ks[6], (d_embed, d_query), -s, s); bp = u(ks[7], (1, d_query), -s, s)
    qv = u(ks[8], (1, d_query), -1.0, 1.0)
    return (wq, bq, wk, bk, wv, bv, wp, bp, qv)


def encoder_reference(embedding, attn_mask, params, category_embed, n_heads):
    """Pure-JAX float32 reference of the PyTorch Encoder forward."""
    wq, bq, wk, bk, wv, bv, wp, bp, qv = params
    B, N, L, D = embedding.shape
    dq = D // n_heads
    x = embedding.reshape(B * N, L, D)
    q = (x @ wq + bq).reshape(B * N, L, n_heads, dq).transpose(0, 2, 1, 3)
    k = (x @ wk + bk).reshape(B * N, L, n_heads, dq).transpose(0, 2, 1, 3)
    v = (x @ wv + bv).reshape(B * N, L, n_heads, dq).transpose(0, 2, 1, 3)
    s = q @ k.transpose(0, 1, 3, 2) / math.sqrt(dq)                  # (BN, H, L, L)
    mask = attn_mask.reshape(B * N, 1, 1, L).astype(jnp.float32)
    s = s + (1.0 - mask) * (-1e9)
    p = jax.nn.softmax(s, axis=-1)
    rep = (p @ v).transpose(0, 2, 1, 3).reshape(B * N, L, D)         # (BN, L, D)
    t = jnp.tanh(rep @ wp + bp)
    sc = jnp.sum(t * qv, axis=-1)                                    # (BN, L)
    a = jax.nn.softmax(sc, axis=-1)[..., None]
    news = jnp.sum(rep * a, axis=1).reshape(B, N, D)
    if category_embed is not None:
        news = (news + category_embed) / 2.0
    return news


if __name__ == "__main__":
    # small shapes consistent with the module
    B, N, L = 2, 3, 8          # batch, n_news, context_length
    n_heads, d_embed = 4, 32   # d_query = 8

    key = jax.random.PRNGKey(0)
    k_emb, k_cat, k_par = jax.random.split(key, 3)

    embedding = jax.random.normal(k_emb, (B, N, L, d_embed), jnp.float32)
    attn_mask = jnp.ones((B, N, L), jnp.float32)
    attn_mask = attn_mask.at[:, 1::2, -2:].set(0.0)   # mask last 2 tokens of every other item
    category_embed = jax.random.normal(k_cat, (B, N, d_embed), jnp.float32)

    params = init_params(k_par, d_embed, n_heads)
    prepared = prepare_params(params, n_heads)

    news_vector = nrms_encoder(embedding, attn_mask, prepared,
                               category_embed=category_embed, n_heads=n_heads)
    jax.block_until_ready(news_vector)

    assert news_vector.shape == (B, N, d_embed)
    assert bool(jnp.all(jnp.isfinite(news_vector)))

    # bf16 MXU operands + approx reciprocals mean ~1e-2 relative agreement with
    # the f32 reference, not bitwise equality.
    ref = encoder_reference(embedding, attn_mask, params, category_embed, n_heads)
    err = float(jnp.max(jnp.abs(news_vector - ref)) / (jnp.max(jnp.abs(ref)) + 1e-6))
    assert err < 5e-2, f"normalized max error {err:.4f}"

    print("KERNEL_OK")
</pallas_src>

<mosaic_0001>
module attributes {stable_mosaic.version = 11 : i64} {
  func.func @_encoder_kernel(%arg0: i32, %arg1: memref<8x8x32xbf16, #tpu.memory_space<vmem>>, %arg2: memref<8x1x8xf32, #tpu.memory_space<vmem>>, %arg3: memref<32x96xbf16, #tpu.memory_space<vmem>>, %arg4: memref<1x96xf32, #tpu.memory_space<vmem>>, %arg5: memref<4x8x8xbf16, #tpu.memory_space<vmem>>, %arg6: memref<1x8xf32, #tpu.memory_space<vmem>>, %arg7: memref<1x8xf32, #tpu.memory_space<vmem>>, %arg8: memref<8x32xf32, #tpu.memory_space<vmem>>) attributes {dimension_semantics = [#tpu.dimension_semantics<parallel>], iteration_bounds = array<i64: 1>, scalar_prefetch = 0 : i64, scratch_operands = 0 : i64, tpu.core_type = #tpu.core_type<tc>, window_params = [{transform_indices = @transform_0, window_bounds = array<i64: 8, 8, 32>}, {transform_indices = @transform_1, window_bounds = array<i64: 8, 1, 8>}, {pipeline_mode = #tpu.pipeline_mode<synchronous>, transform_indices = @transform_2, window_bounds = array<i64: 32, 96>}, {pipeline_mode = #tpu.pipeline_mode<synchronous>, transform_indices = @transform_3, window_bounds = array<i64: 1, 96>}, {pipeline_mode = #tpu.pipeline_mode<synchronous>, transform_indices = @transform_4, window_bounds = array<i64: 4, 8, 8>}, {pipeline_mode = #tpu.pipeline_mode<synchronous>, transform_indices = @transform_5, window_bounds = array<i64: 1, 8>}, {pipeline_mode = #tpu.pipeline_mode<synchronous>, transform_indices = @transform_6, window_bounds = array<i64: 1, 8>}, {transform_indices = @transform_7, window_bounds = array<i64: 8, 32>}]} {
    %c0 = arith.constant 0 : index
    %c0_0 = arith.constant 0 : index
    %c0_1 = arith.constant 0 : index
    %0 = vector.load %arg1[%c0, %c0_0, %c0_1] : memref<8x8x32xbf16, #tpu.memory_space<vmem>>, vector<8x8x32xbf16>
    %1 = vector.shape_cast %0 : vector<8x8x32xbf16> to vector<64x32xbf16>
    %c0_2 = arith.constant 0 : index
    %c0_3 = arith.constant 0 : index
    %2 = vector.load %arg3[%c0_2, %c0_3] : memref<32x96xbf16, #tpu.memory_space<vmem>>, vector<32x96xbf16>
    %cst = arith.constant dense<0.000000e+00> : vector<64x96xf32>
    %3 = tpu.matmul %1, %2, %cst {dimension_numbers = #tpu.dot_dimension_numbers<[1], [0], [0], [1], [0, 0, 1, 1], [], []>} : vector<64x32xbf16>, vector<32x96xbf16>, vector<64x96xf32> -> vector<64x96xf32>
    %c0_4 = arith.constant 0 : index
    %c0_5 = arith.constant 0 : index
    %4 = vector.load %arg4[%c0_4, %c0_5] : memref<1x96xf32, #tpu.memory_space<vmem>>, vector<1x96xf32>
    %5 = vector.broadcast %4 : vector<1x96xf32> to vector<64x96xf32>
    %6 = arith.addf %3, %5 : vector<64x96xf32>
    %7 = arith.truncf %6 : vector<64x96xf32> to vector<64x96xbf16>
    %c0_6 = arith.constant 0 : index
    %c0_7 = arith.constant 0 : index
    %c0_8 = arith.constant 0 : index
    %8 = vector.load %arg2[%c0_6, %c0_7, %c0_8] : memref<8x1x8xf32, #tpu.memory_space<vmem>>, vector<8x1x8xf32>
    %cst_9 = arith.constant 0.000000e+00 : f32
    %9 = vector.broadcast %cst_9 : f32 to vector<64x8xf32>
    %10 = vector.extract_strided_slice %7 {offsets = [0, 0], sizes = [64, 8], strides = [1, 1]} : vector<64x96xbf16> to vector<64x8xbf16>
    %11 = vector.shape_cast %10 : vector<64x8xbf16> to vector<8x8x8xbf16>
    %12 = vector.extract_strided_slice %7 {offsets = [0, 32], sizes = [64, 8], strides = [1, 1]} : vector<64x96xbf16> to vector<64x8xbf16>
    %13 = vector.shape_cast %12 : vector<64x8xbf16> to vector<8x8x8xbf16>
    %14 = vector.extract_strided_slice %7 {offsets = [0, 64], sizes = [64, 8], strides = [1, 1]} : vector<64x96xbf16> to vector<64x8xbf16>
    %15 = vector.shape_cast %14 : vector<64x8xbf16> to vector<8x8x8xbf16>
    "tpu.trace_start"() <{level = 10 : i32, message = "tld,tmd->tlm"}> : () -> ()
    %cst_10 = arith.constant dense<0.000000e+00> : vector<8x8x8xf32>
    %16 = tpu.matmul %11, %13, %cst_10 {dimension_numbers = #tpu.dot_dimension_numbers<[2], [2], [1], [1], [0, 0, 0, 1, 1, 1], [0], [0]>} : vector<8x8x8xbf16>, vector<8x8x8xbf16>, vector<8x8x8xf32> -> vector<8x8x8xf32>
    "tpu.trace_stop"() : () -> ()
    %17 = vector.broadcast %8 : vector<8x1x8xf32> to vector<8x8x8xf32>
    %18 = arith.addf %16, %17 : vector<8x8x8xf32>
    %cst_11 = arith.constant dense<0xFF800000> : vector<8x8xf32>
    %19 = vector.multi_reduction <maximumf>, %18, %cst_11 [2] : vector<8x8x8xf32> to vector<8x8xf32>
    %20 = vector.shape_cast %19 : vector<8x8xf32> to vector<8x8x1xf32>
    %21 = vector.broadcast %20 : vector<8x8x1xf32> to vector<8x8x8xf32>
    %22 = arith.subf %18, %21 : vector<8x8x8xf32>
    %23 = math.exp %22 : vector<8x8x8xf32>
    %cst_12 = arith.constant dense<0.000000e+00> : vector<8x8xf32>
    %24 = vector.multi_reduction <add>, %23, %cst_12 [2] : vector<8x8x8xf32> to vector<8x8xf32>
    %25 = vector.shape_cast %24 : vector<8x8xf32> to vector<8x8x1xf32>
    %26 = tpu.reciprocal %25 {approx = true} : vector<8x8x1xf32> -> vector<8x8x1xf32>
    %27 = vector.broadcast %26 : vector<8x8x1xf32> to vector<8x8x8xf32>
    %28 = arith.mulf %23, %27 : vector<8x8x8xf32>
    %29 = arith.truncf %28 : vector<8x8x8xf32> to vector<8x8x8xbf16>
    "tpu.trace_start"() <{level = 10 : i32, message = "tlm,tmd->tld"}> : () -> ()
    %cst_13 = arith.constant dense<0.000000e+00> : vector<8x8x8xf32>
    %30 = tpu.matmul %29, %15, %cst_13 {dimension_numbers = #tpu.dot_dimension_numbers<[2], [1], [1], [2], [0, 0, 0, 1, 1, 2], [0], [0]>} : vector<8x8x8xbf16>, vector<8x8x8xbf16>, vector<8x8x8xf32> -> vector<8x8x8xf32>
    "tpu.trace_stop"() : () -> ()
    %31 = arith.truncf %30 : vector<8x8x8xf32> to vector<8x8x8xbf16>
    %32 = vector.shape_cast %31 : vector<8x8x8xbf16> to vector<64x8xbf16>
    %c0_14 = arith.constant 0 : index
    %c0_15 = arith.constant 0 : index
    %c0_16 = arith.constant 0 : index
    %33 = vector.load %arg5[%c0_14, %c0_15, %c0_16] : memref<4x8x8xbf16, #tpu.memory_space<vmem>>, vector<1x8x8xbf16>
    %34 = vector.shape_cast %33 : vector<1x8x8xbf16> to vector<8x8xbf16>
    %cst_17 = arith.constant dense<0.000000e+00> : vector<64x8xf32>
    %35 = tpu.matmul %32, %34, %cst_17 {dimension_numbers = #tpu.dot_dimension_numbers<[1], [0], [0], [1], [0, 0, 1, 1], [], []>} : vector<64x8xbf16>, vector<8x8xbf16>, vector<64x8xf32> -> vector<64x8xf32>
    %36 = arith.addf %9, %35 : vector<64x8xf32>
    %37 = vector.extract_strided_slice %7 {offsets = [0, 8], sizes = [64, 8], strides = [1, 1]} : vector<64x96xbf16> to vector<64x8xbf16>
    %38 = vector.shape_cast %37 : vector<64x8xbf16> to vector<8x8x8xbf16>
    %39 = vector.extract_strided_slice %7 {offsets = [0, 40], sizes = [64, 8], strides = [1, 1]} : vector<64x96xbf16> to vector<64x8xbf16>
    %40 = vector.shape_cast %39 : vector<64x8xbf16> to vector<8x8x8xbf16>
    %41 = vector.extract_strided_slice %7 {offsets = [0, 72], sizes = [64, 8], strides = [1, 1]} : vector<64x96xbf16> to vector<64x8xbf16>
    %42 = vector.shape_cast %41 : vector<64x8xbf16> to vector<8x8x8xbf16>
    "tpu.trace_start"() <{level = 10 : i32, message = "tld,tmd->tlm"}> : () -> ()
    %cst_18 = arith.constant dense<0.000000e+00> : vector<8x8x8xf32>
    %43 = tpu.matmul %38, %40, %cst_18 {dimension_numbers = #tpu.dot_dimension_numbers<[2], [2], [1], [1], [0, 0, 0, 1, 1, 1], [0], [0]>} : vector<8x8x8xbf16>, vector<8x8x8xbf16>, vector<8x8x8xf32> -> vector<8x8x8xf32>
    "tpu.trace_stop"() : () -> ()
    %44 = vector.broadcast %8 : vector<8x1x8xf32> to vector<8x8x8xf32>
    %45 = arith.addf %43, %44 : vector<8x8x8xf32>
    %cst_19 = arith.constant dense<0xFF800000> : vector<8x8xf32>
    %46 = vector.multi_reduction <maximumf>, %45, %cst_19 [2] : vector<8x8x8xf32> to vector<8x8xf32>
    %47 = vector.shape_cast %46 : vector<8x8xf32> to vector<8x8x1xf32>
    %48 = vector.broadcast %47 : vector<8x8x1xf32> to vector<8x8x8xf32>
    %49 = arith.subf %45, %48 : vector<8x8x8xf32>
    %50 = math.exp %49 : vector<8x8x8xf32>
    %cst_20 = arith.constant dense<0.000000e+00> : vector<8x8xf32>
    %51 = vector.multi_reduction <add>, %50, %cst_20 [2] : vector<8x8x8xf32> to vector<8x8xf32>
    %52 = vector.shape_cast %51 : vector<8x8xf32> to vector<8x8x1xf32>
    %53 = tpu.reciprocal %52 {approx = true} : vector<8x8x1xf32> -> vector<8x8x1xf32>
    %54 = vector.broadcast %53 : vector<8x8x1xf32> to vector<8x8x8xf32>
    %55 = arith.mulf %50, %54 : vector<8x8x8xf32>
    %56 = arith.truncf %55 : vector<8x8x8xf32> to vector<8x8x8xbf16>
    "tpu.trace_start"() <{level = 10 : i32, message = "tlm,tmd->tld"}> : () -> ()
    %cst_21 = arith.constant dense<0.000000e+00> : vector<8x8x8xf32>
    %57 = tpu.matmul %56, %42, %cst_21 {dimension_numbers = #tpu.dot_dimension_numbers<[2], [1], [1], [2], [0, 0, 0, 1, 1, 2], [0], [0]>} : vector<8x8x8xbf16>, vector<8x8x8xbf16>, vector<8x8x8xf32> -> vector<8x8x8xf32>
    "tpu.trace_stop"() : () -> ()
    %58 = arith.truncf %57 : vector<8x8x8xf32> to vector<8x8x8xbf16>
    %59 = vector.shape_cast %58 : vector<8x8x8xbf16> to vector<64x8xbf16>
    %c1 = arith.constant 1 : index
    %c0_22 = arith.constant 0 : index
    %c0_23 = arith.constant 0 : index
    %60 = vector.load %arg5[%c1, %c0_22, %c0_23] : memref<4x8x8xbf16, #tpu.memory_space<vmem>>, vector<1x8x8xbf16>
    %61 = vector.shape_cast %60 : vector<1x8x8xbf16> to vector<8x8xbf16>
    %cst_24 = arith.constant dense<0.000000e+00> : vector<64x8xf32>
    %62 = tpu.matmul %59, %61, %cst_24 {dimension_numbers = #tpu.dot_dimension_numbers<[1], [0], [0], [1], [0, 0, 1, 1], [], []>} : vector<64x8xbf16>, vector<8x8xbf16>, vector<64x8xf32> -> vector<64x8xf32>
    %63 = arith.addf %36, %62 : vector<64x8xf32>
    %64 = vector.extract_strided_slice %7 {offsets = [0, 16], sizes = [64, 8], strides = [1, 1]} : vector<64x96xbf16> to vector<64x8xbf16>
    %65 = vector.shape_cast %64 : vector<64x8xbf16> to vector<8x8x8xbf16>
    %66 = vector.extract_strided_slice %7 {offsets = [0, 48], sizes = [64, 8], strides = [1, 1]} : vector<64x96xbf16> to vector<64x8xbf16>
    %67 = vector.shape_cast %66 : vector<64x8xbf16> to vector<8x8x8xbf16>
    %68 = vector.extract_strided_slice %7 {offsets = [0, 80], sizes = [64, 8], strides = [1, 1]} : vector<64x96xbf16> to vector<64x8xbf16>
    %69 = vector.shape_cast %68 : vector<64x8xbf16> to vector<8x8x8xbf16>
    "tpu.trace_start"() <{level = 10 : i32, message = "tld,tmd->tlm"}> : () -> ()
    %cst_25 = arith.constant dense<0.000000e+00> : vector<8x8x8xf32>
    %70 = tpu.matmul %65, %67, %cst_25 {dimension_numbers = #tpu.dot_dimension_numbers<[2], [2], [1], [1], [0, 0, 0, 1, 1, 1], [0], [0]>} : vector<8x8x8xbf16>, vector<8x8x8xbf16>, vector<8x8x8xf32> -> vector<8x8x8xf32>
    "tpu.trace_stop"() : () -> ()
    %71 = vector.broadcast %8 : vector<8x1x8xf32> to vector<8x8x8xf32>
    %72 = arith.addf %70, %71 : vector<8x8x8xf32>
    %cst_26 = arith.constant dense<0xFF800000> : vector<8x8xf32>
    %73 = vector.multi_reduction <maximumf>, %72, %cst_26 [2] : vector<8x8x8xf32> to vector<8x8xf32>
    %74 = vector.shape_cast %73 : vector<8x8xf32> to vector<8x8x1xf32>
    %75 = vector.broadcast %74 : vector<8x8x1xf32> to vector<8x8x8xf32>
    %76 = arith.subf %72, %75 : vector<8x8x8xf32>
    %77 = math.exp %76 : vector<8x8x8xf32>
    %cst_27 = arith.constant dense<0.000000e+00> : vector<8x8xf32>
    %78 = vector.multi_reduction <add>, %77, %cst_27 [2] : vector<8x8x8xf32> to vector<8x8xf32>
    %79 = vector.shape_cast %78 : vector<8x8xf32> to vector<8x8x1xf32>
    %80 = tpu.reciprocal %79 {approx = true} : vector<8x8x1xf32> -> vector<8x8x1xf32>
    %81 = vector.broadcast %80 : vector<8x8x1xf32> to vector<8x8x8xf32>
    %82 = arith.mulf %77, %81 : vector<8x8x8xf32>
    %83 = arith.truncf %82 : vector<8x8x8xf32> to vector<8x8x8xbf16>
    "tpu.trace_start"() <{level = 10 : i32, message = "tlm,tmd->tld"}> : () -> ()
    %cst_28 = arith.constant dense<0.000000e+00> : vector<8x8x8xf32>
    %84 = tpu.matmul %83, %69, %cst_28 {dimension_numbers = #tpu.dot_dimension_numbers<[2], [1], [1], [2], [0, 0, 0, 1, 1, 2], [0], [0]>} : vector<8x8x8xbf16>, vector<8x8x8xbf16>, vector<8x8x8xf32> -> vector<8x8x8xf32>
    "tpu.trace_stop"() : () -> ()
    %85 = arith.truncf %84 : vector<8x8x8xf32> to vector<8x8x8xbf16>
    %86 = vector.shape_cast %85 : vector<8x8x8xbf16> to vector<64x8xbf16>
    %c2 = arith.constant 2 : index
    %c0_29 = arith.constant 0 : index
    %c0_30 = arith.constant 0 : index
    %87 = vector.load %arg5[%c2, %c0_29, %c0_30] : memref<4x8x8xbf16, #tpu.memory_space<vmem>>, vector<1x8x8xbf16>
    %88 = vector.shape_cast %87 : vector<1x8x8xbf16> to vector<8x8xbf16>
    %cst_31 = arith.constant dense<0.000000e+00> : vector<64x8xf32>
    %89 = tpu.matmul %86, %88, %cst_31 {dimension_numbers = #tpu.dot_dimension_numbers<[1], [0], [0], [1], [0, 0, 1, 1], [], []>} : vector<64x8xbf16>, vector<8x8xbf16>, vector<64x8xf32> -> vector<64x8xf32>
    %90 = arith.addf %63, %89 : vector<64x8xf32>
    %91 = vector.extract_strided_slice %7 {offsets = [0, 24], sizes = [64, 8], strides = [1, 1]} : vector<64x96xbf16> to vector<64x8xbf16>
    %92 = vector.shape_cast %91 : vector<64x8xbf16> to vector<8x8x8xbf16>
    %93 = vector.extract_strided_slice %7 {offsets = [0, 56], sizes = [64, 8], strides = [1, 1]} : vector<64x96xbf16> to vector<64x8xbf16>
    %94 = vector.shape_cast %93 : vector<64x8xbf16> to vector<8x8x8xbf16>
    %95 = vector.extract_strided_slice %7 {offsets = [0, 88], sizes = [64, 8], strides = [1, 1]} : vector<64x96xbf16> to vector<64x8xbf16>
    %96 = vector.shape_cast %95 : vector<64x8xbf16> to vector<8x8x8xbf16>
    "tpu.trace_start"() <{level = 10 : i32, message = "tld,tmd->tlm"}> : () -> ()
    %cst_32 = arith.constant dense<0.000000e+00> : vector<8x8x8xf32>
    %97 = tpu.matmul %92, %94, %cst_32 {dimension_numbers = #tpu.dot_dimension_numbers<[2], [2], [1], [1], [0, 0, 0, 1, 1, 1], [0], [0]>} : vector<8x8x8xbf16>, vector<8x8x8xbf16>, vector<8x8x8xf32> -> vector<8x8x8xf32>
    "tpu.trace_stop"() : () -> ()
    %98 = vector.broadcast %8 : vector<8x1x8xf32> to vector<8x8x8xf32>
    %99 = arith.addf %97, %98 : vector<8x8x8xf32>
    %cst_33 = arith.constant dense<0xFF800000> : vector<8x8xf32>
    %100 = vector.multi_reduction <maximumf>, %99, %cst_33 [2] : vector<8x8x8xf32> to vector<8x8xf32>
    %101 = vector.shape_cast %100 : vector<8x8xf32> to vector<8x8x1xf32>
    %102 = vector.broadcast %101 : vector<8x8x1xf32> to vector<8x8x8xf32>
    %103 = arith.subf %99, %102 : vector<8x8x8xf32>
    %104 = math.exp %103 : vector<8x8x8xf32>
    %cst_34 = arith.constant dense<0.000000e+00> : vector<8x8xf32>
    %105 = vector.multi_reduction <add>, %104, %cst_34 [2] : vector<8x8x8xf32> to vector<8x8xf32>
    %106 = vector.shape_cast %105 : vector<8x8xf32> to vector<8x8x1xf32>
    %107 = tpu.reciprocal %106 {approx = true} : vector<8x8x1xf32> -> vector<8x8x1xf32>
    %108 = vector.broadcast %107 : vector<8x8x1xf32> to vector<8x8x8xf32>
    %109 = arith.mulf %104, %108 : vector<8x8x8xf32>
    %110 = arith.truncf %109 : vector<8x8x8xf32> to vector<8x8x8xbf16>
    "tpu.trace_start"() <{level = 10 : i32, message = "tlm,tmd->tld"}> : () -> ()
    %cst_35 = arith.constant dense<0.000000e+00> : vector<8x8x8xf32>
    %111 = tpu.matmul %110, %96, %cst_35 {dimension_numbers = #tpu.dot_dimension_numbers<[2], [1], [1], [2], [0, 0, 0, 1, 1, 2], [0], [0]>} : vector<8x8x8xbf16>, vector<8x8x8xbf16>, vector<8x8x8xf32> -> vector<8x8x8xf32>
    "tpu.trace_stop"() : () -> ()
    %112 = arith.truncf %111 : vector<8x8x8xf32> to vector<8x8x8xbf16>
    %113 = vector.shape_cast %112 : vector<8x8x8xbf16> to vector<64x8xbf16>
    %c3 = arith.constant 3 : index
    %c0_36 = arith.constant 0 : index
    %c0_37 = arith.constant 0 : index
    %114 = vector.load %arg5[%c3, %c0_36, %c0_37] : memref<4x8x8xbf16, #tpu.memory_space<vmem>>, vector<1x8x8xbf16>
    %115 = vector.shape_cast %114 : vector<1x8x8xbf16> to vector<8x8xbf16>
    %cst_38 = arith.constant dense<0.000000e+00> : vector<64x8xf32>
    %116 = tpu.matmul %113, %115, %cst_38 {dimension_numbers = #tpu.dot_dimension_numbers<[1], [0], [0], [1], [0, 0, 1, 1], [], []>} : vector<64x8xbf16>, vector<8x8xbf16>, vector<64x8xf32> -> vector<64x8xf32>
    %117 = arith.addf %90, %116 : vector<64x8xf32>
    %c0_39 = arith.constant 0 : index
    %c0_40 = arith.constant 0 : index
    %118 = vector.load %arg6[%c0_39, %c0_40] : memref<1x8xf32, #tpu.memory_space<vmem>>, vector<1x8xf32>
    %119 = vector.broadcast %118 : vector<1x8xf32> to vector<64x8xf32>
    %120 = arith.addf %117, %119 : vector<64x8xf32>
    %121 = math.tanh %120 : vector<64x8xf32>
    %c0_41 = arith.constant 0 : index
    %c0_42 = arith.constant 0 : index
    %122 = vector.load %arg7[%c0_41, %c0_42] : memref<1x8xf32, #tpu.memory_space<vmem>>, vector<1x8xf32>
    %123 = vector.broadcast %122 : vector<1x8xf32> to vector<64x8xf32>
    %124 = arith.mulf %121, %123 : vector<64x8xf32>
    %cst_43 = arith.constant dense<0.000000e+00> : vector<64xf32>
    %125 = vector.multi_reduction <add>, %124, %cst_43 [1] : vector<64x8xf32> to vector<64xf32>
    %126 = vector.shape_cast %125 : vector<64xf32> to vector<64x1xf32>
    %127 = vector.shape_cast %126 : vector<64x1xf32> to vector<8x8x1xf32>
    %cst_44 = arith.constant dense<0xFF800000> : vector<8x1xf32>
    %128 = vector.multi_reduction <maximumf>, %127, %cst_44 [1] : vector<8x8x1xf32> to vector<8x1xf32>
    %129 = vector.shape_cast %128 : vector<8x1xf32> to vector<8x1x1xf32>
    %130 = vector.broadcast %129 : vector<8x1x1xf32> to vector<8x8x1xf32>
    %131 = arith.subf %127, %130 : vector<8x8x1xf32>
    %132 = math.exp %131 : vector<8x8x1xf32>
    %cst_45 = arith.constant dense<0.000000e+00> : vector<8x1xf32>
    %133 = vector.multi_reduction <add>, %132, %cst_45 [1] : vector<8x8x1xf32> to vector<8x1xf32>
    %134 = vector.shape_cast %133 : vector<8x1xf32> to vector<8x1x1xf32>
    %135 = tpu.reciprocal %134 {approx = true} : vector<8x1x1xf32> -> vector<8x1x1xf32>
    %136 = vector.broadcast %135 : vector<8x1x1xf32> to vector<8x8x1xf32>
    %137 = arith.mulf %132, %136 : vector<8x8x1xf32>
    %138 = arith.extf %31 : vector<8x8x8xbf16> to vector<8x8x8xf32>
    %139 = vector.broadcast %137 : vector<8x8x1xf32> to vector<8x8x8xf32>
    %140 = arith.mulf %138, %139 : vector<8x8x8xf32>
    %cst_46 = arith.constant dense<0.000000e+00> : vector<8x8xf32>
    %141 = vector.multi_reduction <add>, %140, %cst_46 [1] : vector<8x8x8xf32> to vector<8x8xf32>
    %142 = arith.extf %58 : vector<8x8x8xbf16> to vector<8x8x8xf32>
    %143 = vector.broadcast %137 : vector<8x8x1xf32> to vector<8x8x8xf32>
    %144 = arith.mulf %142, %143 : vector<8x8x8xf32>
    %cst_47 = arith.constant dense<0.000000e+00> : vector<8x8xf32>
    %145 = vector.multi_reduction <add>, %144, %cst_47 [1] : vector<8x8x8xf32> to vector<8x8xf32>
    %146 = arith.extf %85 : vector<8x8x8xbf16> to vector<8x8x8xf32>
    %147 = vector.broadcast %137 : vector<8x8x1xf32> to vector<8x8x8xf32>
    %148 = arith.mulf %146, %147 : vector<8x8x8xf32>
    %cst_48 = arith.constant dense<0.000000e+00> : vector<8x8xf32>
    %149 = vector.multi_reduction <add>, %148, %cst_48 [1] : vector<8x8x8xf32> to vector<8x8xf32>
    %150 = arith.extf %112 : vector<8x8x8xbf16> to vector<8x8x8xf32>
    %151 = vector.broadcast %137 : vector<8x8x1xf32> to vector<8x8x8xf32>
    %152 = arith.mulf %150, %151 : vector<8x8x8xf32>
    %cst_49 = arith.constant dense<0.000000e+00> : vector<8x8xf32>
    %153 = vector.multi_reduction <add>, %152, %cst_49 [1] : vector<8x8x8xf32> to vector<8x8xf32>
    %154 = tpu.concatenate %141, %145, %149, %153 in 1 : vector<8x8xf32>, vector<8x8xf32>, vector<8x8xf32>, vector<8x8xf32> -> vector<8x32xf32>
    %c0_50 = arith.constant 0 : index
    %c0_51 = arith.constant 0 : index
    %155 = vector.load %arg8[%c0_50, %c0_51] : memref<8x32xf32, #tpu.memory_space<vmem>>, vector<8x32xf32>
    tpu.vector_store %arg8[%c0_50, %c0_51], %154 {strides = array<i32>} : memref<8x32xf32, #tpu.memory_space<vmem>>, vector<8x32xf32>,
    return
  }
  func.func @transform_0(%arg0: i32) -> (i32, i32, i32) {
    %c0_i32 = arith.constant 0 : i32
    %c0_i32_0 = arith.constant 0 : i32
    %c0_i32_1 = arith.constant 0 : i32
    return %arg0, %c0_i32, %c0_i32_0 : i32, i32, i32
  }
  func.func @transform_1(%arg0: i32) -> (i32, i32, i32) {
    %c0_i32 = arith.constant 0 : i32
    %c0_i32_0 = arith.constant 0 : i32
    %c0_i32_1 = arith.constant 0 : i32
    return %arg0, %c0_i32, %c0_i32_0 : i32, i32, i32
  }
  func.func @transform_2(%arg0: i32) -> (i32, i32) {
    %c0_i32 = arith.constant 0 : i32
    %c0_i32_0 = arith.constant 0 : i32
    %c0_i32_1 = arith.constant 0 : i32
    return %c0_i32, %c0_i32_0 : i32, i32
  }
  func.func @transform_3(%arg0: i32) -> (i32, i32) {
    %c0_i32 = arith.constant 0 : i32
    %c0_i32_0 = arith.constant 0 : i32
    %c0_i32_1 = arith.constant 0 : i32
    return %c0_i32, %c0_i32_0 : i32, i32
  }
  func.func @transform_4(%arg0: i32) -> (i32, i32, i32) {
    %c0_i32 = arith.constant 0 : i32
    %c0_i32_0 = arith.constant 0 : i32
    %c0_i32_1 = arith.constant 0 : i32
    %c0_i32_2 = arith.constant 0 : i32
    return %c0_i32, %c0_i32_0, %c0_i32_1 : i32, i32, i32
  }
  func.func @transform_5(%arg0: i32) -> (i32, i32) {
    %c0_i32 = arith.constant 0 : i32
    %c0_i32_0 = arith.constant 0 : i32
    %c0_i32_1 = arith.constant 0 : i32
    return %c0_i32, %c0_i32_0 : i32, i32
  }
  func.func @transform_6(%arg0: i32) -> (i32, i32) {
    %c0_i32 = arith.constant 0 : i32
    %c0_i32_0 = arith.constant 0 : i32
    %c0_i32_1 = arith.constant 0 : i32
    return %c0_i32, %c0_i32_0 : i32, i32
  }
  func.func @transform_7(%arg0: i32) -> (i32, i32) {
    %c0_i32 = arith.constant 0 : i32
    %c0_i32_0 = arith.constant 0 : i32
    return %arg0, %c0_i32 : i32, i32
  }
}

</mosaic_0001>

<bundles_post_ra>
// kernel: tpu_custom_call.1
= control target key start
LH: loop header
LB: loop body
LE: loop exit
PB: predicated region body
PF: predicated region fallthrough
CT: control target
= control target key end

     0   :  { %12 = vsyncpa [#allocation3], 0  ;;  %s7342_s0 = inlined_call_operand.hbm [shape: bf16[8,8,32], index: 0, kind: input, shape index: {}]   ;;  %s7343_s1 = inlined_call_operand.hbm [shape: f32[8,1,8], index: 1, kind: input, shape index: {}]   ;;  %s7344_s2 = inlined_call_operand.hbm [shape: bf16[32,96], index: 2, kind: input, shape index: {}]   ;;  %s7345_s3 = inlined_call_operand.vmem [shape: f32[1,96], index: 3, kind: input, shape index: {}]   ;;  %s7346_s4 = inlined_call_operand.hbm [shape: bf16[4,8,8], index: 4, kind: input, shape index: {}]   ;;  %s7347_s5 = inlined_call_operand.vmem [shape: f32[1,8], index: 5, kind: input, shape index: {}]   ;;  %s7348_s6 = inlined_call_operand.vmem [shape: f32[1,8], index: 6, kind: input, shape index: {}]   ;;  %s7349_s7 = inlined_call_operand.hbm [shape: f32[8,32], index: 7, kind: output, shape index: {}]  }
   0x1   :  { %13 = vsyncpa [#allocation6], 0 }
   0x2   :  { %14 = vsyncpa [#allocation9], 0 }
   0x3   :  { %15 = vsyncpa [#allocation4], 0  ;;  %s5941_s24 = smov [#allocation5]   ;;  %s5823_s28 = scalar_lea.hbm %s7343_s1, 128 }
   0x4   :  { %s33_s25 = sshll.u32 %s5941_s24, 4  ;;  %p5824_p0 = scmp.ne.s32.totalorder %s7343_s1, %s5823_s28  ;;  %s34_s25 = int_to_ptr.vmem [resolvable:$true] %s33_s25 }
   0x5   :  { %p5827_p1 = scmp.lt.u32.totalorder %s5823_s28, %s7343_s1 }
   0x7   :  { %p5829_p2 = pnand %p5827_p1, %p5824_p0 }
   0x9   :  { %5832 = shalt.err (!%p5829_p2)
}
   0xa   :  { %s5833_s10 = scalar_lea.vmem %s34_s25, 128  ;;  %p5838_p4 = scmp.lt.s32.totalorder %s34_s25, %s34_s25 }
   0xb   :  { %p5834_p3 = scmp.ne.s32.totalorder %s34_s25, %s5833_s10  ;;  %p5839_p5 = scmp.lt.s32.totalorder %s5833_s10, %s5833_s10 }
   0xd   :  { %p5840_p6 = por %p5839_p5, %p5838_p4 }
   0xf   :  { %p5841_p7 = pnand %p5840_p6, %p5834_p3 }
  0x11   :  { %5844 = shalt.err (!%p5841_p7)
}
  0x12   :  { %s5942_s11 = smov 16   ;;  %s5943_s12 = smov 1  }
  0x13   :  { %39 = dma.hbm_to_vmem [thread:$0]  %s7343_s1, 128, %s34_s25, [#allocation6], %s5942_s11, %s5942_s11, %s5943_s12  }
  0x14   :  { %s5944_s15 = smov [#allocation2]   ;;  %s5845_s19 = scalar_lea.hbm %s7342_s0, 512 }
  0x15   :  { %s21_s16 = sshll.u32 %s5944_s15, 4  ;;  %p5846_p8 = scmp.ne.s32.totalorder %s7342_s0, %s5845_s19  ;;  %s22_s16 = int_to_ptr.vmem [resolvable:$true] %s21_s16 }
  0x16   :  { %p5849_p9 = scmp.lt.u32.totalorder %s5845_s19, %s7342_s0 }
  0x18   :  { %p5851_p10 = pnand %p5849_p9, %p5846_p8 }
  0x1a   :  { %5854 = shalt.err (!%p5851_p10)
}
  0x1b   :  { %s5855_s24 = scalar_lea.vmem %s22_s16, 512  ;;  %p5860_p12 = scmp.lt.s32.totalorder %s22_s16, %s22_s16 }
  0x1c   :  { %p5856_p11 = scmp.ne.s32.totalorder %s22_s16, %s5855_s24  ;;  %p5861_p13 = scmp.lt.s32.totalorder %s5855_s24, %s5855_s24 }
  0x1e   :  { %p5862_p0 = por %p5861_p13, %p5860_p12 }
  0x20   :  { %p5863_p1 = pnand %p5862_p0, %p5856_p11 }
  0x22   :  { %5866 = shalt.err (!%p5863_p1)
}
  0x23   :  { %s5945_s1 = smov 64   ;;  %s5946_s25 = smov 4  }
  0x24   :  { %27 = dma.hbm_to_vmem [thread:$0]  %s7342_s0, 512, %s22_s16, [#allocation3], %s5945_s1, %s5945_s1, %s5946_s25  }
  0x25   :  { %s5947_s28 = smov [#allocation7]   ;;  %s5948_s30 = smov [#allocation8]  }
  0x26   :  { %s45_s29 = sshll.u32 %s5947_s28, 4  ;;  %s59_s8 = sshll.u32 %s5948_s30, 4  ;;  %s46_s29 = int_to_ptr.vmem [resolvable:$true] %s45_s29  ;;  %s6033_s8 = int_to_ptr.vmem [resolvable:$true] %s59_s8 }
  0x27   :  { %s5867_s12 = scalar_lea.hbm %s7344_s2, 256 }
  0x28   :  { %p5868_p2 = scmp.ne.s32.totalorder %s7344_s2, %s5867_s12  ;;  %p5871_p3 = scmp.lt.u32.totalorder %s5867_s12, %s7344_s2 }
  0x2a   :  { %p5873_p4 = pnand %p5871_p3, %p5868_p2 }
  0x2c   :  { %5876 = shalt.err (!%p5873_p4)
}
  0x2d   :  { %s5877_s0 = scalar_lea.vmem %s46_s29, 256  ;;  %p5882_p6 = scmp.lt.s32.totalorder %s46_s29, %s46_s29 }
  0x2e   :  { %p5878_p5 = scmp.ne.s32.totalorder %s46_s29, %s5877_s0  ;;  %p5883_p7 = scmp.lt.s32.totalorder %s5877_s0, %s5877_s0 }
  0x30   :  { %p5884_p8 = por %p5883_p7, %p5882_p6 }
  0x32   :  { %p5885_p9 = pnand %p5884_p8, %p5878_p5 }
  0x34   :  { %5888 = shalt.err (!%p5885_p9)
}
  0x35   :  { %51 = dma.hbm_to_vmem [thread:$0]  %s7344_s2, 256, %s46_s29, [#allocation6], %s5945_s1, %s5945_s1, %s5946_s25  }
  0x36   :  { %s5889_s21 = scalar_lea.hbm %s7346_s4, 256 }
  0x37   :  { %p5890_p10 = scmp.ne.s32.totalorder %s7346_s4, %s5889_s21  ;;  %p5893_p11 = scmp.lt.u32.totalorder %s5889_s21, %s7346_s4 }
  0x39   :  { %p5895_p12 = pnand %p5893_p11, %p5890_p10 }
  0x3b   :  { %5898 = shalt.err (!%p5895_p12)
}
  0x3c   :  { %s5899_s27 = scalar_lea.vmem %s6033_s8, 256  ;;  %p5904_p0 = scmp.lt.s32.totalorder %s6033_s8, %s6033_s8 }
  0x3d   :  { %p5900_p13 = scmp.ne.s32.totalorder %s6033_s8, %s5899_s27  ;;  %p5905_p1 = scmp.lt.s32.totalorder %s5899_s27, %s5899_s27 }
  0x3f   :  { %p5906_p2 = por %p5905_p1, %p5904_p0 }
  0x41   :  { %p5907_p3 = pnand %p5906_p2, %p5900_p13 }
  0x43   :  { %5910 = shalt.err (!%p5907_p3)
}
  0x44   :  { %65 = dma.hbm_to_vmem [thread:$0]  %s7346_s4, 256, %s6033_s8, [#allocation9], %s5945_s1, %s5945_s1, %s5946_s25  }
  0x45   :  { %5933 = dma.done.wait [#allocation3], 512  }
  0x46   :  { %5934 = vsyncadd [#allocation3], 4294966784 }
  0x47   :  { %5935 = dma.done.wait [#allocation6], 384  }
  0x48   :  { %5936 = vsyncadd [#allocation6], 4294966912 }
  0x49   :  { %5937 = dma.done.wait [#allocation9], 256  }
  0x4a   :  { %5938 = vsyncadd [#allocation9], 4294967040  ;;  %v5633_v0 = vld [vmem:[#allocation7] sm:$0xff]   ;;  %v5634_v1 = vld [vmem:[#allocation7 + $0x8] sm:$0xff]   ;;  %vm134_vm0 = vcmask 261120   ;;  %v5949_v6 = vmov 0.0  }
  0x4b   :  { %5142 = vmatprep.subr.bf16.mxu0 %v5633_v0  ;;  %v5635_v2 = vld [vmem:[#allocation2] sm:$0xff]   ;;  %5578 = vmatprep.subr.bf16.mxu1 %v5633_v0  ;;  %v5637_v3 = vld [vmem:[#allocation2 + $0x10] sm:$0xff]   ;;  %v5636_v4 = vld [vmem:[#allocation2 + $0x8] sm:$0xff]   ;;  %vm5950_vm1 = vmmov 0   ;;  %vm294_vm2 = vcmask 64512   ;;  %vm778_vm3 = vcmask 1043456  }
  0x4c   :  { %5143 = vmatpush3.bf16.msra.mxu0 %v5633_v0  ;;  %5580 = vmatpush3.bf16.msra.mxu1 %v5633_v0  ;;  %v5638_v5 = vld [vmem:[#allocation2 + $0x18] sm:$0xff]   ;;  %v4839_v7 = vld [vmem:[%s7345_s3] ss:$0 sm:$0xff]  ;;  %s5951_s3 = smov 96   ;;  %v6155_v48 = vld [vmem:[#allocation5 + $0x2] ss:$0 sm:$0xff] }
  0x4d   :  { %5144 = vmatprep.subr.bf16.mxu0 %v5634_v1  ;;  %5146 = vmatprep.mubr.msk.bf16.mxu0 %vm134_vm0, %v5635_v2  ;;  %v6157_v50 = vld [vmem:[#allocation5] ss:$0 sm:$0xff]  ;;  %v6169_v62 = vld [vmem:[#allocation5 + $0x4] ss:$0 sm:$0xff]  ;;  %v6171_v63 = vld [vmem:[#allocation5 + $0x1] ss:$0 sm:$0xff] }
  0x4e   :  { %5579 = vmatprep.subr.bf16.mxu1 %v5634_v1  ;;  %5150 = vmatprep.mubr.msk.bf16.mxu1 %vm134_vm0, %v5637_v3  ;;  %s5952_s29 = smov 88   ;;  %s5953_s30 = smov 120   ;;  %vm4747_vm4 = vcmask 1041409   ;;  %vm4749_vm5 = vcmask 1042434   ;;  %vm4751_vm6 = vcmask 1043459   ;;  %vm4753_vm7 = vcmask 1044484  }
  0x4f   :  { %s5955_s8 = smov 112   ;;  %s5956_s9 = smov 80   ;;  %vm4755_vm8 = vcmask 1045509   ;;  %vm4757_vm9 = vcmask 1046534   ;;  %vm4759_vm10 = vcmask 1047559   ;;  %vm4817_vm11 = vcmask 130048  }
  0x50   :  { %5145 = vmatpush3.bf16.msra.mxu0 %v5634_v1  ;;  %5581 = vmatpush3.bf16.msra.mxu1 %v5634_v1  ;;  %s5957_s10 = smov 48   ;;  %s5958_s12 = smov 72   ;;  %vm4819_vm12 = vcmask 195584  }
  0x51   :  { %5166 = vmatprep.subr.bf16.mxu0 %v5949_v6  ;;  %5154 = vmatprep.subr.bf16.mxu1 %v5949_v6  ;;  %s5959_s13 = smov 104   ;;  %s5960_s14 = smov 40  }
  0x53   :  { %5147 = vmatmul.mubr.msk.bf16.vlgmr.msra.gmra.mrb[0].mxu0 %vm134_vm0, %v5636_v4  ;;  %5151 = vmatmul.mubr.msk.bf16.vlgmr.msra.gmra.mrb[0].mxu1 %vm134_vm0, %v5638_v5 }
  0x54   :  { %5168 = vmatprep.mubr.msk.bf16.mxu0 %vm5950_vm1, %v5949_v6  ;;  %5156 = vmatprep.mubr.msk.bf16.mxu1 %vm5950_vm1, %v5949_v6 }
 0x126   :  { %v5148_v8 = vpop.f32.mrb[0].mxu0  ;;  %v5152_v9 = vpop.f32.mrb[0].mxu1 }
 0x127   :  { %v190_v10 = vadd.f32 %v5148_v8, %v4839_v7  ;;  %v181_v11 = vpop.f32.mrb[1].mxu0  ;;  %v197_v12 = vpop.f32.mrb[1].mxu1  ;;  %v206_v28 = vadd.f32 %v5152_v9, %v4839_v7 }
 0x128   :  { %v182_v13 = vadd.f32 %v4839_v7, %v181_v11  ;;  %v5149_v14 = vpop.f32.mrb[2].mxu0  ;;  %v5153_v15 = vpop.f32.mrb[2].mxu1  ;;  %v198_v23 = vadd.f32 %v4839_v7, %v197_v12 }
 0x129   :  { %v6083_v16 = vpack.c.bf16 %v190_v10, %v190_v10  ;;  %v193_v17 = vadd.f32 %v5149_v14, %v4839_v7  ;;  %v184_v18 = vpop.f32.mrb[3].mxu0  ;;  %v200_v19 = vpop.f32.mrb[3].mxu1  ;;  %v209_v26 = vadd.f32 %v5153_v15, %v4839_v7  ;;  %v6102_v31 = vpack.c.bf16 %v206_v28, %v206_v28 }
 0x12a   :  { %v6085_v20 = vpack.c.bf16 %v182_v13, %v182_v13  ;;  %v185_v21 = vadd.f32 %v4839_v7, %v184_v18  ;;  %v201_v22 = vadd.f32 %v4839_v7, %v200_v19  ;;  %v6096_v29 = vpack.c.bf16 %v198_v23, %v198_v23 }
 0x12b   :  { %389 = vrot.lane.b32.xlu1 %v6083_v16, %s5951_s3  ;;  %v6089_v24 = vpack.c.bf16 %v193_v17, %v193_v17  ;;  %v6099_v30 = vpack.c.bf16 %v209_v26, %v209_v26 }
 0x12c   :  { %292 = vrot.lane.b32.xlu0 %v6085_v20, %s5951_s3  ;;  %v6091_v25 = vpack.c.bf16 %v185_v21, %v185_v21  ;;  %v6094_v27 = vpack.c.bf16 %v201_v22, %v201_v22 }
 0x12f   :  { %437 = vrot.lane.b32.xlu1 %v6089_v24, %s5951_s3 }
 0x130   :  { %341 = vrot.lane.b32.xlu0 %v6091_v25, %s5951_s3 }
 0x133   :  { %533 = vrot.lane.b32.xlu1 %v6094_v27, %s5951_s3 }
 0x134   :  { %485 = vrot.lane.b32.xlu0 %v6096_v29, %s5951_s3 }
 0x137   :  { %629 = vrot.lane.b32.xlu1 %v6099_v30, %s5951_s3 }
 0x138   :  { %581 = vrot.lane.b32.xlu0 %v6102_v31, %s5951_s3 }
 0x19d   :  { %v390_v32 = vpop.permute.xlu1 %389 }
 0x19e   :  { %v395_v33 = vsel %vm294_vm2, %v390_v32, 0  ;;  %v293_v34 = vpop.permute.xlu0 %292 }
 0x19f   :  { %v299_v35 = vsel %vm294_vm2, %v293_v34, 0  ;;  %5167 = vmatpush3.bf16.xpose.msra.mxu0 %v395_v33 }
 0x1a0   :  { %5155 = vmatpush3.bf16.xpose.msra.mxu1 %v299_v35  ;;  %5178 = vmatprep.subr.bf16.mxu0 %v5949_v6 }
 0x1a1   :  { %5160 = vmatprep.subr.bf16.mxu1 %v5949_v6  ;;  %v438_v41 = vpop.permute.xlu1 %437 }
 0x1a2   :  { %v342_v36 = vpop.permute.xlu0 %341  ;;  %v443_v43 = vsel %vm294_vm2, %v438_v41, 0 }
 0x1a3   :  { %v347_v38 = vsel %vm294_vm2, %v342_v36, 0 }
 0x1a5   :  { %v534_v44 = vpop.permute.xlu1 %533 }
 0x1a6   :  { %5169 = vmatmul.mubr.msk.bf16.vlgmr.msra.gmra.mrb[4].mxu0 %vm294_vm2, %v6083_v16  ;;  %v486_v37 = vpop.permute.xlu0 %485  ;;  %v539_v45 = vsel %vm294_vm2, %v534_v44, 0 }
 0x1a7   :  { %v491_v39 = vsel %vm294_vm2, %v486_v37, 0  ;;  %5157 = vmatmul.mubr.msk.bf16.vlgmr.msra.gmra.mrb[4].mxu1 %vm294_vm2, %v6085_v20  ;;  %5180 = vmatprep.mubr.msk.bf16.mxu0 %vm5950_vm1, %v5949_v6  ;;  %v6187_v37 = vld [vmem:[#allocation5 + $0x3] ss:$0 sm:$0xff] }
 0x1a8   :  { %5161 = vmatpush3.bf16.xpose.msra.mxu1 %v347_v38  ;;  %5179 = vmatpush3.bf16.xpose.msra.mxu0 %v491_v39  ;;  %v6190_v39 = vld [vmem:[#allocation5 + $0x5] ss:$0 sm:$0xff] }
 0x1a9   :  { %5162 = vmatprep.mubr.msk.bf16.mxu1 %vm5950_vm1, %v5949_v6  ;;  %5172 = vmatprep.subr.bf16.mxu1 %v5949_v6  ;;  %v630_v46 = vpop.permute.xlu1 %629 }
 0x1aa   :  { %v582_v40 = vpop.permute.xlu0 %581  ;;  %5190 = vmatprep.subr.bf16.mxu0 %v5949_v6  ;;  %v635_v47 = vsel %vm294_vm2, %v630_v46, 0 }
 0x1ab   :  { %v587_v42 = vsel %vm294_vm2, %v582_v40, 0 }
 0x1af   :  { %5163 = vmatmul.mubr.msk.bf16.vlgmr.msra.gmra.mrb[8].mxu1 %vm294_vm2, %v6091_v25  ;;  %5181 = vmatmul.mubr.msk.bf16.vlgmr.msra.gmra.mrb[8].mxu0 %vm294_vm2, %v6096_v29 }
 0x1b0   :  { %5173 = vmatpush3.bf16.xpose.msra.mxu1 %v443_v43  ;;  %5191 = vmatpush3.bf16.xpose.msra.mxu0 %v587_v42  ;;  %v6194_v42 = vld [vmem:[#allocation5 + $0x7] ss:$0 sm:$0xff]  ;;  %v6196_v43 = vld [vmem:[#allocation5 + $0x6] ss:$0 sm:$0xff] }
 0x1b1   :  { %5174 = vmatprep.mubr.msk.bf16.mxu1 %vm5950_vm1, %v5949_v6  ;;  %5192 = vmatprep.mubr.msk.bf16.mxu0 %vm5950_vm1, %v5949_v6 }
 0x1b2   :  { %5184 = vmatprep.subr.bf16.mxu1 %v5949_v6  ;;  %5202 = vmatprep.subr.bf16.mxu0 %v5949_v6 }
 0x1b7   :  { %5175 = vmatmul.mubr.msk.bf16.vlgmr.msra.gmra.mrb[12].mxu1 %vm294_vm2, %v6089_v24  ;;  %5193 = vmatmul.mubr.msk.bf16.vlgmr.msra.gmra.mrb[12].mxu0 %vm294_vm2, %v6102_v31 }
 0x1b8   :  { %5185 = vmatpush3.bf16.xpose.msra.mxu1 %v539_v45  ;;  %5186 = vmatprep.mubr.msk.bf16.mxu1 %vm5950_vm1, %v5949_v6 }
 0x1b9   :  { %5196 = vmatprep.subr.bf16.mxu1 %v5949_v6  ;;  %5204 = vmatprep.mubr.msk.bf16.mxu0 %vm5950_vm1, %v5949_v6 }
 0x1bf   :  { %5187 = vmatmul.mubr.msk.bf16.vlgmr.msra.gmra.mrb[16].mxu1 %vm294_vm2, %v6094_v27 }
 0x1c0   :  { %5197 = vmatpush3.bf16.xpose.msra.mxu1 %v635_v47  ;;  %5198 = vmatprep.mubr.msk.bf16.mxu1 %vm5950_vm1, %v5949_v6 }
 0x1c1   :  { %5208 = vmatprep.subr.bf16.mxu1 %v5949_v6 }
 0x1c7   :  { %5199 = vmatmul.mubr.msk.bf16.vlgmr.msra.gmra.mrb[20].mxu1 %vm294_vm2, %v6099_v30 }
 0x1c8   :  { %5210 = vmatprep.mubr.msk.bf16.mxu1 %vm5950_vm1, %v5949_v6 }
 0x279   :  { %v431_v49 = vpop.f32.mrb[4].mxu0 }
 0x27a   :  { %v6160_v51 = vadd.f32 %v6155_v48, %v431_v49  ;;  %v335_v52 = vpop.f32.mrb[4].mxu1  ;;  %v5170_v53 = vpop.f32.mrb[5].mxu0 }
 0x27b   :  { %v5158_v54 = vpop.f32.mrb[5].mxu1  ;;  %v434_v55 = vpop.f32.mrb[6].mxu0  ;;  %v6163_v56 = vadd.f32 %v6157_v50, %v335_v52 }
 0x27c   :  { %v338_v57 = vpop.f32.mrb[6].mxu1  ;;  %v5171_v58 = vpop.f32.mrb[7].mxu0  ;;  %v683_v59 = vsel %vm294_vm2, %v6160_v51, -inf }
 0x27d   :  { %684 = vmax.xlane.f32.xlu0 %v683_v59  ;;  %v5159_v60 = vpop.f32.mrb[7].mxu1  ;;  %v677_v61 = vsel %vm294_vm2, %v6163_v56, -inf }
 0x281   :  { %678 = vmax.xlane.f32.xlu0 %v677_v61 }
 0x282   :  { %v383_v0 = vpop.f32.mrb[8].mxu1  ;;  %v527_v1 = vpop.f32.mrb[8].mxu0 }
 0x283   :  { %v6174_v2 = vadd.f32 %v6169_v62, %v527_v1  ;;  %v5164_v3 = vpop.f32.mrb[9].mxu1  ;;  %v5182_v4 = vpop.f32.mrb[9].mxu0  ;;  %v6177_v8 = vadd.f32 %v6171_v63, %v383_v0 }
 0x284   :  { %v386_v5 = vpop.f32.mrb[10].mxu1  ;;  %v530_v7 = vpop.f32.mrb[10].mxu0 }
 0x285   :  { %v5165_v9 = vpop.f32.mrb[11].mxu1  ;;  %v5183_v10 = vpop.f32.mrb[11].mxu0  ;;  %v689_v11 = vsel %vm294_vm2, %v6174_v2, -inf  ;;  %v680_v12 = vsel %vm294_vm2, %v6177_v8, -inf }
 0x286   :  { %690 = vmax.xlane.f32.xlu1 %v689_v11 }
 0x28a   :  { %v479_v13 = vpop.f32.mrb[12].mxu1  ;;  %681 = vmax.xlane.f32.xlu1 %v680_v12  ;;  %v623_v14 = vpop.f32.mrb[12].mxu0 }
 0x28b   :  { %v5176_v15 = vpop.f32.mrb[13].mxu1  ;;  %v5194_v17 = vpop.f32.mrb[13].mxu0  ;;  %v480_v38 = vadd.f32 %v6187_v37, %v479_v13  ;;  %v624_v46 = vadd.f32 %v6196_v43, %v623_v14 }
 0x28c   :  { %v482_v18 = vpop.f32.mrb[14].mxu1  ;;  %v626_v19 = vpop.f32.mrb[14].mxu0 }
 0x28d   :  { %v5177_v21 = vpop.f32.mrb[15].mxu1  ;;  %v5195_v22 = vpop.f32.mrb[15].mxu0  ;;  %v686_v41 = vsel %vm294_vm2, %v480_v38, -inf  ;;  %v695_v49 = vsel %vm294_vm2, %v624_v46, -inf }
 0x292   :  { %v575_v23 = vpop.f32.mrb[16].mxu1 }
 0x293   :  { %v5188_v26 = vpop.f32.mrb[17].mxu1  ;;  %v576_v40 = vadd.f32 %v6190_v39, %v575_v23 }
 0x294   :  { %v578_v28 = vpop.f32.mrb[18].mxu1 }
 0x295   :  { %v5189_v32 = vpop.f32.mrb[19].mxu1  ;;  %v692_v45 = vsel %vm294_vm2, %v576_v40, -inf }
 0x297   :  { %822 = vrot.lane.b32.xlu0 %v6091_v25, %s5945_s1 }
 0x29a   :  { %v671_v33 = vpop.f32.mrb[20].mxu1 }
 0x29b   :  { %v5200_v34 = vpop.f32.mrb[21].mxu1  ;;  %773 = vrot.lane.b32.xlu1 %v6085_v20, %s5945_s1  ;;  %v6199_v44 = vadd.f32 %v6194_v42, %v671_v33 }
 0x29c   :  { %v674_v35 = vpop.f32.mrb[22].mxu1 }
 0x29d   :  { %v5201_v36 = vpop.f32.mrb[23].mxu1  ;;  %v698_v47 = vsel %vm294_vm2, %v6199_v44, -inf }
 0x2b6   :  { %687 = vmax.xlane.f32.xlu0 %v686_v41 }
 0x2ba   :  { %693 = vmax.xlane.f32.xlu0 %v692_v45 }
 0x2be   :  { %699 = vmax.xlane.f32.xlu0 %v698_v47 }
 0x2bf   :  { %696 = vmax.xlane.f32.xlu1 %v695_v49 }
 0x2d0   :  { %870 = vrot.lane.b32.xlu1 %v6083_v16, %s5945_s1 }
 0x2d4   :  { %966 = vrot.lane.b32.xlu0 %v6096_v29, %s5945_s1  ;;  %918 = vrot.lane.b32.xlu1 %v6089_v24, %s5945_s1 }
 0x2d8   :  { %1014 = vrot.lane.b32.xlu1 %v6094_v27, %s5945_s1 }
 0x30a   :  { %v685_v52 = vpop.xlane.xlu0 %684 }
 0x30b   :  { %v703_v53 = vsub.f32 %v6160_v51, %v685_v52 }
 0x30d   :  { %v713_v54 = vmul.f32 1.442695, %v703_v53 }
 0x30e   :  { %v679_v55 = vpop.xlane.xlu0 %678 }
 0x30f   :  { %5639 = vpow2.f32 %v713_v54  ;;  %v701_v57 = vsub.f32 %v6163_v56, %v679_v55 }
 0x311   :  { %v709_v58 = vmul.f32 1.442695, %v701_v57 }
 0x312   :  { %v823_v59 = vpop.permute.xlu0 %822 }
 0x313   :  { %5641 = vpow2.f32 %v709_v58  ;;  %v828_v60 = vsel %vm778_vm3, %v823_v59, 0  ;;  %v691_v61 = vpop.xlane.xlu1 %690 }
 0x314   :  { %v705_v0 = vsub.f32 %v6174_v2, %v691_v61  ;;  %5209 = vmatpush3.bf16.msra.mxu1 %v828_v60 }
 0x315   :  { %5220 = vmatprep.subr.bf16.mxu1 %v5949_v6 }
 0x316   :  { %v717_v1 = vmul.f32 1.442695, %v705_v0 }
 0x317   :  { %v682_v3 = vpop.xlane.xlu1 %681 }
 0x318   :  { %5643 = vpow2.f32 %v717_v1  ;;  %v702_v51 = vsub.f32 %v6177_v8, %v682_v3 }
 0x319   :  { %v6220_v4 = vpop.eup %5639 }
 0x31a   :  { %v711_v56 = vmul.f32 1.442695, %v702_v51  ;;  %v731_v5 = vsel %vm294_vm2, %v6220_v4, 0.0 }
 0x31b   :  { %v774_v7 = vpop.permute.xlu1 %773  ;;  %732 = vadd.xlane.f32.xlu1 %v731_v5 }
 0x31c   :  { %5645 = vpow2.f32 %v711_v56  ;;  %v780_v9 = vsel %vm778_vm3, %v774_v7, 0 }
 0x31d   :  { %v6225_v2 = vpop.eup %5641  ;;  %5203 = vmatpush3.bf16.msra.mxu0 %v780_v9 }
 0x31e   :  { %v725_v10 = vsel %vm294_vm2, %v6225_v2, 0.0  ;;  %5214 = vmatprep.subr.bf16.mxu0 %v5949_v6 }
 0x31f   :  { %726 = vadd.xlane.f32.xlu1 %v725_v10 }
 0x322   :  { %v6230_v8 = vpop.eup %5643 }
 0x323   :  { %v737_v11 = vsel %vm294_vm2, %v6230_v8, 0.0 }
 0x324   :  { %738 = vadd.xlane.f32.xlu1 %v737_v11 }
 0x326   :  { %v6234_v12 = vpop.eup %5645 }
 0x327   :  { %v728_v13 = vsel %vm294_vm2, %v6234_v12, 0.0 }
 0x328   :  { %729 = vadd.xlane.f32.xlu0 %v728_v13 }
 0x343   :  { %v688_v14 = vpop.xlane.xlu0 %687 }
 0x344   :  { %v704_v15 = vsub.f32 %v480_v38, %v688_v14 }
 0x346   :  { %v715_v17 = vmul.f32 1.442695, %v704_v15 }
 0x347   :  { %v694_v18 = vpop.xlane.xlu0 %693 }
 0x348   :  { %5647 = vpow2.f32 %v715_v17  ;;  %v706_v19 = vsub.f32 %v576_v40, %v694_v18 }
 0x34a   :  { %v719_v21 = vmul.f32 1.442695, %v706_v19 }
 0x34b   :  { %v700_v38 = vpop.xlane.xlu0 %699 }
 0x34c   :  { %5649 = vpow2.f32 %v719_v21  ;;  %v697_v22 = vpop.xlane.xlu1 %696  ;;  %v708_v40 = vsub.f32 %v6199_v44, %v700_v38 }
 0x34d   :  { %v707_v23 = vsub.f32 %v624_v46, %v697_v22 }
 0x34e   :  { %v723_v41 = vmul.f32 1.442695, %v708_v40 }
 0x34f   :  { %v721_v26 = vmul.f32 1.442695, %v707_v23  ;;  %v967_v54 = vpop.permute.xlu0 %966 }
 0x350   :  { %v871_v46 = vpop.permute.xlu1 %870  ;;  %v972_v9 = vsel %vm778_vm3, %v967_v54, 0 }
 0x351   :  { %5651 = vpow2.f32 %v721_v26  ;;  %v876_v0 = vsel %vm778_vm3, %v871_v46, 0 }
 0x352   :  { %v6238_v28 = vpop.eup %5647  ;;  %5653 = vpow2.f32 %v723_v41 }
 0x353   :  { %v734_v32 = vsel %vm294_vm2, %v6238_v28, 0.0 }
 0x354   :  { %735 = vadd.xlane.f32.xlu0 %v734_v32  ;;  %v919_v47 = vpop.permute.xlu1 %918 }
 0x356   :  { %v6242_v33 = vpop.eup %5649 }
 0x357   :  { %v740_v34 = vsel %vm294_vm2, %v6242_v33, 0.0 }
 0x358   :  { %741 = vadd.xlane.f32.xlu0 %v740_v34  ;;  %v1015_v49 = vpop.permute.xlu1 %1014 }
 0x359   :  { %v1020_v21 = vsel %vm778_vm3, %v1015_v49, 0 }
 0x35b   :  { %v6246_v35 = vpop.eup %5651 }
 0x35c   :  { %v743_v36 = vsel %vm294_vm2, %v6246_v35, 0.0  ;;  %v6267_v45 = vpop.eup %5653 }
 0x35d   :  { %744 = vadd.xlane.f32.xlu1 %v743_v36  ;;  %v746_v44 = vsel %vm294_vm2, %v6267_v45, 0.0 }
 0x36e   :  { %1110 = vrot.lane.b32.xlu1 %v6099_v30, %s5945_s1  ;;  %1062 = vrot.lane.b32.xlu0 %v6102_v31, %s5945_s1  ;;  %s5954_s1 = smov 56  }
 0x372   :  { %1219 = vrot.lane.b32.xlu1 %v6091_v25, %s5952_s29 }
 0x376   :  { %1217 = vrot.lane.b32.xlu1 %v6091_v25, %s5953_s30 }
 0x37a   :  { %1319 = vrot.lane.b32.xlu1 %v6089_v24, %s5952_s29 }
 0x37e   :  { %1317 = vrot.lane.b32.xlu1 %v6089_v24, %s5953_s30 }
 0x382   :  { %1419 = vrot.lane.b32.xlu1 %v6094_v27, %s5952_s29 }
 0x386   :  { %1417 = vrot.lane.b32.xlu1 %v6094_v27, %s5953_s30 }
 0x38a   :  { %1519 = vrot.lane.b32.xlu1 %v6099_v30, %s5952_s29 }
 0x38d   :  { %747 = vadd.xlane.f32.xlu0 %v746_v44 }
 0x38e   :  { %1517 = vrot.lane.b32.xlu1 %v6099_v30, %s5953_s30 }
 0x392   :  { %1663 = vrot.lane.b32.xlu1 %v6085_v20, %s5954_s1 }
 0x3a3   :  { %1169 = vrot.lane.b32.xlu0 %v6085_v20, %s5952_s29 }
 0x3a7   :  { %1167 = vrot.lane.b32.xlu0 %v6085_v20, %s5953_s30 }
 0x3a8   :  { %v733_v52 = vpop.xlane.xlu1 %732 }
 0x3ab   :  { %1269 = vrot.lane.b32.xlu0 %v6083_v16, %s5952_s29 }
 0x3ac   :  { %v727_v53 = vpop.xlane.xlu1 %726 }
 0x3ad   :  { %5655 = vrcp.f32 %v727_v53 }
 0x3ae   :  { %5657 = vrcp.f32 %v733_v52 }
 0x3af   :  { %1267 = vrot.lane.b32.xlu0 %v6083_v16, %s5953_s30 }
 0x3b1   :  { %v739_v57 = vpop.xlane.xlu1 %738 }
 0x3b3   :  { %1369 = vrot.lane.b32.xlu0 %v6096_v29, %s5952_s29 }
 0x3b5   :  { %v730_v55 = vpop.xlane.xlu0 %729 }
 0x3b6   :  { %5659 = vrcp.f32 %v730_v55 }
 0x3b7   :  { %v5656_v58 = vpop.eup %5655  ;;  %1367 = vrot.lane.b32.xlu0 %v6096_v29, %s5953_s30  ;;  %5661 = vrcp.f32 %v739_v57 }
 0x3b8   :  { %v757_v59 = vmul.f32 %v5656_v58, %v6225_v2  ;;  %v5658_v61 = vpop.eup %5657  ;;  %v924_v2 = vsel %vm778_vm3, %v919_v47, 0 }
 0x3b9   :  { %v759_v1 = vmul.f32 %v5658_v61, %v6220_v4 }
 0x3ba   :  { %v765_v60 = vpack.c.bf16 %v757_v59, %v757_v59 }
 0x3bb   :  { %1469 = vrot.lane.b32.xlu0 %v6102_v31, %s5952_s29  ;;  %v767_v56 = vpack.c.bf16 %v759_v1, %v759_v1 }
 0x3bc   :  { %5205 = vmatmul.mubr.msk.bf16.vlgmr.msra.gmra.mrb[16].mxu0 %vm294_vm2, %v765_v60 }
 0x3bd   :  { %5215 = vmatpush3.bf16.msra.mxu0 %v876_v0  ;;  %5216 = vmatprep.mubr.msk.bf16.mxu0 %vm5950_vm1, %v5949_v6 }
 0x3be   :  { %5226 = vmatprep.subr.bf16.mxu0 %v5949_v6 }
 0x3bf   :  { %1467 = vrot.lane.b32.xlu0 %v6102_v31, %s5953_s30 }
 0x3c0   :  { %v5660_v3 = vpop.eup %5659 }
 0x3c1   :  { %v758_v51 = vmul.f32 %v5660_v3, %v6234_v12  ;;  %v5662_v5 = vpop.eup %5661 }
 0x3c2   :  { %v761_v4 = vmul.f32 %v5662_v5, %v6230_v8 }
 0x3c3   :  { %v766_v7 = vpack.c.bf16 %v758_v51, %v758_v51 }
 0x3c4   :  { %5217 = vmatmul.mubr.msk.bf16.vlgmr.msra.gmra.mrb[20].mxu0 %vm294_vm2, %v767_v56  ;;  %v769_v10 = vpack.c.bf16 %v761_v4, %v761_v4 }
 0x3c5   :  { %5227 = vmatpush3.bf16.msra.mxu0 %v972_v9  ;;  %5211 = vmatmul.mubr.msk.bf16.vlgmr.msra.gmra.mrb[24].mxu1 %vm294_vm2, %v766_v7 }
 0x3c6   :  { %5221 = vmatpush3.bf16.msra.mxu1 %v924_v2  ;;  %5228 = vmatprep.mubr.msk.bf16.mxu0 %vm5950_vm1, %v5949_v6 }
 0x3c7   :  { %5238 = vmatprep.subr.bf16.mxu0 %v5949_v6  ;;  %5222 = vmatprep.mubr.msk.bf16.mxu1 %vm5950_vm1, %v5949_v6 }
 0x3c8   :  { %5232 = vmatprep.subr.bf16.mxu1 %v5949_v6 }
 0x3cc   :  { %5229 = vmatmul.mubr.msk.bf16.vlgmr.msra.gmra.mrb[24].mxu0 %vm294_vm2, %v769_v10 }
 0x3cd   :  { %5240 = vmatprep.mubr.msk.bf16.mxu0 %vm5950_vm1, %v5949_v6 }
 0x3e1   :  { %v736_v11 = vpop.xlane.xlu0 %735 }
 0x3e2   :  { %5663 = vrcp.f32 %v736_v11 }
 0x3e5   :  { %v742_v12 = vpop.xlane.xlu0 %741 }
 0x3e6   :  { %5665 = vrcp.f32 %v742_v12 }
 0x3e9   :  { %v1063_v13 = vpop.permute.xlu0 %1062 }
 0x3ea   :  { %v1068_v8 = vsel %vm778_vm3, %v1063_v13, 0  ;;  %v745_v14 = vpop.xlane.xlu1 %744 }
 0x3eb   :  { %5667 = vrcp.f32 %v745_v14  ;;  %5239 = vmatpush3.bf16.msra.mxu0 %v1068_v8 }
 0x3ec   :  { %v5664_v15 = vpop.eup %5663  ;;  %5250 = vmatprep.subr.bf16.mxu0 %v5949_v6 }
 0x3ed   :  { %v760_v17 = vmul.f32 %v5664_v15, %v6238_v28 }
 0x3ee   :  { %v1111_v26 = vpop.permute.xlu1 %1110 }
 0x3ef   :  { %v768_v18 = vpack.c.bf16 %v760_v17, %v760_v17  ;;  %v1116_v36 = vsel %vm778_vm3, %v1111_v26, 0 }
 0x3f0   :  { %v5666_v19 = vpop.eup %5665 }
 0x3f1   :  { %5223 = vmatmul.mubr.msk.bf16.vlgmr.msra.gmra.mrb[28].mxu1 %vm294_vm2, %v768_v18  ;;  %v762_v22 = vmul.f32 %v5666_v19, %v6242_v33 }
 0x3f2   :  { %5233 = vmatpush3.bf16.msra.mxu1 %v1020_v21  ;;  %5234 = vmatprep.mubr.msk.bf16.mxu1 %vm5950_vm1, %v5949_v6  ;;  %v1220_v33 = vpop.permute.xlu1 %1219 }
 0x3f3   :  { %5244 = vmatprep.subr.bf16.mxu1 %v5949_v6  ;;  %v770_v34 = vpack.c.bf16 %v762_v22, %v762_v22  ;;  %v1225_v58 = vsel %vm294_vm2, %v1220_v33, 0 }
 0x3f5   :  { %v5668_v23 = vpop.eup %5667 }
 0x3f6   :  { %v763_v32 = vmul.f32 %v5668_v23, %v6246_v35  ;;  %v1218_v38 = vpop.permute.xlu1 %1217 }
 0x3f8   :  { %v771_v28 = vpack.c.bf16 %v763_v32, %v763_v32 }
 0x3f9   :  { %5235 = vmatmul.mubr.msk.bf16.vlgmr.msra.gmra.mrb[32].mxu1 %vm294_vm2, %v770_v34 }
 0x3fa   :  { %5245 = vmatpush3.bf16.msra.mxu1 %v1116_v36  ;;  %5241 = vmatmul.mubr.msk.bf16.vlgmr.msra.gmra.mrb[28].mxu0 %vm294_vm2, %v771_v28  ;;  %v1320_v35 = vpop.permute.xlu1 %1319 }
 0x3fb   :  { %5252 = vmatprep.mubr.msk.bf16.mxu0 %vm5950_vm1, %v5949_v6  ;;  %5246 = vmatprep.mubr.msk.bf16.mxu1 %vm5950_vm1, %v5949_v6  ;;  %v1325_v1 = vsel %vm294_vm2, %v1320_v35, 0 }
 0x3fc   :  { %5256 = vmatprep.subr.bf16.mxu1 %v5949_v6 }
 0x3fe   :  { %v1318_v41 = vpop.permute.xlu1 %1317 }
 0x402   :  { %v1420_v49 = vpop.permute.xlu1 %1419 }
 0x403   :  { %v1425_v7 = vsel %vm294_vm2, %v1420_v49, 0 }
 0x406   :  { %v1418_v59 = vpop.permute.xlu1 %1417 }
 0x40a   :  { %v1520_v0 = vpop.permute.xlu1 %1519 }
 0x40b   :  { %v1525_v10 = vsel %vm294_vm2, %v1520_v0, 0 }
 0x40e   :  { %v1518_v51 = vpop.permute.xlu1 %1517 }
 0x412   :  { %v1664_v9 = vpop.permute.xlu1 %1663 }
 0x413   :  { %v1669_v4 = vsel %vm778_vm3, %v1664_v9, 0 }
 0x41a   :  { %v748_v40 = vpop.xlane.xlu0 %747 }
 0x41b   :  { %5669 = vrcp.f32 %v748_v40 }
 0x41e   :  { %v1170_v44 = vpop.permute.xlu0 %1169 }
 0x41f   :  { %v1175_v46 = vsel %vm294_vm2, %v1170_v44, 0 }
 0x420   :  { %5251 = vmatpush3.bf16.xpose.msra.mxu0 %v1175_v46 }
 0x421   :  { %5262 = vmatprep.subr.bf16.mxu0 %v5949_v6 }
 0x422   :  { %v1168_v47 = vpop.permute.xlu0 %1167 }
 0x425   :  { %v5670_v52 = vpop.eup %5669 }
 0x426   :  { %v1270_v53 = vpop.permute.xlu0 %1269  ;;  %v764_v54 = vmul.f32 %v5670_v52, %v6267_v45 }
 0x427   :  { %v1275_v55 = vsel %vm294_vm2, %v1270_v53, 0  ;;  %5253 = vmatmul.mubr.msk.bf16.vlgmr.msra.gmra.mrb[32].mxu0 %vm294_vm2, %v1168_v47 }
 0x428   :  { %5263 = vmatpush3.bf16.xpose.msra.mxu0 %v1275_v55  ;;  %v772_v57 = vpack.c.bf16 %v764_v54, %v764_v54  ;;  %5264 = vmatprep.mubr.msk.bf16.mxu0 %vm5950_vm1, %v5949_v6 }
 0x429   :  { %5274 = vmatprep.subr.bf16.mxu0 %v5949_v6 }
 0x42a   :  { %5247 = vmatmul.mubr.msk.bf16.vlgmr.msra.gmra.mrb[36].mxu1 %vm294_vm2, %v772_v57  ;;  %v1268_v60 = vpop.permute.xlu0 %1267 }
 0x42b   :  { %5257 = vmatpush3.bf16.xpose.msra.mxu1 %v1225_v58  ;;  %5258 = vmatprep.mubr.msk.bf16.mxu1 %vm5950_vm1, %v5949_v6 }
 0x42c   :  { %5268 = vmatprep.subr.bf16.mxu1 %v5949_v6 }
 0x42e   :  { %v1370_v45 = vpop.permute.xlu0 %1369 }
 0x42f   :  { %v1375_v61 = vsel %vm294_vm2, %v1370_v45, 0  ;;  %5265 = vmatmul.mubr.msk.bf16.vlgmr.msra.gmra.mrb[36].mxu0 %vm294_vm2, %v1268_v60 }
 0x430   :  { %5275 = vmatpush3.bf16.xpose.msra.mxu0 %v1375_v61  ;;  %5276 = vmatprep.mubr.msk.bf16.mxu0 %vm5950_vm1, %v5949_v6 }
 0x431   :  { %5286 = vmatprep.subr.bf16.mxu0 %v5949_v6 }
 0x432   :  { %5259 = vmatmul.mubr.msk.bf16.vlgmr.msra.gmra.mrb[40].mxu1 %vm294_vm2, %v1218_v38  ;;  %v1368_v3 = vpop.permute.xlu0 %1367 }
 0x433   :  { %5269 = vmatpush3.bf16.xpose.msra.mxu1 %v1325_v1  ;;  %5270 = vmatprep.mubr.msk.bf16.mxu1 %vm5950_vm1, %v5949_v6 }
 0x434   :  { %5280 = vmatprep.subr.bf16.mxu1 %v5949_v6 }
 0x436   :  { %v1470_v56 = vpop.permute.xlu0 %1469 }
 0x437   :  { %v1475_v5 = vsel %vm294_vm2, %v1470_v56, 0  ;;  %5277 = vmatmul.mubr.msk.bf16.vlgmr.msra.gmra.mrb[40].mxu0 %vm294_vm2, %v1368_v3 }
 0x438   :  { %5287 = vmatpush3.bf16.xpose.msra.mxu0 %v1475_v5  ;;  %5288 = vmatprep.mubr.msk.bf16.mxu0 %vm5950_vm1, %v5949_v6 }
 0x439   :  { %5298 = vmatprep.subr.bf16.mxu0 %v5949_v6 }
 0x43a   :  { %5271 = vmatmul.mubr.msk.bf16.vlgmr.msra.gmra.mrb[44].mxu1 %vm294_vm2, %v1318_v41  ;;  %v1468_v2 = vpop.permute.xlu0 %1467 }
 0x43b   :  { %5281 = vmatpush3.bf16.xpose.msra.mxu1 %v1425_v7  ;;  %5282 = vmatprep.mubr.msk.bf16.mxu1 %vm5950_vm1, %v5949_v6 }
 0x43c   :  { %5292 = vmatprep.subr.bf16.mxu1 %v5949_v6 }
 0x43f   :  { %5289 = vmatmul.mubr.msk.bf16.vlgmr.msra.gmra.mrb[44].mxu0 %vm294_vm2, %v1468_v2 }
 0x440   :  { %5299 = vmatpush3.bf16.msra.mxu0 %v1669_v4  ;;  %5300 = vmatprep.mubr.msk.bf16.mxu0 %vm5950_vm1, %v5949_v6 }
 0x441   :  { %5310 = vmatprep.subr.bf16.mxu0 %v5949_v6 }
 0x442   :  { %5283 = vmatmul.mubr.msk.bf16.vlgmr.msra.gmra.mrb[48].mxu1 %vm294_vm2, %v1418_v59 }
 0x443   :  { %5293 = vmatpush3.bf16.xpose.msra.mxu1 %v1525_v10  ;;  %5294 = vmatprep.mubr.msk.bf16.mxu1 %vm5950_vm1, %v5949_v6 }
 0x444   :  { %5304 = vmatprep.subr.bf16.mxu1 %v5949_v6 }
 0x44a   :  { %5295 = vmatmul.mubr.msk.bf16.vlgmr.msra.gmra.mrb[52].mxu1 %vm294_vm2, %v1518_v51 }
 0x44b   :  { %5306 = vmatprep.mubr.msk.bf16.mxu1 %vm5950_vm1, %v5949_v6 }
 0x48f   :  { %v6379_v11 = vpop.f32.mrb[16].mxu0 }
 0x490   :  { %v5206_v12 = vpop.f32.mrb[17].mxu0 }
 0x491   :  { %v819_v13 = vpop.f32.mrb[18].mxu0 }
 0x492   :  { %v5207_v8 = vpop.f32.mrb[19].mxu0 }
 0x497   :  { %v6381_v14 = vpop.f32.mrb[20].mxu0 }
 0x498   :  { %v6383_v15 = vpop.f32.mrb[24].mxu1  ;;  %v5218_v17 = vpop.f32.mrb[21].mxu0 }
 0x499   :  { %v4976_v18 = vpack.c.bf16 %v6383_v15, %v6379_v11  ;;  %v5212_v19 = vpop.f32.mrb[25].mxu1  ;;  %v915_v21 = vpop.f32.mrb[22].mxu0 }
 0x49a   :  { %v867_v22 = vpop.f32.mrb[26].mxu1  ;;  %v5219_v23 = vpop.f32.mrb[23].mxu0 }
 0x49b   :  { %v5213_v26 = vpop.f32.mrb[27].mxu1 }
 0x49f   :  { %v6387_v32 = vpop.f32.mrb[24].mxu0 }
 0x4a0   :  { %v5230_v34 = vpop.f32.mrb[25].mxu0 }
 0x4a1   :  { %v1011_v28 = vpop.f32.mrb[26].mxu0 }
 0x4a2   :  { %v5231_v36 = vpop.f32.mrb[27].mxu0 }
 0x4c4   :  { %v6389_v33 = vpop.f32.mrb[28].mxu1 }
 0x4c5   :  { %v4977_v38 = vpack.c.bf16 %v6389_v33, %v6381_v14  ;;  %v5224_v35 = vpop.f32.mrb[29].mxu1 }
 0x4c6   :  { %v963_v40 = vpop.f32.mrb[30].mxu1 }
 0x4c7   :  { %v5225_v41 = vpop.f32.mrb[31].mxu1 }
 0x4cc   :  { %v6393_v44 = vpop.f32.mrb[32].mxu1 }
 0x4cd   :  { %v4978_v46 = vpack.c.bf16 %v6393_v44, %v6387_v32  ;;  %v5236_v47 = vpop.f32.mrb[33].mxu1  ;;  %v6397_v49 = vpop.f32.mrb[28].mxu0 }
 0x4ce   :  { %v1059_v52 = vpop.f32.mrb[34].mxu1  ;;  %v5242_v53 = vpop.f32.mrb[29].mxu0 }
 0x4cf   :  { %v5237_v54 = vpop.f32.mrb[35].mxu1  ;;  %v1107_v55 = vpop.f32.mrb[30].mxu0 }
 0x4d0   :  { %v5243_v57 = vpop.f32.mrb[31].mxu0 }
 0x4fa   :  { %v1211_v58 = vpop.f32.mrb[32].mxu0 }
 0x4fb   :  { %v6400_v59 = vadd.f32 %v6157_v50, %v1211_v58  ;;  %v5254_v60 = vpop.f32.mrb[33].mxu0 }
 0x4fc   :  { %v1214_v45 = vpop.f32.mrb[34].mxu0 }
 0x4fd   :  { %v6402_v61 = vpop.f32.mrb[36].mxu1  ;;  %v5255_v0 = vpop.f32.mrb[35].mxu0  ;;  %v1567_v1 = vsel %vm294_vm2, %v6400_v59, -inf }
 0x4fe   :  { %v4979_v3 = vpack.c.bf16 %v6402_v61, %v6397_v49  ;;  %v5248_v51 = vpop.f32.mrb[37].mxu1  ;;  %1568 = vmax.xlane.f32.xlu0 %v1567_v1 }
 0x4ff   :  { %v1155_v56 = vpop.f32.mrb[38].mxu1 }
 0x500   :  { %v5249_v5 = vpop.f32.mrb[39].mxu1 }
 0x502   :  { %v1311_v7 = vpop.f32.mrb[36].mxu0 }
 0x503   :  { %v1312_v9 = vadd.f32 %v6155_v48, %v1311_v7  ;;  %v5266_v50 = vpop.f32.mrb[37].mxu0 }
 0x504   :  { %v1314_v2 = vpop.f32.mrb[38].mxu0 }
 0x505   :  { %v1261_v4 = vpop.f32.mrb[40].mxu1  ;;  %v5267_v10 = vpop.f32.mrb[39].mxu0  ;;  %v1573_v12 = vsel %vm294_vm2, %v1312_v9, -inf }
 0x506   :  { %v1262_v13 = vadd.f32 %v6171_v63, %v1261_v4  ;;  %v5260_v8 = vpop.f32.mrb[41].mxu1  ;;  %1574 = vmax.xlane.f32.xlu0 %v1573_v12 }
 0x507   :  { %v1264_v17 = vpop.f32.mrb[42].mxu1 }
 0x508   :  { %v5261_v19 = vpop.f32.mrb[43].mxu1  ;;  %v1570_v21 = vsel %vm294_vm2, %v1262_v13, -inf }
 0x509   :  { %1571 = vmax.xlane.f32.xlu1 %v1570_v21 }
 0x50a   :  { %v1411_v22 = vpop.f32.mrb[40].mxu0 }
 0x50b   :  { %v6413_v23 = vadd.f32 %v6169_v62, %v1411_v22  ;;  %v5278_v48 = vpop.f32.mrb[41].mxu0 }
 0x50c   :  { %v1414_v26 = vpop.f32.mrb[42].mxu0 }
 0x50d   :  { %v1361_v34 = vpop.f32.mrb[44].mxu1  ;;  %v5279_v28 = vpop.f32.mrb[43].mxu0  ;;  %v1579_v36 = vsel %vm294_vm2, %v6413_v23, -inf }
 0x50e   :  { %v1362_v63 = vadd.f32 %v6187_v37, %v1361_v34  ;;  %v5272_v35 = vpop.f32.mrb[45].mxu1  ;;  %1580 = vmax.xlane.f32.xlu1 %v1579_v36 }
 0x50f   :  { %v1364_v40 = vpop.f32.mrb[46].mxu1 }
 0x510   :  { %v5273_v41 = vpop.f32.mrb[47].mxu1  ;;  %v1576_v47 = vsel %vm294_vm2, %v1362_v63, -inf }
 0x511   :  { %1577 = vmax.xlane.f32.xlu0 %v1576_v47 }
 0x512   :  { %v1511_v52 = vpop.f32.mrb[44].mxu0 }
 0x513   :  { %v6420_v62 = vadd.f32 %v6196_v43, %v1511_v52  ;;  %v5290_v53 = vpop.f32.mrb[45].mxu0 }
 0x514   :  { %v1514_v54 = vpop.f32.mrb[46].mxu0 }
 0x515   :  { %v1461_v55 = vpop.f32.mrb[48].mxu1  ;;  %v5291_v57 = vpop.f32.mrb[47].mxu0  ;;  %v1585_v58 = vsel %vm294_vm2, %v6420_v62, -inf }
 0x516   :  { %v1462_v37 = vadd.f32 %v6190_v39, %v1461_v55  ;;  %v5284_v60 = vpop.f32.mrb[49].mxu1  ;;  %1586 = vmax.xlane.f32.xlu1 %v1585_v58 }
 0x517   :  { %v1464_v45 = vpop.f32.mrb[50].mxu1 }
 0x518   :  { %v5285_v0 = vpop.f32.mrb[51].mxu1  ;;  %v1582_v1 = vsel %vm294_vm2, %v1462_v37, -inf }
 0x519   :  { %1583 = vmax.xlane.f32.xlu0 %v1582_v1 }
 0x51d   :  { %v1561_v51 = vpop.f32.mrb[52].mxu1 }
 0x51e   :  { %v1562_v43 = vadd.f32 %v6194_v42, %v1561_v51  ;;  %v5296_v56 = vpop.f32.mrb[53].mxu1 }
 0x51f   :  { %v1564_v5 = vpop.f32.mrb[54].mxu1 }
 0x520   :  { %v5297_v7 = vpop.f32.mrb[55].mxu1  ;;  %v1588_v50 = vsel %vm294_vm2, %v1562_v43, -inf }
 0x521   :  { %1589 = vmax.xlane.f32.xlu0 %v1588_v50 }
 0x527   :  { %1759 = vrot.lane.b32.xlu1 %v6083_v16, %s5954_s1 }
 0x52b   :  { %1807 = vrot.lane.b32.xlu1 %v6089_v24, %s5954_s1 }
 0x537   :  { %1711 = vrot.lane.b32.xlu0 %v6091_v25, %s5954_s1 }
 0x58b   :  { %v1569_v39 = vpop.xlane.xlu0 %1568 }
 0x58c   :  { %v1591_v2 = vsub.f32 %v6400_v59, %v1569_v39 }
 0x58e   :  { %v1599_v4 = vmul.f32 1.442695, %v1591_v2 }
 0x590   :  { %5671 = vpow2.f32 %v1599_v4 }
 0x593   :  { %v1575_v42 = vpop.xlane.xlu0 %1574 }
 0x594   :  { %v1593_v10 = vsub.f32 %v1312_v9, %v1575_v42 }
 0x596   :  { %v1603_v12 = vmul.f32 1.442695, %v1593_v10  ;;  %v1572_v8 = vpop.xlane.xlu1 %1571 }
 0x597   :  { %v1592_v17 = vsub.f32 %v1262_v13, %v1572_v8 }
 0x598   :  { %5673 = vpow2.f32 %v1603_v12 }
 0x599   :  { %v1601_v19 = vmul.f32 1.442695, %v1592_v17 }
 0x59a   :  { %v6435_v21 = vpop.eup %5671 }
 0x59b   :  { %5675 = vpow2.f32 %v1601_v19  ;;  %v1615_v22 = vsel %vm294_vm2, %v6435_v21, 0.0  ;;  %v1581_v52 = vpop.xlane.xlu1 %1580 }
 0x59c   :  { %1616 = vadd.xlane.f32.xlu1 %v1615_v22  ;;  %v1595_v53 = vsub.f32 %v6413_v23, %v1581_v52 }
 0x59e   :  { %v1578_v48 = vpop.xlane.xlu0 %1577  ;;  %v1607_v55 = vmul.f32 1.442695, %v1595_v53 }
 0x59f   :  { %v1594_v26 = vsub.f32 %v1362_v63, %v1578_v48 }
 0x5a1   :  { %v1605_v34 = vmul.f32 1.442695, %v1594_v26 }
 0x5a2   :  { %v6439_v59 = vpop.eup %5673 }
 0x5a3   :  { %5677 = vpow2.f32 %v1605_v34  ;;  %v1621_v9 = vsel %vm294_vm2, %v6439_v59, 0.0  ;;  %v1587_v54 = vpop.xlane.xlu1 %1586 }
 0x5a4   :  { %1622 = vadd.xlane.f32.xlu1 %v1621_v9  ;;  %v1597_v57 = vsub.f32 %v6420_v62, %v1587_v54  ;;  %5679 = vpow2.f32 %v1607_v55 }
 0x5a5   :  { %v6443_v13 = vpop.eup %5675 }
 0x5a6   :  { %v1618_v28 = vsel %vm294_vm2, %v6443_v13, 0.0  ;;  %v1584_v36 = vpop.xlane.xlu0 %1583  ;;  %v1611_v58 = vmul.f32 1.442695, %v1597_v57 }
 0x5a7   :  { %1619 = vadd.xlane.f32.xlu0 %v1618_v28  ;;  %v1596_v60 = vsub.f32 %v1462_v37, %v1584_v36  ;;  %v1760_v50 = vpop.permute.xlu1 %1759 }
 0x5a8   :  { %5681 = vpow2.f32 %v1611_v58  ;;  %v1765_v17 = vsel %vm778_vm3, %v1760_v50, 0 }
 0x5a9   :  { %v1609_v45 = vmul.f32 1.442695, %v1596_v60 }
 0x5ab   :  { %5683 = vpow2.f32 %v1609_v45  ;;  %v1808_v39 = vpop.permute.xlu1 %1807 }
 0x5ad   :  { %v6447_v35 = vpop.eup %5677 }
 0x5ae   :  { %v1590_v40 = vpop.xlane.xlu0 %1589  ;;  %v1624_v63 = vsel %vm294_vm2, %v6447_v35, 0.0  ;;  %v6459_v1 = vpop.eup %5679 }
 0x5af   :  { %1625 = vadd.xlane.f32.xlu0 %v1624_v63  ;;  %v1598_v0 = vsub.f32 %v1562_v43, %v1590_v40  ;;  %v1627_v23 = vsel %vm294_vm2, %v6459_v1, 0.0  ;;  %v1813_v40 = vsel %vm778_vm3, %v1808_v39, 0 }
 0x5b1   :  { %v1613_v51 = vmul.f32 1.442695, %v1598_v0 }
 0x5b2   :  { %v1712_v41 = vpop.permute.xlu0 %1711  ;;  %v6463_v56 = vpop.eup %5681 }
 0x5b3   :  { %v1717_v47 = vsel %vm778_vm3, %v1712_v41, 0  ;;  %5685 = vpow2.f32 %v1613_v51  ;;  %v1633_v62 = vsel %vm294_vm2, %v6463_v56, 0.0 }
 0x5b4   :  { %5305 = vmatpush3.bf16.msra.mxu1 %v1717_v47 }
 0x5b5   :  { %1903 = vrot.lane.b32.xlu1 %v6094_v27, %s5954_s1  ;;  %5316 = vmatprep.subr.bf16.mxu1 %v5949_v6  ;;  %v6467_v5 = vpop.eup %5683 }
 0x5b6   :  { %v1630_v37 = vsel %vm294_vm2, %v6467_v5, 0.0 }
 0x5bd   :  { %v6471_v43 = vpop.eup %5685 }
 0x5be   :  { %v1636_v7 = vsel %vm294_vm2, %v6471_v43, 0.0 }
 0x5c5   :  { %1855 = vrot.lane.b32.xlu0 %v6096_v29, %s5954_s1 }
 0x5d9   :  { %1628 = vadd.xlane.f32.xlu1 %v1627_v23 }
 0x5dd   :  { %1634 = vadd.xlane.f32.xlu1 %v1633_v62 }
 0x5e4   :  { %1631 = vadd.xlane.f32.xlu0 %v1630_v37 }
 0x5e8   :  { %1637 = vadd.xlane.f32.xlu0 %v1636_v7 }
 0x5ee   :  { %1999 = vrot.lane.b32.xlu1 %v6099_v30, %s5954_s1 }
 0x5f2   :  { %2257 = vrot.lane.b32.xlu1 %v6085_v20, %s5955_s8 }
 0x5f6   :  { %2307 = vrot.lane.b32.xlu1 %v6091_v25, %s5955_s8 }
 0x5fa   :  { %2357 = vrot.lane.b32.xlu1 %v6083_v16, %s5955_s8 }
 0x5fe   :  { %2407 = vrot.lane.b32.xlu1 %v6089_v24, %s5955_s8  ;;  %1951 = vrot.lane.b32.xlu0 %v6102_v31, %s5954_s1 }
 0x602   :  { %2509 = vrot.lane.b32.xlu1 %v6094_v27, %s5956_s9  ;;  %2259 = vrot.lane.b32.xlu0 %v6085_v20, %s5956_s9 }
 0x606   :  { %2507 = vrot.lane.b32.xlu1 %v6094_v27, %s5955_s8  ;;  %2309 = vrot.lane.b32.xlu0 %v6091_v25, %s5956_s9 }
 0x60a   :  { %2609 = vrot.lane.b32.xlu1 %v6099_v30, %s5956_s9  ;;  %2359 = vrot.lane.b32.xlu0 %v6083_v16, %s5956_s9 }
 0x60e   :  { %2607 = vrot.lane.b32.xlu1 %v6099_v30, %s5955_s8  ;;  %2409 = vrot.lane.b32.xlu0 %v6089_v24, %s5956_s9 }
 0x612   :  { %2459 = vrot.lane.b32.xlu0 %v6096_v29, %s5956_s9 }
 0x616   :  { %2457 = vrot.lane.b32.xlu0 %v6096_v29, %s5955_s8 }
 0x61a   :  { %2559 = vrot.lane.b32.xlu0 %v6102_v31, %s5956_s9 }
 0x61e   :  { %2557 = vrot.lane.b32.xlu0 %v6102_v31, %s5955_s8 }
 0x629   :  { %v1617_v2 = vpop.xlane.xlu1 %1616 }
 0x62a   :  { %5687 = vrcp.f32 %v1617_v2 }
 0x631   :  { %v1623_v4 = vpop.xlane.xlu1 %1622 }
 0x632   :  { %5689 = vrcp.f32 %v1623_v4 }
 0x634   :  { %v5688_v42 = vpop.eup %5687  ;;  %v1620_v10 = vpop.xlane.xlu0 %1619 }
 0x635   :  { %5691 = vrcp.f32 %v1620_v10  ;;  %v1647_v12 = vmul.f32 %v5688_v42, %v6435_v21  ;;  %v1904_v63 = vpop.permute.xlu1 %1903 }
 0x636   :  { %v1909_v47 = vsel %vm778_vm3, %v1904_v63, 0  ;;  %v1166_v63 = vld [vmem:[#allocation8] sm:$0xf] }
 0x637   :  { %v1655_v8 = vpack.c.bf16 %v1647_v12, %v1647_v12 }
 0x639   :  { %5301 = vmatmul.mubr.msk.bf16.vlgmr.msra.gmra.mrb[48].mxu0 %vm294_vm2, %v1655_v8 }
 0x63a   :  { %5311 = vmatpush3.bf16.msra.mxu0 %v1765_v17  ;;  %5312 = vmatprep.mubr.msk.bf16.mxu0 %vm5950_vm1, %v5949_v6 }
 0x63b   :  { %5322 = vmatprep.subr.bf16.mxu0 %v5949_v6 }
 0x63c   :  { %v5690_v19 = vpop.eup %5689  ;;  %v1626_v22 = vpop.xlane.xlu0 %1625 }
 0x63d   :  { %5693 = vrcp.f32 %v1626_v22  ;;  %v1649_v48 = vmul.f32 %v5690_v19, %v6439_v59  ;;  %v2056_v22 = vld [vmem:[#allocation8 + $0x4] sm:$0xf] }
 0x63f   :  { %v5692_v26 = vpop.eup %5691  ;;  %v1657_v34 = vpack.c.bf16 %v1649_v48, %v1649_v48 }
 0x640   :  { %v1856_v9 = vpop.permute.xlu0 %1855  ;;  %v1648_v21 = vmul.f32 %v5692_v26, %v6443_v13 }
 0x641   :  { %v1861_v28 = vsel %vm778_vm3, %v1856_v9, 0  ;;  %5313 = vmatmul.mubr.msk.bf16.vlgmr.msra.gmra.mrb[52].mxu0 %vm294_vm2, %v1657_v34  ;;  %v2090_v34 = vsel %vm778_vm3, %v2056_v22, 0 }
 0x642   :  { %5323 = vmatpush3.bf16.msra.mxu0 %v1861_v28  ;;  %v1656_v36 = vpack.c.bf16 %v1648_v21, %v1648_v21  ;;  %5324 = vmatprep.mubr.msk.bf16.mxu0 %vm5950_vm1, %v5949_v6 }
 0x643   :  { %5334 = vmatprep.subr.bf16.mxu0 %v5949_v6 }
 0x644   :  { %5307 = vmatmul.mubr.msk.bf16.vlgmr.msra.gmra.mrb[56].mxu1 %vm294_vm2, %v1656_v36 }
 0x645   :  { %5317 = vmatpush3.bf16.msra.mxu1 %v1813_v40  ;;  %5318 = vmatprep.mubr.msk.bf16.mxu1 %vm5950_vm1, %v5949_v6 }
 0x646   :  { %5328 = vmatprep.subr.bf16.mxu1 %v5949_v6 }
 0x647   :  { %v5694_v59 = vpop.eup %5693 }
 0x648   :  { %v1650_v13 = vmul.f32 %v5694_v59, %v6447_v35 }
 0x64a   :  { %v1658_v41 = vpack.c.bf16 %v1650_v13, %v1650_v13 }
 0x64c   :  { %5319 = vmatmul.mubr.msk.bf16.vlgmr.msra.gmra.mrb[60].mxu1 %vm294_vm2, %v1658_v41 }
 0x64d   :  { %5329 = vmatpush3.bf16.msra.mxu1 %v1909_v47  ;;  %5330 = vmatprep.mubr.msk.bf16.mxu1 %vm5950_vm1, %v5949_v6 }
 0x64e   :  { %5340 = vmatprep.subr.bf16.mxu1 %v5949_v6 }
 0x666   :  { %v1629_v52 = vpop.xlane.xlu1 %1628 }
 0x667   :  { %5695 = vrcp.f32 %v1629_v52 }
 0x66a   :  { %v1635_v53 = vpop.xlane.xlu1 %1634 }
 0x66b   :  { %5697 = vrcp.f32 %v1635_v53 }
 0x66e   :  { %v2000_v37 = vpop.permute.xlu1 %1999 }
 0x66f   :  { %v2005_v39 = vsel %vm778_vm3, %v2000_v37, 0  ;;  %v2190_v37 = vsel %vm778_vm3, %v1166_v63, 0 }
 0x671   :  { %v5696_v54 = vpop.eup %5695  ;;  %v1632_v55 = vpop.xlane.xlu0 %1631 }
 0x672   :  { %v1651_v35 = vmul.f32 %v5696_v54, %v6459_v1  ;;  %5699 = vrcp.f32 %v1632_v55  ;;  %v2258_v42 = vpop.permute.xlu1 %2257 }
 0x674   :  { %v1659_v57 = vpack.c.bf16 %v1651_v35, %v1651_v35 }
 0x675   :  { %v5698_v58 = vpop.eup %5697  ;;  %v1638_v60 = vpop.xlane.xlu0 %1637 }
 0x676   :  { %5701 = vrcp.f32 %v1638_v60  ;;  %5325 = vmatmul.mubr.msk.bf16.vlgmr.msra.gmra.mrb[56].mxu0 %vm294_vm2, %v1659_v57  ;;  %v1653_v45 = vmul.f32 %v5698_v58, %v6463_v56  ;;  %v2308_v12 = vpop.permute.xlu1 %2307 }
 0x677   :  { %5336 = vmatprep.mubr.msk.bf16.mxu0 %vm5950_vm1, %v5949_v6 }
 0x678   :  { %v1661_v62 = vpack.c.bf16 %v1653_v45, %v1653_v45 }
 0x679   :  { %v1952_v0 = vpop.permute.xlu0 %1951 }
 0x67a   :  { %v1957_v51 = vsel %vm778_vm3, %v1952_v0, 0 }
 0x67b   :  { %5335 = vmatpush3.bf16.msra.mxu0 %v1957_v51 }
 0x67c   :  { %v5700_v23 = vpop.eup %5699  ;;  %5606 = vmatprep.subr.msk.bf16.mxu0 %vm778_vm3, %v2056_v22 }
 0x67d   :  { %v1652_v1 = vmul.f32 %v5700_v23, %v6467_v5  ;;  %v2260_v2 = vpop.permute.xlu0 %2259 }
 0x67e   :  { %5337 = vmatmul.mubr.msk.bf16.vlgmr.msra.gmra.mrb[60].mxu0 %vm294_vm2, %v1661_v62  ;;  %v2265_v5 = vsel %vm294_vm2, %v2260_v2, 0 }
 0x67f   :  { %v1660_v7 = vpack.c.bf16 %v1652_v1, %v1652_v1  ;;  %5347 = vmatpush3.bf16.msra.mxu0 %v2090_v34 }
 0x680   :  { %v5702_v50 = vpop.eup %5701  ;;  %5607 = vmatprep.subr.msk.bf16.mxu0 %vm778_vm3, %v1166_v63 }
 0x681   :  { %5331 = vmatmul.mubr.msk.bf16.vlgmr.msra.gmra.mrb[64].mxu1 %vm294_vm2, %v1660_v7  ;;  %v1654_v56 = vmul.f32 %v5702_v50, %v6471_v43  ;;  %v2310_v10 = vpop.permute.xlu0 %2309  ;;  %v2358_v43 = vpop.permute.xlu1 %2357 }
 0x682   :  { %5341 = vmatpush3.bf16.msra.mxu1 %v2005_v39  ;;  %5342 = vmatprep.mubr.msk.bf16.mxu1 %vm5950_vm1, %v5949_v6  ;;  %v2315_v8 = vsel %vm294_vm2, %v2310_v10, 0 }
 0x683   :  { %5366 = vmatprep.subr.bf16.mxu1 %v5949_v6  ;;  %v1662_v4 = vpack.c.bf16 %v1654_v56, %v1654_v56 }
 0x685   :  { %v2360_v17 = vpop.permute.xlu0 %2359  ;;  %v2408_v48 = vpop.permute.xlu1 %2407 }
 0x686   :  { %v2365_v19 = vsel %vm294_vm2, %v2360_v17, 0 }
 0x689   :  { %5343 = vmatmul.mubr.msk.bf16.vlgmr.msra.gmra.mrb[68].mxu1 %vm294_vm2, %v1662_v4  ;;  %v2410_v26 = vpop.permute.xlu0 %2409  ;;  %v2510_v21 = vpop.permute.xlu1 %2509 }
 0x68a   :  { %5368 = vmatprep.mubr.msk.bf16.mxu1 %vm5950_vm1, %v5949_v6  ;;  %v2415_v9 = vsel %vm294_vm2, %v2410_v26, 0  ;;  %v2515_v36 = vsel %vm294_vm2, %v2510_v21, 0 }
 0x68b   :  { %5367 = vmatpush3.bf16.xpose.msra.mxu1 %v2265_v5 }
 0x68c   :  { %5372 = vmatprep.subr.bf16.mxu1 %v5949_v6 }
 0x68d   :  { %v2508_v28 = vpop.permute.xlu1 %2507 }
 0x691   :  { %v2610_v40 = vpop.permute.xlu1 %2609 }
 0x692   :  { %5369 = vmatmul.mubr.msk.bf16.vlgmr.msra.gmra.mrb[72].mxu1 %vm294_vm2, %v2258_v42  ;;  %v2615_v59 = vsel %vm294_vm2, %v2610_v40, 0  ;;  %v6603_v40 = vld [vmem:[#allocation5] ss:$0 sm:$0xff] }
 0x693   :  { %5373 = vmatpush3.bf16.xpose.msra.mxu1 %v2315_v8  ;;  %5374 = vmatprep.mubr.msk.bf16.mxu1 %vm5950_vm1, %v5949_v6 }
 0x694   :  { %5378 = vmatprep.subr.bf16.mxu1 %v5949_v6 }
 0x695   :  { %v2608_v13 = vpop.permute.xlu1 %2607 }
 0x69a   :  { %5375 = vmatmul.mubr.msk.bf16.vlgmr.msra.gmra.mrb[76].mxu1 %vm294_vm2, %v2308_v12 }
 0x69b   :  { %5379 = vmatpush3.bf16.xpose.msra.mxu1 %v2365_v19  ;;  %5380 = vmatprep.mubr.msk.bf16.mxu1 %vm5950_vm1, %v5949_v6 }
 0x69c   :  { %5384 = vmatprep.subr.bf16.mxu1 %v5949_v6 }
 0x6a2   :  { %5381 = vmatmul.mubr.msk.bf16.vlgmr.msra.gmra.mrb[80].mxu1 %vm294_vm2, %v2358_v43 }
 0x6a3   :  { %5385 = vmatpush3.bf16.xpose.msra.mxu1 %v2415_v9  ;;  %5386 = vmatprep.mubr.msk.bf16.mxu1 %vm5950_vm1, %v5949_v6 }
 0x6a4   :  { %5396 = vmatprep.subr.bf16.mxu1 %v5949_v6 }
 0x6aa   :  { %5387 = vmatmul.mubr.msk.bf16.vlgmr.msra.gmra.mrb[84].mxu1 %vm294_vm2, %v2408_v48 }
 0x6ab   :  { %5397 = vmatpush3.bf16.xpose.msra.mxu1 %v2515_v36  ;;  %5398 = vmatprep.mubr.msk.bf16.mxu1 %vm5950_vm1, %v5949_v6 }
 0x6ac   :  { %5408 = vmatprep.subr.bf16.mxu1 %v5949_v6 }
 0x6b2   :  { %5399 = vmatmul.mubr.msk.bf16.vlgmr.msra.gmra.mrb[88].mxu1 %vm294_vm2, %v2508_v28  ;;  %v2460_v28 = vpop.permute.xlu0 %2459 }
 0x6b3   :  { %5409 = vmatpush3.bf16.xpose.msra.mxu1 %v2615_v59  ;;  %5410 = vmatprep.mubr.msk.bf16.mxu1 %vm5950_vm1, %v5949_v6  ;;  %v2465_v63 = vsel %vm294_vm2, %v2460_v28, 0 }
 0x6b4   :  { %5420 = vmatprep.subr.bf16.mxu1 %v5949_v6 }
 0x6ba   :  { %5411 = vmatmul.mubr.msk.bf16.vlgmr.msra.gmra.mrb[92].mxu1 %vm294_vm2, %v2608_v13 }
 0x6bb   :  { %5422 = vmatprep.mubr.msk.bf16.mxu1 %vm5950_vm1, %v5949_v6 }
 0x70c   :  { %v6569_v41 = vpop.f32.mrb[48].mxu0 }
 0x70d   :  { %v5302_v47 = vpop.f32.mrb[49].mxu0 }
 0x70e   :  { %v1708_v52 = vpop.f32.mrb[50].mxu0 }
 0x70f   :  { %v5303_v53 = vpop.f32.mrb[51].mxu0 }
 0x714   :  { %v6571_v54 = vpop.f32.mrb[52].mxu0 }
 0x715   :  { %v5314_v55 = vpop.f32.mrb[53].mxu0 }
 0x716   :  { %v1804_v35 = vpop.f32.mrb[54].mxu0  ;;  %v2458_v55 = vpop.permute.xlu0 %2457 }
 0x717   :  { %v6573_v57 = vpop.f32.mrb[56].mxu1  ;;  %v5315_v58 = vpop.f32.mrb[55].mxu0  ;;  %v6620_v35 = vld [vmem:[#allocation5 + $0x1] ss:$0 sm:$0xff] }
 0x718   :  { %v4972_v60 = vpack.c.bf16 %v6573_v57, %v6569_v41  ;;  %v5308_v45 = vpop.f32.mrb[57].mxu1 }
 0x719   :  { %v1756_v0 = vpop.f32.mrb[58].mxu1 }
 0x71a   :  { %v5309_v51 = vpop.f32.mrb[59].mxu1  ;;  %5348 = vmatprep.mubr.msk.bf16.mxu0 %vm294_vm2, %v4972_v60  ;;  %v2560_v0 = vpop.permute.xlu0 %2559 }
 0x71f   :  { %v6578_v23 = vpop.f32.mrb[60].mxu1 }
 0x720   :  { %v4973_v62 = vpack.c.bf16 %v6578_v23, %v6571_v54  ;;  %v5320_v1 = vpop.f32.mrb[61].mxu1 }
 0x721   :  { %v1852_v7 = vpop.f32.mrb[62].mxu1 }
 0x722   :  { %v5321_v50 = vpop.f32.mrb[63].mxu1  ;;  %5349 = vmatmul.mubr.msk.bf16.vlgmr.msra.gmra.mrb[64].mxu0 %vm294_vm2, %v4973_v62  ;;  %v6630_v62 = vld [vmem:[#allocation5 + $0x2] ss:$0 sm:$0xff]  ;;  %v2565_v7 = vsel %vm294_vm2, %v2560_v0, 0 }
 0x723   :  { %5357 = vmatpush3.bf16.msra.mxu0 %v2190_v37 }
 0x724   :  { %5390 = vmatprep.subr.bf16.mxu0 %v5949_v6 }
 0x749   :  { %v6585_v39 = vpop.f32.mrb[56].mxu0 }
 0x74a   :  { %v5326_v56 = vpop.f32.mrb[57].mxu0 }
 0x74b   :  { %v1900_v2 = vpop.f32.mrb[58].mxu0 }
 0x74c   :  { %v5327_v4 = vpop.f32.mrb[59].mxu0 }
 0x74d   :  { %v2558_v4 = vpop.permute.xlu0 %2557 }
 0x751   :  { %v6587_v5 = vpop.f32.mrb[60].mxu0 }
 0x752   :  { %v5338_v42 = vpop.f32.mrb[61].mxu0 }
 0x753   :  { %v1996_v10 = vpop.f32.mrb[62].mxu0  ;;  %v6642_v42 = vld [vmem:[#allocation5 + $0x3] ss:$0 sm:$0xff] }
 0x754   :  { %v6589_v12 = vpop.f32.mrb[64].mxu1  ;;  %v5339_v8 = vpop.f32.mrb[63].mxu0 }
 0x755   :  { %v4974_v43 = vpack.c.bf16 %v6589_v12, %v6585_v39  ;;  %v5332_v17 = vpop.f32.mrb[65].mxu1 }
 0x756   :  { %v1948_v19 = vpop.f32.mrb[66].mxu1 }
 0x757   :  { %v5333_v22 = vpop.f32.mrb[67].mxu1  ;;  %5352 = vmatprep.mubr.msk.bf16.mxu0 %vm294_vm2, %v4974_v43 }
 0x75c   :  { %v6594_v48 = vpop.f32.mrb[68].mxu1 }
 0x75d   :  { %v4975_v26 = vpack.c.bf16 %v6594_v48, %v6587_v5  ;;  %v5344_v34 = vpop.f32.mrb[69].mxu1 }
 0x75e   :  { %v2044_v9 = vpop.f32.mrb[70].mxu1 }
 0x75f   :  { %v5345_v21 = vpop.f32.mrb[71].mxu1  ;;  %5353 = vmatmul.mubr.msk.bf16.gmra.mrb[68].mxu0 %vm294_vm2, %v4975_v26  ;;  %v6649_v26 = vld [vmem:[#allocation5 + $0x5] ss:$0 sm:$0xff] }
 0x760   :  { %5358 = vmatprep.mubr.msk.bf16.mxu0 %vm294_vm2, %v4976_v18 }
 0x765   :  { %v2301_v36 = vpop.f32.mrb[72].mxu1 }
 0x766   :  { %v6606_v59 = vadd.f32 %v6603_v40, %v2301_v36  ;;  %v5370_v13 = vpop.f32.mrb[73].mxu1 }
 0x767   :  { %v2304_v47 = vpop.f32.mrb[74].mxu1  ;;  %5359 = vmatmul.mubr.msk.bf16.vlgmr.msra.gmra.mrb[64].mxu0 %vm294_vm2, %v4977_v38 }
 0x768   :  { %v5371_v52 = vpop.f32.mrb[75].mxu1  ;;  %5391 = vmatpush3.bf16.xpose.msra.mxu0 %v2465_v63  ;;  %5362 = vmatprep.mubr.msk.bf16.mxu0 %vm294_vm2, %v4978_v46  ;;  %v2657_v18 = vsel %vm294_vm2, %v6606_v59, -inf  ;;  %v6653_v63 = vld [vmem:[#allocation5 + $0x7] ss:$0 sm:$0xff] }
 0x769   :  { %2658 = vmax.xlane.f32.xlu0 %v2657_v18  ;;  %5402 = vmatprep.subr.bf16.mxu0 %v5949_v6 }
 0x76d   :  { %v2351_v53 = vpop.f32.mrb[76].mxu1 }
 0x76e   :  { %v2352_v58 = vadd.f32 %v6620_v35, %v2351_v53  ;;  %v5376_v38 = vpop.f32.mrb[77].mxu1 }
 0x76f   :  { %v2354_v60 = vpop.f32.mrb[78].mxu1  ;;  %5363 = vmatmul.mubr.msk.bf16.gmra.mrb[68].mxu0 %vm294_vm2, %v4979_v3 }
 0x770   :  { %v5377_v46 = vpop.f32.mrb[79].mxu1  ;;  %v2660_v45 = vsel %vm294_vm2, %v2352_v58, -inf  ;;  %5392 = vmatprep.mubr.msk.bf16.mxu0 %vm5950_vm1, %v5949_v6 }
 0x771   :  { %2661 = vmax.xlane.f32.xlu1 %v2660_v45 }
 0x775   :  { %v2401_v51 = vpop.f32.mrb[80].mxu1 }
 0x776   :  { %v6633_v1 = vadd.f32 %v6630_v62, %v2401_v51  ;;  %v5382_v37 = vpop.f32.mrb[81].mxu1 }
 0x777   :  { %v2404_v50 = vpop.f32.mrb[82].mxu1  ;;  %5393 = vmatmul.mubr.msk.bf16.vlgmr.msra.gmra.mrb[72].mxu0 %vm294_vm2, %v2458_v55 }
 0x778   :  { %v5383_v3 = vpop.f32.mrb[83].mxu1  ;;  %5403 = vmatpush3.bf16.xpose.msra.mxu0 %v2565_v7  ;;  %v2663_v56 = vsel %vm294_vm2, %v6633_v1, -inf  ;;  %5404 = vmatprep.mubr.msk.bf16.mxu0 %vm5950_vm1, %v5949_v6 }
 0x779   :  { %2664 = vmax.xlane.f32.xlu0 %v2663_v56  ;;  %5414 = vmatprep.subr.bf16.mxu0 %v5949_v6 }
 0x77d   :  { %v2451_v2 = vpop.f32.mrb[84].mxu1 }
 0x77e   :  { %v2452_v10 = vadd.f32 %v6642_v42, %v2451_v2  ;;  %v5388_v8 = vpop.f32.mrb[85].mxu1 }
 0x77f   :  { %v2454_v43 = vpop.f32.mrb[86].mxu1  ;;  %5405 = vmatmul.mubr.msk.bf16.vlgmr.msra.gmra.mrb[76].mxu0 %vm294_vm2, %v2558_v4 }
 0x780   :  { %v5389_v17 = vpop.f32.mrb[87].mxu1  ;;  %v2666_v19 = vsel %vm294_vm2, %v2452_v10, -inf  ;;  %5416 = vmatprep.mubr.msk.bf16.mxu0 %vm5950_vm1, %v5949_v6 }
 0x781   :  { %2667 = vmax.xlane.f32.xlu0 %v2666_v19 }
 0x785   :  { %v2551_v22 = vpop.f32.mrb[88].mxu1 }
 0x786   :  { %v2552_v34 = vadd.f32 %v6649_v26, %v2551_v22  ;;  %v5400_v9 = vpop.f32.mrb[89].mxu1 }
 0x787   :  { %v2554_v21 = vpop.f32.mrb[90].mxu1 }
 0x788   :  { %v5401_v28 = vpop.f32.mrb[91].mxu1  ;;  %v2672_v36 = vsel %vm294_vm2, %v2552_v34, -inf }
 0x789   :  { %2673 = vmax.xlane.f32.xlu0 %v2672_v36 }
 0x78d   :  { %v2651_v13 = vpop.f32.mrb[92].mxu1 }
 0x78e   :  { %v2652_v47 = vadd.f32 %v6653_v63, %v2651_v13  ;;  %v5412_v52 = vpop.f32.mrb[93].mxu1 }
 0x78f   :  { %v2654_v18 = vpop.f32.mrb[94].mxu1 }
 0x790   :  { %v5413_v53 = vpop.f32.mrb[95].mxu1  ;;  %v2678_v55 = vsel %vm294_vm2, %v2652_v47, -inf }
 0x791   :  { %2679 = vmax.xlane.f32.xlu0 %v2678_v55 }
 0x7f6   :  { %v2659_v45 = vpop.xlane.xlu0 %2658 }
 0x7f7   :  { %v2681_v21 = vsub.f32 %v6606_v59, %v2659_v45 }
 0x7f9   :  { %v2689_v28 = vmul.f32 1.442695, %v2681_v21 }
 0x7fe   :  { %v2662_v38 = vpop.xlane.xlu1 %2661 }
 0x7ff   :  { %v2682_v60 = vsub.f32 %v2352_v58, %v2662_v38 }
 0x801   :  { %v2691_v46 = vmul.f32 1.442695, %v2682_v60  ;;  %v6687_v60 = vld [vmem:[#allocation5 + $0x6] ss:$0 sm:$0xff] }
 0x803   :  { %5703 = vpow2.f32 %v2691_v46 }
 0x806   :  { %v2665_v0 = vpop.xlane.xlu0 %2664 }
 0x807   :  { %v2683_v36 = vsub.f32 %v6633_v1, %v2665_v0 }
 0x809   :  { %v2693_v53 = vmul.f32 1.442695, %v2683_v36 }
 0x80d   :  { %v6657_v51 = vpop.eup %5703 }
 0x80e   :  { %v2668_v37 = vpop.xlane.xlu0 %2667  ;;  %v2708_v7 = vsel %vm294_vm2, %v6657_v51, 0.0 }
 0x80f   :  { %v2684_v50 = vsub.f32 %v2452_v10, %v2668_v37  ;;  %2709 = vadd.xlane.f32.xlu0 %v2708_v7 }
 0x811   :  { %v2695_v3 = vmul.f32 1.442695, %v2684_v50 }
 0x813   :  { %5705 = vpow2.f32 %v2695_v3 }
 0x816   :  { %v2674_v56 = vpop.xlane.xlu0 %2673 }
 0x817   :  { %v2686_v2 = vsub.f32 %v2552_v34, %v2674_v56 }
 0x819   :  { %v2699_v4 = vmul.f32 1.442695, %v2686_v2 }
 0x81b   :  { %5707 = vpow2.f32 %v2699_v4 }
 0x81d   :  { %v6661_v8 = vpop.eup %5705 }
 0x81e   :  { %v2680_v58 = vpop.xlane.xlu0 %2679  ;;  %v2714_v43 = vsel %vm294_vm2, %v6661_v8, 0.0 }
 0x81f   :  { %v2688_v17 = vsub.f32 %v2652_v47, %v2680_v58  ;;  %2715 = vadd.xlane.f32.xlu0 %v2714_v43  ;;  %v6679_v47 = vld [vmem:[#allocation5 + $0x4] ss:$0 sm:$0xff] }
 0x821   :  { %v2703_v19 = vmul.f32 1.442695, %v2688_v17 }
 0x823   :  { %5709 = vpow2.f32 %v2703_v19 }
 0x824   :  { %5711 = vpow2.f32 %v2689_v28 }
 0x825   :  { %v6665_v22 = vpop.eup %5707  ;;  %5713 = vpow2.f32 %v2693_v53 }
 0x826   :  { %v2720_v10 = vsel %vm294_vm2, %v6665_v22, 0.0 }
 0x827   :  { %2721 = vadd.xlane.f32.xlu0 %v2720_v10 }
 0x82d   :  { %v6669_v9 = vpop.eup %5709 }
 0x82e   :  { %v2726_v34 = vsel %vm294_vm2, %v6669_v9, 0.0  ;;  %v5712_v50 = vpop.eup %5711 }
 0x82f   :  { %2727 = vadd.xlane.f32.xlu0 %v2726_v34  ;;  %v2705_v3 = vsel %vm294_vm2, %v5712_v50, 0.0  ;;  %v6696_v56 = vpop.eup %5713 }
 0x830   :  { %v2711_v2 = vsel %vm294_vm2, %v6696_v56, 0.0 }
 0x845   :  { %2801 = vrot.lane.b32.xlu0 %v6091_v25, %s5957_s10 }
 0x849   :  { %2945 = vrot.lane.b32.xlu0 %v6096_v29, %s5957_s10 }
 0x84a   :  { %v2501_v13 = vpop.f32.mrb[72].mxu0 }
 0x84b   :  { %v2502_v52 = vadd.f32 %v6679_v47, %v2501_v13  ;;  %v5394_v18 = vpop.f32.mrb[73].mxu0 }
 0x84c   :  { %v2504_v55 = vpop.f32.mrb[74].mxu0 }
 0x84d   :  { %3041 = vrot.lane.b32.xlu0 %v6102_v31, %s5957_s10  ;;  %v5395_v59 = vpop.f32.mrb[75].mxu0  ;;  %v2669_v38 = vsel %vm294_vm2, %v2502_v52, -inf }
 0x84e   :  { %2670 = vmax.xlane.f32.xlu1 %v2669_v38 }
 0x851   :  { %3257 = vrot.lane.b32.xlu0 %v6085_v20, %s5958_s12 }
 0x852   :  { %v2601_v1 = vpop.f32.mrb[76].mxu0 }
 0x853   :  { %v2602_v46 = vadd.f32 %v6687_v60, %v2601_v1  ;;  %v5406_v45 = vpop.f32.mrb[77].mxu0 }
 0x854   :  { %v2604_v0 = vpop.f32.mrb[78].mxu0 }
 0x855   :  { %3307 = vrot.lane.b32.xlu0 %v6091_v25, %s5958_s12  ;;  %v5407_v37 = vpop.f32.mrb[79].mxu0  ;;  %v2675_v7 = vsel %vm294_vm2, %v2602_v46, -inf }
 0x856   :  { %2676 = vmax.xlane.f32.xlu1 %v2675_v7 }
 0x859   :  { %3357 = vrot.lane.b32.xlu0 %v6083_v16, %s5958_s12 }
 0x85a   :  { %2706 = vadd.xlane.f32.xlu1 %v2705_v3 }
 0x85d   :  { %3355 = vrot.lane.b32.xlu0 %v6083_v16, %s5959_s13 }
 0x85e   :  { %2712 = vadd.xlane.f32.xlu1 %v2711_v2 }
 0x861   :  { %3457 = vrot.lane.b32.xlu0 %v6096_v29, %s5958_s12 }
 0x865   :  { %3455 = vrot.lane.b32.xlu0 %v6096_v29, %s5959_s13 }
 0x869   :  { %3557 = vrot.lane.b32.xlu0 %v6102_v31, %s5958_s12 }
 0x86d   :  { %3555 = vrot.lane.b32.xlu0 %v6102_v31, %s5959_s13 }
 0x86f   :  { %2753 = vrot.lane.b32.xlu1 %v6085_v20, %s5957_s10 }
 0x873   :  { %2849 = vrot.lane.b32.xlu1 %v6083_v16, %s5957_s10 }
 0x877   :  { %2897 = vrot.lane.b32.xlu1 %v6089_v24, %s5957_s10 }
 0x87b   :  { %2993 = vrot.lane.b32.xlu1 %v6094_v27, %s5957_s10 }
 0x89c   :  { %v2710_v4 = vpop.xlane.xlu0 %2709 }
 0x89d   :  { %5715 = vrcp.f32 %v2710_v4 }
 0x8a7   :  { %v5716_v17 = vpop.eup %5715 }
 0x8a8   :  { %v2738_v10 = vmul.f32 %v5716_v17, %v6657_v51 }
 0x8aa   :  { %v2746_v28 = vpack.c.bf16 %v2738_v10, %v2738_v10 }
 0x8ac   :  { %v2716_v58 = vpop.xlane.xlu0 %2715 }
 0x8b4   :  { %v2722_v43 = vpop.xlane.xlu0 %2721 }
 0x8bc   :  { %v6718_v19 = vpop.xlane.xlu0 %2727 }
 0x8c0   :  { %v2802_v34 = vpop.permute.xlu0 %2801 }
 0x8c1   :  { %v2807_v21 = vsel %vm778_vm3, %v2802_v34, 0 }
 0x8c2   :  { %5421 = vmatpush3.bf16.msra.mxu1 %v2807_v21 }
 0x8c3   :  { %5432 = vmatprep.subr.bf16.mxu1 %v5949_v6 }
 0x8c5   :  { %5423 = vmatmul.mubr.msk.bf16.vlgmr.msra.gmra.mrb[96].mxu1 %vm294_vm2, %v2746_v28 }
 0x8c6   :  { %5434 = vmatprep.mubr.msk.bf16.mxu1 %vm5950_vm1, %v5949_v6 }
 0x8db   :  { %v2671_v36 = vpop.xlane.xlu1 %2670 }
 0x8dc   :  { %v2685_v13 = vsub.f32 %v2502_v52, %v2671_v36 }
 0x8de   :  { %v2697_v18 = vmul.f32 1.442695, %v2685_v13 }
 0x8e0   :  { %5717 = vpow2.f32 %v2697_v18  ;;  %v2946_v18 = vpop.permute.xlu0 %2945 }
 0x8e1   :  { %5719 = vrcp.f32 %v2716_v58 }
 0x8e3   :  { %v2677_v53 = vpop.xlane.xlu1 %2676 }
 0x8e4   :  { %v2687_v55 = vsub.f32 %v2602_v46, %v2677_v53 }
 0x8e6   :  { %v2701_v59 = vmul.f32 1.442695, %v2687_v55  ;;  %v2951_v55 = vsel %vm778_vm3, %v2946_v18, 0 }
 0x8e7   :  { %v2707_v51 = vpop.xlane.xlu1 %2706 }
 0x8e8   :  { %5721 = vpow2.f32 %v2701_v59 }
 0x8e9   :  { %5723 = vrcp.f32 %v2707_v51 }
 0x8ea   :  { %v6726_v38 = vpop.eup %5717 }
 0x8eb   :  { %v2713_v1 = vpop.xlane.xlu1 %2712  ;;  %v2717_v45 = vsel %vm294_vm2, %v6726_v38, 0.0  ;;  %v5720_v37 = vpop.eup %5719 }
 0x8ec   :  { %2718 = vadd.xlane.f32.xlu1 %v2717_v45  ;;  %5725 = vrcp.f32 %v2713_v1  ;;  %v2740_v58 = vmul.f32 %v5720_v37, %v6661_v8 }
 0x8ed   :  { %5727 = vrcp.f32 %v2722_v43 }
 0x8ee   :  { %v2748_v36 = vpack.c.bf16 %v2740_v58, %v2740_v58  ;;  %5729 = vrcp.f32 %v6718_v19 }
 0x8ef   :  { %v2754_v0 = vpop.permute.xlu1 %2753 }
 0x8f0   :  { %v2759_v52 = vsel %vm778_vm3, %v2754_v0, 0 }
 0x8f1   :  { %5415 = vmatpush3.bf16.msra.mxu0 %v2759_v52 }
 0x8f2   :  { %v6731_v46 = vpop.eup %5721  ;;  %5426 = vmatprep.subr.bf16.mxu0 %v5949_v6 }
 0x8f3   :  { %v5724_v7 = vpop.eup %5723  ;;  %v2850_v3 = vpop.permute.xlu1 %2849  ;;  %v2723_v2 = vsel %vm294_vm2, %v6731_v46, 0.0 }
 0x8f4   :  { %v2737_v4 = vmul.f32 %v5724_v7, %v5712_v50  ;;  %2724 = vadd.xlane.f32.xlu1 %v2723_v2  ;;  %v2855_v21 = vsel %vm778_vm3, %v2850_v3, 0  ;;  %v3042_v7 = vpop.permute.xlu0 %3041 }
 0x8f5   :  { %v3047_v19 = vsel %vm778_vm3, %v3042_v7, 0 }
 0x8f6   :  { %v2745_v17 = vpack.c.bf16 %v2737_v4, %v2737_v4  ;;  %v5726_v10 = vpop.eup %5725 }
 0x8f7   :  { %v2898_v34 = vpop.permute.xlu1 %2897  ;;  %v2739_v28 = vmul.f32 %v5726_v10, %v6696_v56  ;;  %v5728_v8 = vpop.eup %5727 }
 0x8f8   :  { %5417 = vmatmul.mubr.msk.bf16.vlgmr.msra.gmra.mrb[80].mxu0 %vm294_vm2, %v2745_v17  ;;  %v2903_v43 = vsel %vm778_vm3, %v2898_v34, 0  ;;  %v2742_v56 = vmul.f32 %v5728_v8, %v6665_v22  ;;  %v5730_v51 = vpop.eup %5729  ;;  %v3146_v17 = vld [vmem:[#allocation8 + $0x8] sm:$0xf] }
 0x8f9   :  { %5427 = vmatpush3.bf16.msra.mxu0 %v2855_v21  ;;  %5433 = vmatpush3.bf16.msra.mxu1 %v2903_v43  ;;  %v2747_v53 = vpack.c.bf16 %v2739_v28, %v2739_v28  ;;  %v2744_v0 = vmul.f32 %v5730_v51, %v6669_v9  ;;  %v3180_v28 = vsel %vm778_vm3, %v3146_v17, 0 }
 0x8fa   :  { %5444 = vmatprep.subr.bf16.mxu1 %v5949_v6  ;;  %5428 = vmatprep.mubr.msk.bf16.mxu0 %vm5950_vm1, %v5949_v6  ;;  %v2750_v59 = vpack.c.bf16 %v2742_v56, %v2742_v56 }
 0x8fb   :  { %v2994_v50 = vpop.permute.xlu1 %2993  ;;  %5438 = vmatprep.subr.bf16.mxu0 %v5949_v6  ;;  %v2752_v4 = vpack.c.bf16 %v2744_v0, %v2744_v0 }
 0x8fc   :  { %v2999_v13 = vsel %vm778_vm3, %v2994_v50, 0  ;;  %5435 = vmatmul.mubr.msk.bf16.vlgmr.msra.gmra.mrb[100].mxu1 %vm294_vm2, %v2748_v36 }
 0x8fd   :  { %5445 = vmatpush3.bf16.msra.mxu1 %v2999_v13  ;;  %5446 = vmatprep.mubr.msk.bf16.mxu1 %vm5950_vm1, %v5949_v6 }
 0x8fe   :  { %5456 = vmatprep.subr.bf16.mxu1 %v5949_v6 }
 0x900   :  { %5429 = vmatmul.mubr.msk.bf16.vlgmr.msra.gmra.mrb[84].mxu0 %vm294_vm2, %v2747_v53 }
 0x901   :  { %5439 = vmatpush3.bf16.msra.mxu0 %v2951_v55  ;;  %5440 = vmatprep.mubr.msk.bf16.mxu0 %vm5950_vm1, %v5949_v6 }
 0x902   :  { %5450 = vmatprep.subr.bf16.mxu0 %v5949_v6 }
 0x904   :  { %5447 = vmatmul.mubr.msk.bf16.vlgmr.msra.gmra.mrb[104].mxu1 %vm294_vm2, %v2750_v59 }
 0x905   :  { %3089 = vrot.lane.b32.xlu1 %v6099_v30, %s5957_s10  ;;  %5458 = vmatprep.mubr.msk.bf16.mxu1 %vm5950_vm1, %v5949_v6 }
 0x909   :  { %3255 = vrot.lane.b32.xlu1 %v6085_v20, %s5959_s13 }
 0x90d   :  { %3305 = vrot.lane.b32.xlu1 %v6091_v25, %s5959_s13 }
 0x911   :  { %3407 = vrot.lane.b32.xlu1 %v6089_v24, %s5958_s12 }
 0x915   :  { %3405 = vrot.lane.b32.xlu1 %v6089_v24, %s5959_s13 }
 0x919   :  { %3507 = vrot.lane.b32.xlu1 %v6094_v27, %s5958_s12 }
 0x91d   :  { %3505 = vrot.lane.b32.xlu1 %v6094_v27, %s5959_s13 }
 0x921   :  { %3607 = vrot.lane.b32.xlu1 %v6099_v30, %s5958_s12 }
 0x925   :  { %3605 = vrot.lane.b32.xlu1 %v6099_v30, %s5959_s13 }
 0x979   :  { %v2719_v22 = vpop.xlane.xlu1 %2718 }
 0x97a   :  { %5731 = vrcp.f32 %v2719_v22 }
 0x981   :  { %v2725_v1 = vpop.xlane.xlu1 %2724 }
 0x982   :  { %5733 = vrcp.f32 %v2725_v1 }
 0x984   :  { %v5732_v45 = vpop.eup %5731 }
 0x985   :  { %v2741_v52 = vmul.f32 %v5732_v45, %v6726_v38  ;;  %v3090_v37 = vpop.permute.xlu1 %3089  ;;  %v3258_v38 = vpop.permute.xlu0 %3257 }
 0x986   :  { %v3095_v3 = vsel %vm778_vm3, %v3090_v37, 0  ;;  %v3263_v21 = vsel %vm294_vm2, %v3258_v38, 0 }
 0x987   :  { %5457 = vmatpush3.bf16.msra.mxu1 %v3095_v3  ;;  %v2749_v2 = vpack.c.bf16 %v2741_v52, %v2741_v52 }
 0x988   :  { %5472 = vmatprep.subr.bf16.mxu1 %v5949_v6 }
 0x989   :  { %v3256_v58 = vpop.permute.xlu1 %3255  ;;  %5441 = vmatmul.mubr.msk.bf16.vlgmr.msra.gmra.mrb[88].mxu0 %vm294_vm2, %v2749_v2  ;;  %v3308_v36 = vpop.permute.xlu0 %3307 }
 0x98a   :  { %5451 = vmatpush3.bf16.msra.mxu0 %v3047_v19  ;;  %5459 = vmatmul.mubr.msk.bf16.vlgmr.msra.gmra.mrb[108].mxu1 %vm294_vm2, %v2752_v4  ;;  %v3313_v50 = vsel %vm294_vm2, %v3308_v36, 0 }
 0x98b   :  { %5452 = vmatprep.mubr.msk.bf16.mxu0 %vm5950_vm1, %v5949_v6  ;;  %5474 = vmatprep.mubr.msk.bf16.mxu1 %vm5950_vm1, %v5949_v6 }
 0x98c   :  { %v5734_v9 = vpop.eup %5733  ;;  %5608 = vmatprep.subr.msk.bf16.mxu0 %vm778_vm3, %v3146_v17 }
 0x98d   :  { %v2743_v10 = vmul.f32 %v5734_v9, %v6731_v46  ;;  %v3306_v34 = vpop.permute.xlu1 %3305  ;;  %v3358_v9 = vpop.permute.xlu0 %3357 }
 0x98f   :  { %v2751_v43 = vpack.c.bf16 %v2743_v10, %v2743_v10 }
 0x990   :  { %5473 = vmatpush3.bf16.xpose.msra.mxu1 %v3263_v21 }
 0x991   :  { %5453 = vmatmul.mubr.msk.bf16.vlgmr.msra.gmra.mrb[92].mxu0 %vm294_vm2, %v2751_v43  ;;  %5478 = vmatprep.subr.bf16.mxu1 %v5949_v6  ;;  %v3408_v8 = vpop.permute.xlu1 %3407  ;;  %v3363_v43 = vsel %vm294_vm2, %v3358_v9, 0 }
 0x992   :  { %5463 = vmatpush3.bf16.msra.mxu0 %v3180_v28  ;;  %v3413_v55 = vsel %vm294_vm2, %v3408_v8, 0 }
 0x993   :  { %5484 = vmatprep.subr.bf16.mxu0 %v5949_v6 }
 0x995   :  { %v3406_v18 = vpop.permute.xlu1 %3405 }
 0x997   :  { %5475 = vmatmul.mubr.msk.bf16.vlgmr.msra.gmra.mrb[112].mxu1 %vm294_vm2, %v3256_v58 }
 0x998   :  { %v6798_v46 = vpop.f32.mrb[96].mxu1  ;;  %5479 = vmatpush3.bf16.xpose.msra.mxu1 %v3313_v50  ;;  %5480 = vmatprep.mubr.msk.bf16.mxu1 %vm5950_vm1, %v5949_v6 }
 0x999   :  { %v5424_v13 = vpop.f32.mrb[97].mxu1  ;;  %5490 = vmatprep.subr.bf16.mxu1 %v5949_v6  ;;  %v3508_v59 = vpop.permute.xlu1 %3507 }
 0x99a   :  { %v2846_v56 = vpop.f32.mrb[98].mxu1  ;;  %v3513_v51 = vsel %vm294_vm2, %v3508_v59, 0 }
 0x99b   :  { %v5425_v53 = vpop.f32.mrb[99].mxu1 }
 0x99d   :  { %v3506_v22 = vpop.permute.xlu1 %3505 }
 0x99f   :  { %5481 = vmatmul.mubr.msk.bf16.vlgmr.msra.gmra.mrb[116].mxu1 %vm294_vm2, %v3306_v34 }
 0x9a0   :  { %5491 = vmatpush3.bf16.xpose.msra.mxu1 %v3413_v55  ;;  %5492 = vmatprep.mubr.msk.bf16.mxu1 %vm5950_vm1, %v5949_v6 }
 0x9a1   :  { %5502 = vmatprep.subr.bf16.mxu1 %v5949_v6  ;;  %v3608_v1 = vpop.permute.xlu1 %3607 }
 0x9a2   :  { %v3613_v45 = vsel %vm294_vm2, %v3608_v1, 0 }
 0x9a5   :  { %v3606_v0 = vpop.permute.xlu1 %3605 }
 0x9a7   :  { %5493 = vmatmul.mubr.msk.bf16.vlgmr.msra.gmra.mrb[120].mxu1 %vm294_vm2, %v3406_v18 }
 0x9a8   :  { %5503 = vmatpush3.bf16.xpose.msra.mxu1 %v3513_v51  ;;  %5504 = vmatprep.mubr.msk.bf16.mxu1 %vm5950_vm1, %v5949_v6 }
 0x9a9   :  { %5514 = vmatprep.subr.bf16.mxu1 %v5949_v6 }
 0x9af   :  { %5505 = vmatmul.mubr.msk.bf16.vlgmr.msra.gmra.mrb[124].mxu1 %vm294_vm2, %v3506_v22 }
 0x9b0   :  { %5515 = vmatpush3.bf16.xpose.msra.mxu1 %v3613_v45  ;;  %5516 = vmatprep.mubr.msk.bf16.mxu1 %vm5950_vm1, %v5949_v6 }
 0x9b1   :  { %5526 = vmatprep.subr.bf16.mxu1 %v5949_v6 }
 0x9b7   :  { %5517 = vmatmul.mubr.msk.bf16.vlgmr.msra.gmra.mrb[128].mxu1 %vm294_vm2, %v3606_v0  ;;  %v3356_v0 = vpop.permute.xlu0 %3355 }
 0x9b8   :  { %5528 = vmatprep.mubr.msk.bf16.mxu1 %vm5950_vm1, %v5949_v6 }
 0x9cb   :  { %v6821_v52 = vpop.f32.mrb[80].mxu0 }
 0x9cc   :  { %v4980_v37 = vpack.c.bf16 %v6798_v46, %v6821_v52  ;;  %v5418_v7 = vpop.f32.mrb[81].mxu0 }
 0x9cd   :  { %v2798_v3 = vpop.f32.mrb[82].mxu0 }
 0x9ce   :  { %v5419_v2 = vpop.f32.mrb[83].mxu0  ;;  %5464 = vmatprep.mubr.msk.bf16.mxu0 %vm294_vm2, %v4980_v37 }
 0x9cf   :  { %v6826_v4 = vpop.f32.mrb[100].mxu1 }
 0x9d0   :  { %v5436_v19 = vpop.f32.mrb[101].mxu1 }
 0x9d1   :  { %v2942_v58 = vpop.f32.mrb[102].mxu1 }
 0x9d2   :  { %v5437_v17 = vpop.f32.mrb[103].mxu1  ;;  %v3458_v58 = vpop.permute.xlu0 %3457 }
 0x9d3   :  { %v6828_v38 = vpop.f32.mrb[84].mxu0 }
 0x9d4   :  { %v4981_v10 = vpack.c.bf16 %v6826_v4, %v6828_v38  ;;  %v5430_v34 = vpop.f32.mrb[85].mxu0 }
 0x9d5   :  { %v2894_v21 = vpop.f32.mrb[86].mxu0 }
 0x9d6   :  { %v5431_v28 = vpop.f32.mrb[87].mxu0  ;;  %5465 = vmatmul.mubr.msk.bf16.vlgmr.msra.gmra.mrb[64].mxu0 %vm294_vm2, %v4981_v10 }
 0x9d7   :  { %5485 = vmatpush3.bf16.xpose.msra.mxu0 %v3363_v43  ;;  %v6834_v36 = vpop.f32.mrb[104].mxu1  ;;  %v3456_v28 = vpop.permute.xlu0 %3455 }
 0x9d8   :  { %v5448_v8 = vpop.f32.mrb[105].mxu1  ;;  %5496 = vmatprep.subr.bf16.mxu0 %v5949_v6 }
 0x9d9   :  { %v3038_v50 = vpop.f32.mrb[106].mxu1  ;;  %v3463_v8 = vsel %vm294_vm2, %v3458_v58, 0 }
 0x9da   :  { %v5449_v13 = vpop.f32.mrb[107].mxu1 }
 0xa5c   :  { %v6837_v18 = vpop.f32.mrb[88].mxu0 }
 0xa5d   :  { %v4982_v56 = vpack.c.bf16 %v6834_v36, %v6837_v18  ;;  %v5442_v53 = vpop.f32.mrb[89].mxu0  ;;  %v6841_v55 = vpop.f32.mrb[108].mxu1 }
 0xa5e   :  { %v2990_v59 = vpop.f32.mrb[90].mxu0  ;;  %v5460_v22 = vpop.f32.mrb[109].mxu1 }
 0xa5f   :  { %v5443_v51 = vpop.f32.mrb[91].mxu0  ;;  %v3134_v1 = vpop.f32.mrb[110].mxu1  ;;  %5468 = vmatprep.mubr.msk.bf16.mxu0 %vm294_vm2, %v4982_v56 }
 0xa60   :  { %v5461_v45 = vpop.f32.mrb[111].mxu1  ;;  %v3558_v56 = vpop.permute.xlu0 %3557 }
 0xa61   :  { %v3563_v51 = vsel %vm294_vm2, %v3558_v56, 0 }
 0xa64   :  { %v6844_v37 = vpop.f32.mrb[92].mxu0 }
 0xa65   :  { %v4983_v7 = vpack.c.bf16 %v6841_v55, %v6844_v37  ;;  %v5454_v3 = vpop.f32.mrb[93].mxu0 }
 0xa66   :  { %v3086_v2 = vpop.f32.mrb[94].mxu0 }
 0xa67   :  { %v5455_v19 = vpop.f32.mrb[95].mxu0  ;;  %5469 = vmatmul.mubr.msk.bf16.gmra.mrb[68].mxu0 %vm294_vm2, %v4983_v7  ;;  %v3556_v7 = vpop.permute.xlu0 %3555 }
 0xa68   :  { %5486 = vmatprep.mubr.msk.bf16.mxu0 %vm5950_vm1, %v5949_v6 }
 0xa6a   :  { %v3299_v17 = vpop.f32.mrb[112].mxu1 }
 0xa6b   :  { %v3300_v9 = vadd.f32 %v6603_v40, %v3299_v17  ;;  %v5476_v10 = vpop.f32.mrb[113].mxu1 }
 0xa6c   :  { %v3302_v34 = vpop.f32.mrb[114].mxu1 }
 0xa6d   :  { %v5477_v21 = vpop.f32.mrb[115].mxu1  ;;  %v3655_v43 = vsel %vm294_vm2, %v3300_v9, -inf }
 0xa6e   :  { %3656 = vmax.xlane.f32.xlu0 %v3655_v43 }
 0xa6f   :  { %5487 = vmatmul.mubr.msk.bf16.vlgmr.msra.gmra.mrb[96].mxu0 %vm294_vm2, %v3356_v0 }
 0xa70   :  { %5497 = vmatpush3.bf16.xpose.msra.mxu0 %v3463_v8  ;;  %5498 = vmatprep.mubr.msk.bf16.mxu0 %vm5950_vm1, %v5949_v6 }
 0xa71   :  { %5508 = vmatprep.subr.bf16.mxu0 %v5949_v6 }
 0xa72   :  { %v3349_v50 = vpop.f32.mrb[116].mxu1 }
 0xa73   :  { %v3350_v40 = vadd.f32 %v6620_v35, %v3349_v50  ;;  %v5482_v13 = vpop.f32.mrb[117].mxu1 }
 0xa74   :  { %v3352_v53 = vpop.f32.mrb[118].mxu1 }
 0xa75   :  { %v5483_v59 = vpop.f32.mrb[119].mxu1  ;;  %v3658_v22 = vsel %vm294_vm2, %v3350_v40, -inf }
 0xa76   :  { %3659 = vmax.xlane.f32.xlu1 %v3658_v22 }
 0xa77   :  { %5499 = vmatmul.mubr.msk.bf16.vlgmr.msra.gmra.mrb[100].mxu0 %vm294_vm2, %v3456_v28 }
 0xa78   :  { %5509 = vmatpush3.bf16.xpose.msra.mxu0 %v3563_v51  ;;  %5510 = vmatprep.mubr.msk.bf16.mxu0 %vm5950_vm1, %v5949_v6 }
 0xa79   :  { %5520 = vmatprep.subr.bf16.mxu0 %v5949_v6 }
 0xa7a   :  { %v3449_v1 = vpop.f32.mrb[120].mxu1 }
 0xa7b   :  { %v5494_v45 = vpop.f32.mrb[121].mxu1  ;;  %v3450_v51 = vadd.f32 %v6642_v42, %v3449_v1 }
 0xa7c   :  { %v3452_v35 = vpop.f32.mrb[122].mxu1 }
 0xa7d   :  { %v5495_v0 = vpop.f32.mrb[123].mxu1 }
 0xa7f   :  { %5511 = vmatmul.mubr.msk.bf16.vlgmr.msra.gmra.mrb[104].mxu0 %vm294_vm2, %v3556_v7 }
 0xa80   :  { %5522 = vmatprep.mubr.msk.bf16.mxu0 %vm5950_vm1, %v5949_v6 }
 0xa82   :  { %v3549_v3 = vpop.f32.mrb[124].mxu1 }
 0xa83   :  { %v5506_v2 = vpop.f32.mrb[125].mxu1  ;;  %v3550_v7 = vadd.f32 %v6649_v26, %v3549_v3 }
 0xa84   :  { %v3552_v19 = vpop.f32.mrb[126].mxu1 }
 0xa85   :  { %v5507_v58 = vpop.f32.mrb[127].mxu1  ;;  %v3670_v1 = vsel %vm294_vm2, %v3550_v7, -inf }
 0xa8a   :  { %v3649_v17 = vpop.f32.mrb[128].mxu1 }
 0xa8b   :  { %v5518_v10 = vpop.f32.mrb[129].mxu1  ;;  %v3650_v58 = vadd.f32 %v6653_v63, %v3649_v17 }
 0xa8c   :  { %v3652_v34 = vpop.f32.mrb[130].mxu1 }
 0xa8d   :  { %v5519_v21 = vpop.f32.mrb[131].mxu1  ;;  %v3676_v26 = vsel %vm294_vm2, %v3650_v58, -inf }
 0xafb   :  { %v3657_v8 = vpop.xlane.xlu0 %3656 }
 0xafc   :  { %v3679_v53 = vsub.f32 %v3300_v9, %v3657_v8 }
 0xafe   :  { %v3687_v0 = vmul.f32 1.442695, %v3679_v53 }
 0xb03   :  { %v3660_v43 = vpop.xlane.xlu1 %3659 }
 0xb04   :  { %v3680_v28 = vsub.f32 %v3350_v40, %v3660_v43  ;;  %v3664_v40 = vsel %vm294_vm2, %v3450_v51, -inf }
 0xb06   :  { %v3689_v59 = vmul.f32 1.442695, %v3680_v28 }
 0xb08   :  { %5735 = vpow2.f32 %v3689_v59 }
 0xb09   :  { %5737 = vpow2.f32 %v3687_v0 }
 0xb12   :  { %v6878_v3 = vpop.eup %5735 }
 0xb13   :  { %v3706_v63 = vsel %vm294_vm2, %v6878_v3, 0.0  ;;  %v5738_v8 = vpop.eup %5737 }
 0xb42   :  { %v3399_v50 = vpop.f32.mrb[96].mxu0 }
 0xb43   :  { %v3400_v13 = vadd.f32 %v6630_v62, %v3399_v50  ;;  %v5488_v56 = vpop.f32.mrb[97].mxu0  ;;  %v3703_v50 = vsel %vm294_vm2, %v5738_v8, 0.0 }
 0xb44   :  { %v3402_v22 = vpop.f32.mrb[98].mxu0 }
 0xb45   :  { %v5489_v45 = vpop.f32.mrb[99].mxu0  ;;  %v3661_v35 = vsel %vm294_vm2, %v3400_v13, -inf }
 0xb46   :  { %3662 = vmax.xlane.f32.xlu0 %v3661_v35 }
 0xb4a   :  { %3665 = vmax.xlane.f32.xlu0 %v3664_v40  ;;  %v3499_v2 = vpop.f32.mrb[100].mxu0 }
 0xb4b   :  { %v3500_v62 = vadd.f32 %v6679_v47, %v3499_v2  ;;  %v5500_v19 = vpop.f32.mrb[101].mxu0 }
 0xb4c   :  { %v3502_v9 = vpop.f32.mrb[102].mxu0 }
 0xb4d   :  { %v5501_v42 = vpop.f32.mrb[103].mxu0  ;;  %v3667_v10 = vsel %vm294_vm2, %v3500_v62, -inf }
 0xb4e   :  { %3671 = vmax.xlane.f32.xlu0 %v3670_v1  ;;  %3668 = vmax.xlane.f32.xlu1 %v3667_v10 }
 0xb52   :  { %3677 = vmax.xlane.f32.xlu0 %v3676_v26  ;;  %v3599_v34 = vpop.f32.mrb[104].mxu0 }
 0xb53   :  { %v3600_v47 = vadd.f32 %v6687_v60, %v3599_v34  ;;  %v5512_v21 = vpop.f32.mrb[105].mxu0 }
 0xb54   :  { %v3602_v43 = vpop.f32.mrb[106].mxu0 }
 0xb55   :  { %v5513_v28 = vpop.f32.mrb[107].mxu0  ;;  %v3673_v17 = vsel %vm294_vm2, %v3600_v47, -inf }
 0xb56   :  { %3707 = vadd.xlane.f32.xlu0 %v3706_v63  ;;  %3674 = vmax.xlane.f32.xlu1 %v3673_v17 }
 0xb5a   :  { %3704 = vadd.xlane.f32.xlu1 %v3703_v50 }
 0xb6b   :  { %3751 = vrot.lane.b32.xlu1 %v6085_v20, %s5960_s14 }
 0xb6f   :  { %3847 = vrot.lane.b32.xlu1 %v6083_v16, %s5960_s14 }
 0xb73   :  { %3895 = vrot.lane.b32.xlu1 %v6089_v24, %s5960_s14 }
 0xb77   :  { %3991 = vrot.lane.b32.xlu1 %v6094_v27, %s5960_s14 }
 0xbd3   :  { %v3663_v60 = vpop.xlane.xlu0 %3662 }
 0xbd4   :  { %v3681_v56 = vsub.f32 %v3400_v13, %v3663_v60 }
 0xbd6   :  { %v3691_v53 = vmul.f32 1.442695, %v3681_v56 }
 0xbd7   :  { %v3666_v59 = vpop.xlane.xlu0 %3665 }
 0xbd8   :  { %5739 = vpow2.f32 %v3691_v53  ;;  %v3682_v22 = vsub.f32 %v3450_v51, %v3666_v59 }
 0xbda   :  { %v3693_v45 = vmul.f32 1.442695, %v3682_v22 }
 0xbdb   :  { %v3669_v35 = vpop.xlane.xlu1 %3668  ;;  %v3672_v0 = vpop.xlane.xlu0 %3671 }
 0xbdc   :  { %5741 = vpow2.f32 %v3693_v45  ;;  %v3683_v20 = vsub.f32 %v3500_v62, %v3669_v35  ;;  %v3684_v40 = vsub.f32 %v3550_v7, %v3672_v0 }
 0xbde   :  { %v3695_v2 = vmul.f32 1.442695, %v3683_v20  ;;  %v3697_v16 = vmul.f32 1.442695, %v3684_v40 }
 0xbdf   :  { %v3678_v19 = vpop.xlane.xlu0 %3677 }
 0xbe0   :  { %5743 = vpow2.f32 %v3695_v2  ;;  %v3686_v24 = vsub.f32 %v3650_v58, %v3678_v19 }
 0xbe1   :  { %5745 = vpow2.f32 %v3697_v16 }
 0xbe2   :  { %v5740_v9 = vpop.eup %5739  ;;  %v3701_v27 = vmul.f32 1.442695, %v3686_v24 }
 0xbe3   :  { %v3675_v42 = vpop.xlane.xlu1 %3674  ;;  %v3709_v13 = vsel %vm294_vm2, %v5740_v9, 0.0  ;;  %v3708_v35 = vpop.xlane.xlu0 %3707 }
 0xbe4   :  { %5747 = vpow2.f32 %v3701_v27  ;;  %v3685_v1 = vsub.f32 %v3600_v47, %v3675_v42  ;;  %3710 = vadd.xlane.f32.xlu1 %v3709_v13 }
 0xbe6   :  { %v6894_v51 = vpop.eup %5741  ;;  %v3699_v10 = vmul.f32 1.442695, %v3685_v1 }
 0xbe7   :  { %v3705_v26 = vpop.xlane.xlu1 %3704  ;;  %v3712_v7 = vsel %vm294_vm2, %v6894_v51, 0.0 }
 0xbe8   :  { %5749 = vpow2.f32 %v3699_v10  ;;  %3713 = vadd.xlane.f32.xlu0 %v3712_v7 }
 0xbe9   :  { %5751 = vrcp.f32 %v3705_v26 }
 0xbea   :  { %v5744_v62 = vpop.eup %5743 }
 0xbeb   :  { %v6898_v58 = vpop.eup %5745  ;;  %v3752_v34 = vpop.permute.xlu1 %3751  ;;  %v3715_v21 = vsel %vm294_vm2, %v5744_v62, 0.0 }
 0xbec   :  { %v3757_v43 = vsel %vm778_vm3, %v3752_v34, 0  ;;  %3716 = vadd.xlane.f32.xlu1 %v3715_v21  ;;  %v3718_v47 = vsel %vm294_vm2, %v6898_v58, 0.0 }
 0xbed   :  { %3719 = vadd.xlane.f32.xlu0 %v3718_v47  ;;  %5521 = vmatpush3.bf16.msra.mxu0 %v3757_v43 }
 0xbee   :  { %v6904_v28 = vpop.eup %5747  ;;  %5532 = vmatprep.subr.bf16.mxu0 %v5949_v6 }
 0xbef   :  { %v3724_v63 = vsel %vm294_vm2, %v6904_v28, 0.0  ;;  %v3848_v53 = vpop.permute.xlu1 %3847 }
 0xbf0   :  { %v3853_v22 = vsel %vm778_vm3, %v3848_v53, 0 }
 0xbf1   :  { %3725 = vadd.xlane.f32.xlu0 %v3724_v63 }
 0xbf2   :  { %v6909_v17 = vpop.eup %5749 }
 0xbf3   :  { %v5752_v50 = vpop.eup %5751  ;;  %v3721_v60 = vsel %vm294_vm2, %v6909_v17, 0.0 }
 0xbf4   :  { %v3735_v56 = vmul.f32 %v5752_v50, %v5738_v8  ;;  %3722 = vadd.xlane.f32.xlu1 %v3721_v60  ;;  %v3896_v8 = vpop.permute.xlu1 %3895 }
 0xbf6   :  { %v3743_v59 = vpack.c.bf16 %v3735_v56, %v3735_v56 }
 0xbf8   :  { %5523 = vmatmul.mubr.msk.bf16.vlgmr.msra.gmra.mrb[108].mxu0 %vm294_vm2, %v3743_v59  ;;  %v3992_v45 = vpop.permute.xlu1 %3991 }
 0xbf9   :  { %5533 = vmatpush3.bf16.msra.mxu0 %v3853_v22  ;;  %5534 = vmatprep.mubr.msk.bf16.mxu0 %vm5950_vm1, %v5949_v6  ;;  %v3997_v60 = vsel %vm778_vm3, %v3992_v45, 0 }
 0xbfa   :  { %5544 = vmatprep.subr.bf16.mxu0 %v5949_v6 }
 0xc05   :  { %4087 = vrot.lane.b32.xlu1 %v6099_v30, %s5960_s14 }
 0xc07   :  { %3799 = vrot.lane.b32.xlu0 %v6091_v25, %s5960_s14 }
 0xc0b   :  { %3943 = vrot.lane.b32.xlu0 %v6096_v29, %s5960_s14 }
 0xc0f   :  { %4039 = vrot.lane.b32.xlu0 %v6102_v31, %s5960_s14 }
 0xc71   :  { %v3711_v0 = vpop.xlane.xlu1 %3710 }
 0xc72   :  { %5753 = vrcp.f32 %v3711_v0 }
 0xc73   :  { %5755 = vrcp.f32 %v3708_v35 }
 0xc75   :  { %v3714_v20 = vpop.xlane.xlu0 %3713 }
 0xc79   :  { %v3717_v40 = vpop.xlane.xlu1 %3716 }
 0xc7a   :  { %5757 = vrcp.f32 %v3717_v40  ;;  %v3720_v2 = vpop.xlane.xlu0 %3719 }
 0xc7b   :  { %5759 = vrcp.f32 %v3714_v20 }
 0xc7c   :  { %v5754_v30 = vpop.eup %5753 }
 0xc7d   :  { %v3737_v16 = vmul.f32 %v5754_v30, %v5740_v9  ;;  %v5756_v25 = vpop.eup %5755 }
 0xc7e   :  { %v3726_v19 = vpop.xlane.xlu0 %3725  ;;  %v3736_v29 = vmul.f32 %v5756_v25, %v6878_v3  ;;  %v3901_v3 = vsel %vm778_vm3, %v3896_v8, 0 }
 0xc7f   :  { %v3745_v24 = vpack.c.bf16 %v3737_v16, %v3737_v16 }
 0xc80   :  { %v3744_v9 = vpack.c.bf16 %v3736_v29, %v3736_v29 }
 0xc81   :  { %5535 = vmatmul.mubr.msk.bf16.vlgmr.msra.gmra.mrb[112].mxu0 %vm294_vm2, %v3745_v24  ;;  %v3723_v31 = vpop.xlane.xlu1 %3722 }
 0xc82   :  { %5761 = vrcp.f32 %v3723_v31  ;;  %v3800_v27 = vpop.permute.xlu0 %3799  ;;  %5546 = vmatprep.mubr.msk.bf16.mxu0 %vm5950_vm1, %v5949_v6 }
 0xc83   :  { %v3805_v42 = vsel %vm778_vm3, %v3800_v27, 0  ;;  %5763 = vrcp.f32 %v3720_v2  ;;  %v4144_v2 = vld [vmem:[#allocation8 + $0xc] sm:$0xf] }
 0xc84   :  { %v5758_v13 = vpop.eup %5757  ;;  %5527 = vmatpush3.bf16.msra.mxu1 %v3805_v42  ;;  %5765 = vrcp.f32 %v3726_v19  ;;  %v4178_v30 = vsel %vm778_vm3, %v4144_v2, 0 }
 0xc85   :  { %v3739_v1 = vmul.f32 %v5758_v13, %v5744_v62  ;;  %5538 = vmatprep.subr.bf16.mxu1 %v5949_v6  ;;  %v5760_v10 = vpop.eup %5759  ;;  %v4088_v59 = vpop.permute.xlu1 %4087 }
 0xc86   :  { %v3944_v26 = vpop.permute.xlu0 %3943  ;;  %v3738_v21 = vmul.f32 %v5760_v10, %v6894_v51  ;;  %v4093_v8 = vsel %vm778_vm3, %v4088_v59, 0 }
 0xc87   :  { %v3949_v7 = vsel %vm778_vm3, %v3944_v26, 0  ;;  %5529 = vmatmul.mubr.msk.bf16.vlgmr.msra.gmra.mrb[132].mxu1 %vm294_vm2, %v3744_v9  ;;  %v3747_v34 = vpack.c.bf16 %v3739_v1, %v3739_v1 }
 0xc88   :  { %5539 = vmatpush3.bf16.msra.mxu1 %v3901_v3  ;;  %5545 = vmatpush3.bf16.msra.mxu0 %v3949_v7  ;;  %v3746_v63 = vpack.c.bf16 %v3738_v21, %v3738_v21 }
 0xc89   :  { %5556 = vmatprep.subr.bf16.mxu0 %v5949_v6  ;;  %5540 = vmatprep.mubr.msk.bf16.mxu1 %vm5950_vm1, %v5949_v6 }
 0xc8a   :  { %v4040_v62 = vpop.permute.xlu0 %4039  ;;  %5550 = vmatprep.subr.bf16.mxu1 %v5949_v6 }
 0xc8b   :  { %v4045_v43 = vsel %vm778_vm3, %v4040_v62, 0  ;;  %5547 = vmatmul.mubr.msk.bf16.vlgmr.msra.gmra.mrb[116].mxu0 %vm294_vm2, %v3747_v34 }
 0xc8c   :  { %v5762_v47 = vpop.eup %5761  ;;  %5557 = vmatpush3.bf16.msra.mxu0 %v4045_v43  ;;  %5558 = vmatprep.mubr.msk.bf16.mxu0 %vm5950_vm1, %v5949_v6 }
 0xc8d   :  { %v3741_v51 = vmul.f32 %v5762_v47, %v6909_v17  ;;  %v5764_v50 = vpop.eup %5763  ;;  %5609 = vmatprep.subr.msk.bf16.mxu0 %vm778_vm3, %v4144_v2 }
 0xc8e   :  { %v3740_v53 = vmul.f32 %v5764_v50, %v6898_v58  ;;  %v5766_v17 = vpop.eup %5765 }
 0xc8f   :  { %5541 = vmatmul.mubr.msk.bf16.vlgmr.msra.gmra.mrb[136].mxu1 %vm294_vm2, %v3746_v63  ;;  %v3749_v56 = vpack.c.bf16 %v3741_v51, %v3741_v51  ;;  %v3742_v45 = vmul.f32 %v5766_v17, %v6904_v28 }
 0xc90   :  { %5551 = vmatpush3.bf16.msra.mxu1 %v3997_v60  ;;  %5552 = vmatprep.mubr.msk.bf16.mxu1 %vm5950_vm1, %v5949_v6  ;;  %v3748_v22 = vpack.c.bf16 %v3740_v53, %v3740_v53 }
 0xc91   :  { %5562 = vmatprep.subr.bf16.mxu1 %v5949_v6  ;;  %v3750_v35 = vpack.c.bf16 %v3742_v45, %v3742_v45  ;;  %v4962_v45 = vld [vmem:[%s7347_s5] ss:$0 sm:$0xff]  ;;  %s5961_s5 = smov 8  }
 0xc93   :  { %5559 = vmatmul.mubr.msk.bf16.vlgmr.msra.gmra.mrb[120].mxu0 %vm294_vm2, %v3749_v56 }
 0xc94   :  { %5569 = vmatpush3.bf16.msra.mxu0 %v4178_v30 }
 0xc97   :  { %5553 = vmatmul.mubr.msk.bf16.vlgmr.msra.gmra.mrb[140].mxu1 %vm294_vm2, %v3748_v22 }
 0xc98   :  { %5563 = vmatpush3.bf16.msra.mxu1 %v4093_v8  ;;  %5564 = vmatprep.mubr.msk.bf16.mxu1 %vm5950_vm1, %v5949_v6 }
 0xc9f   :  { %5565 = vmatmul.mubr.msk.bf16.vlgmr.msra.gmra.mrb[144].mxu1 %vm294_vm2, %v3750_v35 }
 0xccb   :  { %v6958_v58 = vpop.f32.mrb[108].mxu0 }
 0xccc   :  { %v5524_v0 = vpop.f32.mrb[109].mxu0 }
 0xccd   :  { %v3796_v20 = vpop.f32.mrb[110].mxu0 }
 0xcce   :  { %v5525_v40 = vpop.f32.mrb[111].mxu0 }
 0xd54   :  { %v6962_v16 = vpop.f32.mrb[112].mxu0 }
 0xd55   :  { %v5536_v25 = vpop.f32.mrb[113].mxu0 }
 0xd56   :  { %v3892_v6 = vpop.f32.mrb[114].mxu0 }
 0xd57   :  { %v5537_v19 = vpop.f32.mrb[115].mxu0 }
 0xd58   :  { %v4963_v19 = vld [vmem:[%s7348_s6] ss:$0 sm:$0xff]  ;;  %s5962_s6 = smov 24  }
 0xd5a   :  { %v6964_v28 = vpop.f32.mrb[132].mxu1 }
 0xd5b   :  { %v4984_v24 = vpack.c.bf16 %v6964_v28, %v6958_v58  ;;  %v5530_v29 = vpop.f32.mrb[133].mxu1 }
 0xd5c   :  { %v3844_v31 = vpop.f32.mrb[134].mxu1 }
 0xd5d   :  { %v5531_v27 = vpop.f32.mrb[135].mxu1  ;;  %5570 = vmatprep.mubr.msk.bf16.mxu0 %vm294_vm2, %v4984_v24 }
 0xd5e   :  { %v6969_v42 = vpop.f32.mrb[116].mxu0 }
 0xd5f   :  { %v5548_v13 = vpop.f32.mrb[117].mxu0 }
 0xd60   :  { %v3988_v1 = vpop.f32.mrb[118].mxu0 }
 0xd61   :  { %v5549_v9 = vpop.f32.mrb[119].mxu0 }
 0xd62   :  { %v6971_v10 = vpop.f32.mrb[136].mxu1 }
 0xd63   :  { %v4985_v26 = vpack.c.bf16 %v6971_v10, %v6962_v16  ;;  %v5542_v3 = vpop.f32.mrb[137].mxu1 }
 0xd64   :  { %v3940_v7 = vpop.f32.mrb[138].mxu1 }
 0xd65   :  { %v5543_v34 = vpop.f32.mrb[139].mxu1  ;;  %5571 = vmatmul.mubr.msk.bf16.vlgmr.msra.gmra.mrb[64].mxu0 %vm294_vm2, %v4985_v26 }
 0xd66   :  { %v6976_v21 = vpop.f32.mrb[120].mxu0 }
 0xd67   :  { %v5560_v62 = vpop.f32.mrb[121].mxu0 }
 0xd68   :  { %v4084_v43 = vpop.f32.mrb[122].mxu0 }
 0xd69   :  { %v5561_v47 = vpop.f32.mrb[123].mxu0 }
 0xd6a   :  { %v6978_v51 = vpop.f32.mrb[140].mxu1 }
 0xd6b   :  { %v4986_v63 = vpack.c.bf16 %v6978_v51, %v6969_v42  ;;  %v5554_v50 = vpop.f32.mrb[141].mxu1 }
 0xd6c   :  { %v4036_v60 = vpop.f32.mrb[142].mxu1 }
 0xd6d   :  { %v5555_v56 = vpop.f32.mrb[143].mxu1  ;;  %5574 = vmatprep.mubr.msk.bf16.mxu0 %vm294_vm2, %v4986_v63 }
 0xd72   :  { %v6983_v53 = vpop.f32.mrb[144].mxu1 }
 0xd73   :  { %v4987_v59 = vpack.c.bf16 %v6983_v53, %v6976_v21  ;;  %v5566_v22 = vpop.f32.mrb[145].mxu1 }
 0xd74   :  { %v4132_v17 = vpop.f32.mrb[146].mxu1 }
 0xd75   :  { %v5567_v8 = vpop.f32.mrb[147].mxu1  ;;  %5575 = vmatmul.mubr.msk.bf16.gmra.mrb[68].mxu0 %vm294_vm2, %v4987_v59 }
 0xe38   :  { %v5572_v35 = vpop.f32.mrb[64].mxu0 }
 0xe39   :  { %v4262_v0 = vadd.f32 %v5572_v35, %v4962_v45  ;;  %v4214_v20 = vpop.f32.mrb[65].mxu0 }
 0xe3a   :  { %v4260_v40 = vadd.f32 %v4962_v45, %v4214_v20  ;;  %v5573_v2 = vpop.f32.mrb[66].mxu0 }
 0xe3b   :  { %5767 = vtanh.f32 %v4262_v0  ;;  %v4263_v30 = vadd.f32 %v5573_v2, %v4962_v45  ;;  %v4217_v25 = vpop.f32.mrb[67].mxu0 }
 0xe3c   :  { %5769 = vtanh.f32 %v4260_v40  ;;  %v4261_v6 = vadd.f32 %v4962_v45, %v4217_v25 }
 0xe3e   :  { %5771 = vtanh.f32 %v4261_v6 }
 0xe3f   :  { %5773 = vtanh.f32 %v4263_v30 }
 0xe45   :  { %v5768_v24 = vpop.eup %5767 }
 0xe46   :  { %v5770_v29 = vpop.eup %5769  ;;  %v4285_v31 = vmul.f32 %v5768_v24, %v4963_v19 }
 0xe47   :  { %v4283_v9 = vmul.f32 %v5770_v29, %v4963_v19 }
 0xe48   :  { %v5772_v27 = vpop.eup %5771  ;;  %v5576_v13 = vpop.f32.mrb[68].mxu0  ;;  %v4297_v1 = vsel %vm294_vm2, %v4285_v31, 0.0 }
 0xe49   :  { %v5774_v26 = vpop.eup %5773  ;;  %v4266_v3 = vadd.f32 %v5576_v13, %v4962_v45  ;;  %4298 = vadd.xlane.f32.xlu0 %v4297_v1  ;;  %v4230_v7 = vpop.f32.mrb[69].mxu0  ;;  %v4284_v34 = vmul.f32 %v5772_v27, %v4963_v19  ;;  %v4291_v56 = vsel %vm294_vm2, %v4283_v9, 0.0 }
 0xe4a   :  { %v4264_v62 = vadd.f32 %v4962_v45, %v4230_v7  ;;  %v5577_v43 = vpop.f32.mrb[70].mxu0  ;;  %v4286_v59 = vmul.f32 %v5774_v26, %v4963_v19 }
 0xe4b   :  { %5775 = vtanh.f32 %v4266_v3  ;;  %v4267_v47 = vadd.f32 %v5577_v43, %v4962_v45  ;;  %v4233_v63 = vpop.f32.mrb[71].mxu0  ;;  %v4294_v50 = vsel %vm294_vm2, %v4284_v34, 0.0 }
 0xe4c   :  { %5777 = vtanh.f32 %v4264_v62  ;;  %v4265_v60 = vadd.f32 %v4962_v45, %v4233_v63  ;;  %4295 = vadd.xlane.f32.xlu1 %v4294_v50  ;;  %v4300_v22 = vsel %vm294_vm2, %v4286_v59, 0.0 }
 0xe4d   :  { %5779 = vtanh.f32 %v4267_v47  ;;  %4292 = vadd.xlane.f32.xlu0 %v4291_v56 }
 0xe4e   :  { %5781 = vtanh.f32 %v4265_v60 }
 0xe51   :  { %4301 = vadd.xlane.f32.xlu0 %v4300_v22 }
 0xe55   :  { %v5776_v17 = vpop.eup %5775 }
 0xe56   :  { %v5778_v8 = vpop.eup %5777  ;;  %v4289_v30 = vmul.f32 %v5776_v17, %v4963_v19  ;;  %v1158_v17 = vpack.c.bf16 %v6379_v11, %v6379_v11  ;;  %v1161_v11 = vpack.c.bf16 %v6389_v33, %v6389_v33  ;;  %v1165_v33 = vpack.c.bf16 %v6402_v61, %v6402_v61 }
 0xe57   :  { %v5780_v35 = vpop.eup %5779  ;;  %v4287_v0 = vmul.f32 %v5778_v8, %v4963_v19 }
 0xe58   :  { %v5782_v20 = vpop.eup %5781  ;;  %v4290_v25 = vmul.f32 %v5780_v35, %v4963_v19  ;;  %v4309_v6 = vsel %vm294_vm2, %v4289_v30, 0.0  ;;  %v1159_v30 = vpack.c.bf16 %v6383_v15, %v6383_v15 }
 0xe59   :  { %v4303_v40 = vsel %vm294_vm2, %v4287_v0, 0.0  ;;  %v4288_v2 = vmul.f32 %v5782_v20, %v4963_v19 }
 0xe5a   :  { %4304 = vadd.xlane.f32.xlu1 %v4303_v40  ;;  %v4312_v24 = vsel %vm294_vm2, %v4290_v25, 0.0  ;;  %v1160_v40 = vpack.c.bf16 %v6381_v14, %v6381_v14 }
 0xe5b   :  { %v4306_v45 = vsel %vm294_vm2, %v4288_v2, 0.0 }
 0xe5c   :  { %4307 = vadd.xlane.f32.xlu0 %v4306_v45  ;;  %v7018_v15 = vunpack.c.l.bf16 %v1160_v40 }
 0xe5e   :  { %4310 = vadd.xlane.f32.xlu1 %v4309_v6 }
 0xe60   :  { %4313 = vadd.xlane.f32.xlu0 %v4312_v24  ;;  %v7008_v24 = vunpack.c.l.bf16 %v1158_v17  ;;  %v7043_v17 = vunpack.c.l.bf16 %v1165_v33 }
 0xed6   :  { %v4299_v29 = vpop.xlane.xlu0 %4298 }
 0xed7   :  { %v4327_v31 = vrot.slane %v4299_v29, 4 }
 0xed9   :  { %v4328_v27 = vmax.f32 %v4299_v29, %v4327_v31  ;;  %v4296_v13 = vpop.xlane.xlu1 %4295  ;;  %v1162_v31 = vpack.c.bf16 %v6387_v32, %v6387_v32 }
 0xeda   :  { %v4321_v1 = vrot.slane %v4296_v13, 4  ;;  %v4293_v9 = vpop.xlane.xlu0 %4292 }
 0xedb   :  { %v4329_v26 = vrot.slane %v4328_v27, 2  ;;  %v4315_v3 = vrot.slane %v4293_v9, 4 }
 0xedc   :  { %v4322_v7 = vmax.f32 %v4296_v13, %v4321_v1 }
 0xedd   :  { %v4330_v34 = vmax.f32 %v4328_v27, %v4329_v26  ;;  %v4316_v62 = vmax.f32 %v4293_v9, %v4315_v3  ;;  %v1163_v27 = vpack.c.bf16 %v6393_v44, %v6393_v44  ;;  %v1164_v3 = vpack.c.bf16 %v6397_v49, %v6397_v49 }
 0xede   :  { %v4323_v43 = vrot.slane %v4322_v7, 2  ;;  %v4302_v19 = vpop.xlane.xlu0 %4301  ;;  %v7033_v49 = vunpack.c.l.bf16 %v1161_v11 }
 0xedf   :  { %v4331_v47 = vrot.slane %v4330_v34, 1  ;;  %v4317_v63 = vrot.slane %v4316_v62, 2  ;;  %v4333_v50 = vrot.slane %v4302_v19, 4  ;;  %v7039_v61 = vunpack.c.l.bf16 %v1164_v3 }
 0xee0   :  { %v4324_v60 = vmax.f32 %v4322_v7, %v4323_v43 }
 0xee1   :  { %v4332_v56 = vmax.f32 %v4330_v34, %v4331_v47  ;;  %v4318_v59 = vmax.f32 %v4316_v62, %v4317_v63  ;;  %v4334_v22 = vmax.f32 %v4302_v19, %v4333_v50  ;;  %v7023_v34 = vunpack.c.l.bf16 %v1159_v30 }
 0xee2   :  { %v4325_v8 = vrot.slane %v4324_v60, 1  ;;  %v7035_v63 = vunpack.c.l.bf16 %v1163_v27 }
 0xee3   :  { %v4365_v35 = vsub.f32 %v4299_v29, %v4332_v56  ;;  %v4319_v0 = vrot.slane %v4318_v59, 1  ;;  %v4335_v20 = vrot.slane %v4334_v22, 2 }
 0xee4   :  { %v4326_v2 = vmax.f32 %v4324_v60, %v4325_v8  ;;  %v2047_v8 = vpack.c.bf16 %v6569_v41, %v6569_v41  ;;  %v2051_v41 = vpack.c.bf16 %v6585_v39, %v6585_v39 }
 0xee5   :  { %v4375_v45 = vmul.f32 1.442695, %v4365_v35  ;;  %v4320_v25 = vmax.f32 %v4318_v59, %v4319_v0  ;;  %v4336_v6 = vmax.f32 %v4334_v22, %v4335_v20  ;;  %v2049_v35 = vpack.c.bf16 %v6571_v54, %v6571_v54 }
 0xee6   :  { %v4364_v29 = vsub.f32 %v4296_v13, %v4326_v2  ;;  %v7062_v27 = vunpack.c.l.bf16 %v2047_v8 }
 0xee7   :  { %5783 = vpow2.f32 %v4375_v45  ;;  %v4363_v14 = vsub.f32 %v4293_v9, %v4320_v25  ;;  %v4337_v1 = vrot.slane %v4336_v6, 1  ;;  %v7016_v26 = vpop.xlane.xlu1 %4304  ;;  %v7029_v9 = vunpack.c.l.bf16 %v1162_v31 }
 0xee8   :  { %v4373_v7 = vmul.f32 1.442695, %v4364_v29  ;;  %v4339_v32 = vrot.slane %v7016_v26, 4  ;;  %v2048_v45 = vpack.c.bf16 %v6573_v57, %v6573_v57  ;;  %v2050_v25 = vpack.c.bf16 %v6578_v23, %v6578_v23 }
 0xee9   :  { %v4371_v13 = vmul.f32 1.442695, %v4363_v14  ;;  %v4338_v44 = vmax.f32 %v4336_v6, %v4337_v1  ;;  %v7027_v62 = vpop.xlane.xlu0 %4307  ;;  %v7064_v14 = vunpack.c.l.bf16 %v2049_v35  ;;  %v2053_v57 = vpack.c.bf16 %v6587_v5, %v6587_v5 }
 0xeea   :  { %5785 = vpow2.f32 %v4373_v7  ;;  %v4340_v43 = vmax.f32 %v7016_v26, %v4339_v32  ;;  %v4345_v47 = vrot.slane %v7027_v62, 4  ;;  %v2052_v23 = vpack.c.bf16 %v6589_v12, %v6589_v12 }
 0xeeb   :  { %5787 = vpow2.f32 %v4371_v13  ;;  %v4366_v50 = vsub.f32 %v4302_v19, %v4338_v44  ;;  %v7037_v60 = vpop.xlane.xlu1 %4310  ;;  %v7071_v32 = vunpack.c.l.bf16 %v2048_v45  ;;  %v7073_v33 = vunpack.c.l.bf16 %v2050_v25 }
 0xeec   :  { %v4341_v56 = vrot.slane %v4340_v43, 2  ;;  %v4346_v59 = vmax.f32 %v7027_v62, %v4345_v47  ;;  %v4351_v22 = vrot.slane %v7037_v60, 4  ;;  %v7075_v13 = vunpack.c.l.bf16 %v2051_v41 }
 0xeed   :  { %v4377_v0 = vmul.f32 1.442695, %v4366_v50  ;;  %v7049_v20 = vpop.xlane.xlu0 %4313 }
 0xeee   :  { %v4342_v19 = vmax.f32 %v4340_v43, %v4341_v56  ;;  %v4347_v40 = vrot.slane %v4346_v59, 2  ;;  %v4352_v2 = vmax.f32 %v7037_v60, %v4351_v22  ;;  %v4357_v30 = vrot.slane %v7049_v20, 4 }
 0xeef   :  { %5789 = vpow2.f32 %v4377_v0  ;;  %v7085_v22 = vunpack.c.l.bf16 %v2052_v23 }
 0xef0   :  { %v4343_v54 = vrot.slane %v4342_v19, 1  ;;  %v4348_v6 = vmax.f32 %v4346_v59, %v4347_v40  ;;  %v4353_v31 = vrot.slane %v4352_v2, 2  ;;  %v4358_v11 = vmax.f32 %v7049_v20, %v4357_v30 }
 0xef1   :  { %v7060_v29 = vpop.eup %5783  ;;  %v7083_v59 = vunpack.c.l.bf16 %v2053_v57 }
 0xef2   :  { %v4399_v39 = vrot.slane %v7060_v29, 4  ;;  %v4344_v1 = vmax.f32 %v4342_v19, %v4343_v54  ;;  %v4349_v3 = vrot.slane %v4348_v6, 1  ;;  %v4354_v7 = vmax.f32 %v4352_v2, %v4353_v31 }
 0xef3   :  { %v4359_v44 = vrot.slane %v4358_v11, 2 }
 0xef4   :  { %v7077_v43 = vpop.eup %5785  ;;  %v4400_v47 = vadd.f32 %v7060_v29, %v4399_v39  ;;  %v4367_v5 = vsub.f32 %v7016_v26, %v4344_v1  ;;  %v4350_v50 = vmax.f32 %v4348_v6, %v4349_v3  ;;  %v4355_v12 = vrot.slane %v4354_v7, 1 }
 0xef5   :  { %v7081_v56 = vpop.eup %5787  ;;  %v4393_v8 = vrot.slane %v7077_v43, 4  ;;  %v4360_v35 = vmax.f32 %v4358_v11, %v4359_v44  ;;  %v2054_v26 = vpack.c.bf16 %v6594_v48, %v6594_v48  ;;  %v3138_v11 = vpack.c.bf16 %v6798_v46, %v6798_v46 }
 0xef6   :  { %v4401_v0 = vrot.slane %v4400_v47, 2  ;;  %v4387_v19 = vrot.slane %v7081_v56, 4  ;;  %v4379_v40 = vmul.f32 1.442695, %v4367_v5  ;;  %v4368_v2 = vsub.f32 %v7027_v62, %v4350_v50 }
 0xef7   :  { %v4394_v30 = vadd.f32 %v7077_v43, %v4393_v8  ;;  %v4356_v45 = vmax.f32 %v4354_v7, %v4355_v12  ;;  %v4361_v25 = vrot.slane %v4360_v35, 1  ;;  %v3137_v3 = vpack.c.bf16 %v6821_v52, %v6821_v52 }
 0xef8   :  { %v4402_v41 = vadd.f32 %v4401_v0, %v4400_v47  ;;  %v4388_v54 = vadd.f32 %v7081_v56, %v4387_v19  ;;  %5791 = vpow2.f32 %v4379_v40  ;;  %v4381_v6 = vmul.f32 1.442695, %v4368_v2 }
 0xef9   :  { %v7094_v31 = vpop.eup %5789  ;;  %v4395_v57 = vrot.slane %v4394_v30, 2  ;;  %v4369_v62 = vsub.f32 %v7037_v60, %v4356_v45  ;;  %v4362_v23 = vmax.f32 %v4360_v35, %v4361_v25  ;;  %v3140_v5 = vpack.c.bf16 %v6826_v4, %v6826_v4 }
 0xefa   :  { %v4403_v39 = vrot.slane %v4402_v41, 1  ;;  %v4389_v48 = vrot.slane %v4388_v54, 2  ;;  %v4405_v1 = vrot.slane %v7094_v31, 4  ;;  %5793 = vpow2.f32 %v4381_v6 }
 0xefb   :  { %v4396_v7 = vadd.f32 %v4395_v57, %v4394_v30  ;;  %v4383_v44 = vmul.f32 1.442695, %v4369_v62  ;;  %v4370_v47 = vsub.f32 %v7049_v20, %v4362_v23  ;;  %v3139_v12 = vpack.c.bf16 %v6828_v38, %v6828_v38 }
 0xefc   :  { %v4404_v46 = vadd.f32 %v4403_v39, %v4402_v41  ;;  %v4390_v50 = vadd.f32 %v4389_v48, %v4388_v54  ;;  %v4406_v60 = vadd.f32 %v7094_v31, %v4405_v1  ;;  %v3142_v52 = vpack.c.bf16 %v6834_v36, %v6834_v36 }
 0xefd   :  { %v4397_v8 = vrot.slane %v4396_v7, 1  ;;  %5795 = vpow2.f32 %v4383_v44  ;;  %v4385_v35 = vmul.f32 1.442695, %v4370_v47  ;;  %v7110_v20 = vunpack.c.l.bf16 %v2054_v26 }
 0xefe   :  { %5797 = vrcp.f32 %v4404_v46  ;;  %v4391_v0 = vrot.slane %v4390_v50, 1  ;;  %v4407_v19 = vrot.slane %v4406_v60, 2  ;;  %v3141_v4 = vpack.c.bf16 %v6837_v18, %v6837_v18 }
 0xeff   :  { %v4398_v40 = vadd.f32 %v4397_v8, %v4396_v7  ;;  %5799 = vpow2.f32 %v4385_v35  ;;  %v7114_v2 = vunpack.c.l.bf16 %v3138_v11  ;;  %v7116_v30 = vunpack.c.l.bf16 %v3137_v3 }
 0xf00   :  { %v4392_v38 = vadd.f32 %v4391_v0, %v4390_v50  ;;  %v4408_v45 = vadd.f32 %v4407_v19, %v4406_v60  ;;  %v7118_v25 = vunpack.c.l.bf16 %v3140_v5  ;;  %v4597_v41 = vunpack.c.l.bf16 %v3139_v12 }
 0xf01   :  { %v3144_v36 = vpack.c.bf16 %v6841_v55, %v6841_v55  ;;  %5801 = vrcp.f32 %v4398_v40  ;;  %v7124_v54 = vunpack.c.l.bf16 %v3142_v52  ;;  %v3143_v18 = vpack.c.bf16 %v6844_v37, %v6844_v37 }
 0xf02   :  { %v7122_v26 = vpop.eup %5791  ;;  %5803 = vrcp.f32 %v4392_v38  ;;  %v4409_v6 = vrot.slane %v4408_v45, 1  ;;  %v7128_v11 = vunpack.c.l.bf16 %v3141_v4  ;;  %v4135_v57 = vpack.c.bf16 %v6958_v58, %v6958_v58 }
 0xf03   :  { %v4137_v62 = vpack.c.bf16 %v6962_v16, %v6962_v16  ;;  %v4411_v55 = vrot.slane %v7122_v26, 4  ;;  %v4136_v39 = vpack.c.bf16 %v6964_v28, %v6964_v28  ;;  %v4139_v37 = vpack.c.bf16 %v6969_v42, %v6969_v42 }
 0xf04   :  { %v7135_v23 = vpop.eup %5793  ;;  %v4138_v48 = vpack.c.bf16 %v6971_v10, %v6971_v10  ;;  %v4410_v1 = vadd.f32 %v4409_v6, %v4408_v45  ;;  %v7143_v3 = vunpack.c.l.bf16 %v3144_v36  ;;  %v4141_v58 = vpack.c.bf16 %v6976_v21, %v6976_v21 }
 0xf05   :  { %v4412_v16 = vadd.f32 %v7122_v26, %v4411_v55  ;;  %v4417_v7 = vrot.slane %v7135_v23, 4  ;;  %v7149_v44 = vunpack.c.l.bf16 %v3143_v18  ;;  %v4140_v28 = vpack.c.bf16 %v6978_v51, %v6978_v51 }
 0xf06   :  { %v4142_v42 = vpack.c.bf16 %v6983_v53, %v6983_v53  ;;  %5805 = vrcp.f32 %v4410_v1  ;;  %v7157_v47 = vunpack.c.l.bf16 %v4135_v57  ;;  %v4669_v5 = vunpack.c.l.bf16 %v4137_v62 }
 0xf07   :  { %v7155_v10 = vpop.eup %5795  ;;  %v4413_v46 = vrot.slane %v4412_v16, 2  ;;  %v4418_v21 = vadd.f32 %v7135_v23, %v4417_v7  ;;  %v7160_v60 = vunpack.c.l.bf16 %v4136_v39  ;;  %v7162_v12 = vunpack.c.l.bf16 %v4139_v37 }
 0xf08   :  { %v5798_v50 = vpop.eup %5797  ;;  %v7164_v8 = vunpack.c.l.bf16 %v4138_v48  ;;  %v4423_v51 = vrot.slane %v7155_v10, 4  ;;  %v7169_v53 = vunpack.c.l.bf16 %v4141_v58  ;;  %v7174_v4 = vunpack.c.l.bf16 %v4140_v28 }
 0xf09   :  { %v7167_v35 = vpop.eup %5799  ;;  %v7172_v52 = vmul.f32 %v5798_v50, %v7060_v29  ;;  %v4414_v0 = vadd.f32 %v4413_v46, %v4412_v16  ;;  %v4419_v19 = vrot.slane %v4418_v21, 2  ;;  %v7176_v40 = vunpack.c.l.bf16 %v4142_v42 }
 0xf0a   :  { %v4424_v38 = vadd.f32 %v7155_v10, %v4423_v51  ;;  %v4429_v45 = vrot.slane %v7167_v35, 4 }
 0xf0b   :  { %v5802_v36 = vpop.eup %5801  ;;  %v4415_v18 = vrot.slane %v4414_v0, 1  ;;  %v4420_v6 = vadd.f32 %v4419_v19, %v4418_v21  ;;  %v4605_v57 = vmul.f32 %v4597_v41, %v7172_v52  ;;  %v4533_v62 = vmul.f32 %v7064_v14, %v7172_v52 }
 0xf0c   :  { %v5804_v29 = vpop.eup %5803  ;;  %v7184_v55 = vmul.f32 %v5802_v36, %v7077_v43  ;;  %v4425_v39 = vrot.slane %v4424_v38, 2  ;;  %v4430_v37 = vadd.f32 %v7167_v35, %v4429_v45  ;;  %v7188_v48 = vmul.f32 %v4669_v5, %v7172_v52 }
 0xf0d   :  { %v7191_v1 = vmul.f32 %v5804_v29, %v7081_v56  ;;  %v4416_v58 = vadd.f32 %v4415_v18, %v4414_v0  ;;  %v4421_v16 = vrot.slane %v4420_v6, 1  ;;  %v4625_v41 = vsel %vm294_vm2, %v4605_v57, 0.0 }
 0xf0e   :  { %v4426_v7 = vadd.f32 %v4425_v39, %v4424_v38  ;;  %v4431_v28 = vrot.slane %v4430_v37, 2  ;;  %v4604_v14 = vmul.f32 %v7114_v2, %v7184_v55  ;;  %v4626_v43 = vrot.slane %v4625_v41, 4 }
 0xf0f   :  { %5807 = vrcp.f32 %v4416_v58  ;;  %v4422_v42 = vadd.f32 %v4421_v16, %v4420_v6  ;;  %v4603_v46 = vmul.f32 %v7116_v30, %v7191_v1  ;;  %v4531_v5 = vmul.f32 %v7062_v27, %v7191_v1 }
 0xf10   :  { %v5806_v56 = vpop.eup %5805  ;;  %v4427_v21 = vrot.slane %v4426_v7, 1  ;;  %v4432_v50 = vadd.f32 %v4431_v28, %v4430_v37  ;;  %v4618_v51 = vsel %vm294_vm2, %v4604_v14, 0.0  ;;  %v4627_v0 = vadd.f32 %v4626_v43, %v4625_v41 }
 0xf11   :  { %v7202_v19 = vmul.f32 %v5806_v56, %v7094_v31  ;;  %5809 = vrcp.f32 %v4422_v42  ;;  %v4611_v2 = vsel %vm294_vm2, %v4603_v46, 0.0  ;;  %v4619_v38 = vrot.slane %v4618_v51, 4 }
 0xf12   :  { %v4428_v45 = vadd.f32 %v4427_v21, %v4426_v7  ;;  %v4433_v36 = vrot.slane %v4432_v50, 1  ;;  %v4612_v18 = vrot.slane %v4611_v2, 4  ;;  %v4628_v30 = vrot.slane %v4627_v0, 2 }
 0xf13   :  { %v4606_v27 = vmul.f32 %v7118_v25, %v7202_v19  ;;  %v4620_v6 = vadd.f32 %v4619_v38, %v4618_v51  ;;  %v4532_v57 = vmul.f32 %v7071_v32, %v7184_v55  ;;  %v4534_v31 = vmul.f32 %v7073_v33, %v7202_v19 }
 0xf14   :  { %5811 = vrcp.f32 %v4428_v45  ;;  %v4434_v29 = vadd.f32 %v4433_v36, %v4432_v50  ;;  %v4613_v39 = vadd.f32 %v4612_v18, %v4611_v2  ;;  %v4629_v37 = vadd.f32 %v4628_v30, %v4627_v0 }
 0xf15   :  { %v4621_v58 = vrot.slane %v4620_v6, 2  ;;  %v4632_v16 = vsel %vm294_vm2, %v4606_v27, 0.0  ;;  %v4539_v41 = vsel %vm294_vm2, %v4531_v5, 0.0  ;;  %v4546_v25 = vsel %vm294_vm2, %v4532_v57, 0.0 }
 0xf16   :  { %5813 = vrcp.f32 %v4434_v29  ;;  %v4614_v7 = vrot.slane %v4613_v39, 2  ;;  %v4630_v28 = vrot.slane %v4629_v37, 1  ;;  %v4633_v14 = vrot.slane %v4632_v16, 4 }
 0xf17   :  { %v4622_v32 = vadd.f32 %v4621_v58, %v4620_v6  ;;  %v4540_v43 = vrot.slane %v4539_v41, 4  ;;  %v4547_v33 = vrot.slane %v4546_v25, 4  ;;  %v4553_v42 = vsel %vm294_vm2, %v4533_v62, 0.0 }
 0xf18   :  { %v4615_v46 = vadd.f32 %v4614_v7, %v4613_v39  ;;  %v4631_v56 = vadd.f32 %v4630_v28, %v4629_v37  ;;  %v4634_v21 = vadd.f32 %v4633_v14, %v4632_v16  ;;  %v4554_v50 = vrot.slane %v4553_v42, 4 }
 0xf19   :  { %v5808_v51 = vpop.eup %5807  ;;  %v4623_v0 = vrot.slane %v4622_v32, 1  ;;  %v4541_v2 = vadd.f32 %v4540_v43, %v4539_v41  ;;  %v4548_v5 = vadd.f32 %v4547_v33, %v4546_v25  ;;  %v4560_v38 = vsel %vm294_vm2, %v4534_v31, 0.0 }
 0xf1a   :  { %v7217_v45 = vmul.f32 %v5808_v51, %v7122_v26  ;;  %v4616_v36 = vrot.slane %v4615_v46, 1  ;;  %v4635_v18 = vrot.slane %v4634_v21, 2  ;;  %v4555_v30 = vadd.f32 %v4554_v50, %v4553_v42 }
 0xf1b   :  { %v5810_v27 = vpop.eup %5809  ;;  %v4624_v6 = vadd.f32 %v4623_v0, %v4622_v32  ;;  %v4542_v57 = vrot.slane %v4541_v2, 2  ;;  %v4549_v62 = vrot.slane %v4548_v5, 2  ;;  %v4561_v29 = vrot.slane %v4560_v38, 4 }
 0xf1c   :  { %v7220_v39 = vmul.f32 %v5810_v27, %v7135_v23  ;;  %v4607_v37 = vmul.f32 %v7128_v11, %v7217_v45  ;;  %v4617_v58 = vadd.f32 %v4616_v36, %v4615_v46  ;;  %v4636_v16 = vadd.f32 %v4635_v18, %v4634_v21 }
 0xf1d   :  { %v4535_v26 = vmul.f32 %v7075_v13, %v7217_v45  ;;  %v4543_v31 = vadd.f32 %v4542_v57, %v4541_v2  ;;  %v4550_v41 = vadd.f32 %v4549_v62, %v4548_v5  ;;  %v4556_v25 = vrot.slane %v4555_v30, 2 }
 0xf1e   :  { %v5812_v7 = vpop.eup %5811  ;;  %v4608_v28 = vmul.f32 %v7124_v54, %v7220_v39  ;;  %v4637_v14 = vrot.slane %v4636_v16, 1  ;;  %v4639_v32 = vsel %vm294_vm2, %v4607_v37, 0.0  ;;  %v4788_v23 = vsel %vm4747_vm4, %v4624_v6, %v4617_v58 }
 0xf1f   :  { %v7231_v43 = vmul.f32 %v5812_v7, %v7155_v10  ;;  %v4640_v11 = vrot.slane %v4639_v32, 4  ;;  %v4789_v33 = vsel %vm4749_vm5, %v4631_v56, %v4788_v23  ;;  %v4536_v13 = vmul.f32 %v7085_v22, %v7220_v39 }
 0xf20   :  { %v5814_v42 = vpop.eup %5813  ;;  %v4638_v46 = vadd.f32 %v4637_v14, %v4636_v16  ;;  %v4646_v21 = vsel %vm294_vm2, %v4608_v28, 0.0  ;;  %v4544_v54 = vrot.slane %v4543_v31, 1  ;;  %v4551_v50 = vrot.slane %v4550_v41, 1 }
 0xf21   :  { %v7238_v51 = vmul.f32 %v5814_v42, %v7167_v35  ;;  %v4609_v10 = vmul.f32 %v7149_v44, %v7231_v43  ;;  %v4641_v0 = vadd.f32 %v4640_v11, %v4639_v32  ;;  %v4647_v2 = vrot.slane %v4646_v21, 4 }
 0xf22   :  { %v4790_v56 = vsel %vm4751_vm6, %v4638_v46, %v4789_v33  ;;  %v4537_v22 = vmul.f32 %v7083_v59, %v7231_v43  ;;  %v4545_v5 = vadd.f32 %v4544_v54, %v4543_v31  ;;  %v4552_v36 = vadd.f32 %v4551_v50, %v4550_v41 }
 0xf23   :  { %v4610_v18 = vmul.f32 %v7143_v3, %v7238_v51  ;;  %v4642_v27 = vrot.slane %v4641_v0, 2  ;;  %v4648_v6 = vadd.f32 %v4647_v2, %v4646_v21  ;;  %v4653_v35 = vsel %vm294_vm2, %v4609_v10, 0.0 }
 0xf24   :  { %v4654_v57 = vrot.slane %v4653_v35, 4  ;;  %v4538_v44 = vmul.f32 %v7110_v20, %v7238_v51  ;;  %v4557_v62 = vadd.f32 %v4556_v25, %v4555_v30  ;;  %v4562_v37 = vadd.f32 %v4561_v29, %v4560_v38 }
 0xf25   :  { %v4643_v58 = vadd.f32 %v4642_v27, %v4641_v0  ;;  %v4649_v16 = vrot.slane %v4648_v6, 2  ;;  %v4660_v7 = vsel %vm294_vm2, %v4610_v18, 0.0  ;;  %v4567_v59 = vsel %vm294_vm2, %v4535_v26, 0.0 }
 0xf26   :  { %v4655_v31 = vadd.f32 %v4654_v57, %v4653_v35  ;;  %v4661_v41 = vrot.slane %v4660_v7, 4  ;;  %v4558_v3 = vrot.slane %v4557_v62, 1  ;;  %v4563_v28 = vrot.slane %v4562_v37, 2 }
 0xf27   :  { %v4644_v14 = vrot.slane %v4643_v58, 1  ;;  %v4650_v32 = vadd.f32 %v4649_v16, %v4648_v6  ;;  %v4568_v23 = vrot.slane %v4567_v59, 4  ;;  %v4574_v11 = vsel %vm294_vm2, %v4536_v13, 0.0 }
 0xf28   :  { %v4656_v20 = vrot.slane %v4655_v31, 2  ;;  %v4662_v30 = vadd.f32 %v4661_v41, %v4660_v7  ;;  %v4559_v38 = vadd.f32 %v4558_v3, %v4557_v62  ;;  %v4564_v29 = vadd.f32 %v4563_v28, %v4562_v37 }
 0xf29   :  { %v4645_v25 = vadd.f32 %v4644_v14, %v4643_v58  ;;  %v4651_v33 = vrot.slane %v4650_v32, 1  ;;  %v4569_v42 = vadd.f32 %v4568_v23, %v4567_v59  ;;  %v4575_v46 = vrot.slane %v4574_v11, 4 }
 0xf2a   :  { %v4657_v21 = vadd.f32 %v4656_v20, %v4655_v31  ;;  %v4663_v26 = vrot.slane %v4662_v30, 2  ;;  %v4565_v54 = vrot.slane %v4564_v29, 1  ;;  %v4581_v50 = vsel %vm294_vm2, %v4537_v22, 0.0 }
 0xf2b   :  { %v4652_v10 = vadd.f32 %v4651_v33, %v4650_v32  ;;  %v4791_v0 = vsel %vm4753_vm7, %v4645_v25, %v4790_v56  ;;  %v4570_v2 = vrot.slane %v4569_v42, 2  ;;  %v4576_v18 = vadd.f32 %v4575_v46, %v4574_v11 }
 0xf2c   :  { %v4658_v27 = vrot.slane %v4657_v21, 1  ;;  %v4664_v13 = vadd.f32 %v4663_v26, %v4662_v30  ;;  %v4566_v6 = vadd.f32 %v4565_v54, %v4564_v29  ;;  %v4582_v35 = vrot.slane %v4581_v50, 4 }
 0xf2d   :  { %v4792_v57 = vsel %vm4755_vm8, %v4652_v10, %v4791_v0  ;;  %v4571_v62 = vadd.f32 %v4570_v2, %v4569_v42  ;;  %v4577_v37 = vrot.slane %v4576_v18, 2  ;;  %v4588_v58 = vsel %vm294_vm2, %v4538_v44, 0.0 }
 0xf2e   :  { %v4659_v16 = vadd.f32 %v4658_v27, %v4657_v21  ;;  %v4665_v7 = vrot.slane %v4664_v13, 1  ;;  %v4583_v59 = vadd.f32 %v4582_v35, %v4581_v50  ;;  %v4589_v31 = vrot.slane %v4588_v58, 4 }
 0xf2f   :  { %v4572_v22 = vrot.slane %v4571_v62, 1  ;;  %v4578_v41 = vadd.f32 %v4577_v37, %v4576_v18  ;;  %v4770_v56 = vsel %vm4747_vm4, %v4552_v36, %v4545_v5  ;;  %v4675_v3 = vmul.f32 %v7157_v47, %v7191_v1 }
 0xf30   :  { %v4666_v28 = vadd.f32 %v4665_v7, %v4664_v13  ;;  %v4793_v14 = vsel %vm4757_vm9, %v4659_v16, %v4792_v57  ;;  %v4584_v32 = vrot.slane %v4583_v59, 2  ;;  %v4590_v23 = vadd.f32 %v4589_v31, %v4588_v58 }
 0xf31   :  { %v4573_v11 = vadd.f32 %v4572_v22, %v4571_v62  ;;  %v4579_v20 = vrot.slane %v4578_v41, 1  ;;  %v4771_v44 = vsel %vm4749_vm5, %v4559_v38, %v4770_v56  ;;  %v4676_v30 = vmul.f32 %v7160_v60, %v7184_v55 }
 0xf32   :  { %v4794_v29 = vsel %vm4759_vm10, %v4666_v28, %v4793_v14  ;;  %v4585_v25 = vadd.f32 %v4584_v32, %v4583_v59  ;;  %v4591_v33 = vrot.slane %v4590_v23, 2  ;;  %v4772_v5 = vsel %vm4751_vm6, %v4566_v6, %v4771_v44 }
 0xf33   :  { %4795 = vrot.lane.b32.xlu0 %v4794_v29, %s5942_s11  ;;  %v4580_v47 = vadd.f32 %v4579_v20, %v4578_v41  ;;  %v4773_v36 = vsel %vm4753_vm7, %v4573_v11, %v4772_v5  ;;  %v4678_v42 = vmul.f32 %v7164_v8, %v7202_v19  ;;  %v4679_v38 = vmul.f32 %v7162_v12, %v7217_v45  ;;  %s5963_s11 = smov [#allocation10]  }
 0xf34   :  { %v4586_v46 = vrot.slane %v4585_v25, 1  ;;  %v4592_v21 = vadd.f32 %v4591_v33, %v4590_v23  ;;  %v4680_v60 = vmul.f32 %v7174_v4, %v7220_v39  ;;  %v4681_v26 = vmul.f32 %v7169_v53, %v7231_v43  ;;  %s4828_s18 = sshll.u32 %s5963_s11, 4  ;;  %s4829_s18 = int_to_ptr.vmem [resolvable:$true] %s4828_s18 }
 0xf35   :  { %v4774_v54 = vsel %vm4755_vm8, %v4580_v47, %v4773_v36  ;;  %v4682_v50 = vmul.f32 %v7176_v40, %v7238_v51  ;;  %v4683_v10 = vsel %vm294_vm2, %v4675_v3, 0.0  ;;  %v4690_v8 = vsel %vm294_vm2, %v4676_v30, 0.0  ;;  %s5911_s19 = scalar_lea.vmem %s4829_s18, 128  ;;  %p5916_p5 = scmp.lt.s32.totalorder %s4829_s18, %s4829_s18 }
 0xf36   :  { %v4587_v0 = vadd.f32 %v4586_v46, %v4585_v25  ;;  %v4593_v2 = vrot.slane %v4592_v21, 1  ;;  %v4684_v12 = vrot.slane %v4683_v10, 4  ;;  %v4691_v18 = vrot.slane %v4690_v8, 4  ;;  %p5912_p4 = scmp.ne.s32.totalorder %s4829_s18, %s5911_s19  ;;  %p5917_p6 = scmp.lt.s32.totalorder %s5911_s19, %s5911_s19 }
 0xf37   :  { %v4697_v27 = vsel %vm294_vm2, %v7188_v48, 0.0  ;;  %v4704_v4 = vsel %vm294_vm2, %v4678_v42, 0.0  ;;  %v4711_v53 = vsel %vm294_vm2, %v4679_v38, 0.0  ;;  %v4718_v13 = vsel %vm294_vm2, %v4680_v60, 0.0 }
 0xf38   :  { %v4594_v6 = vadd.f32 %v4593_v2, %v4592_v21  ;;  %v4775_v40 = vsel %vm4757_vm9, %v4587_v0, %v4774_v54  ;;  %v4685_v35 = vadd.f32 %v4684_v12, %v4683_v10  ;;  %v4692_v57 = vadd.f32 %v4691_v18, %v4690_v8  ;;  %p5918_p7 = por %p5917_p6, %p5916_p5 }
 0xf39   :  { %v4698_v62 = vrot.slane %v4697_v27, 4  ;;  %v4705_v37 = vrot.slane %v4704_v4, 4  ;;  %v4712_v58 = vrot.slane %v4711_v53, 4  ;;  %v4719_v16 = vrot.slane %v4718_v13, 4 }
 0xf3a   :  { %v4776_v7 = vsel %vm4759_vm10, %v4594_v6, %v4775_v40  ;;  %v4686_v59 = vrot.slane %v4685_v35, 2  ;;  %v4693_v31 = vrot.slane %v4692_v57, 2  ;;  %v4725_v48 = vsel %vm294_vm2, %v4681_v26, 0.0  ;;  %p5919_p8 = pnand %p5918_p7, %p5912_p4 }
 0xf3b   :  { %4777 = vrot.lane.b32.xlu1 %v4776_v7, %s5961_s5  ;;  %v4699_v22 = vadd.f32 %v4698_v62, %v4697_v27  ;;  %v4706_v41 = vadd.f32 %v4705_v37, %v4704_v4  ;;  %v4713_v56 = vadd.f32 %v4712_v58, %v4711_v53  ;;  %v4720_v3 = vadd.f32 %v4719_v16, %v4718_v13 }
 0xf3c   :  { %v4687_v28 = vadd.f32 %v4686_v59, %v4685_v35  ;;  %v4694_v14 = vadd.f32 %v4693_v31, %v4692_v57  ;;  %v4726_v32 = vrot.slane %v4725_v48, 4  ;;  %v4732_v23 = vsel %vm294_vm2, %v4682_v50, 0.0 }
 0xf3d   :  { %v4700_v11 = vrot.slane %v4699_v22, 2  ;;  %v4707_v20 = vrot.slane %v4706_v41, 2  ;;  %v4714_v44 = vrot.slane %v4713_v56, 2  ;;  %v4721_v30 = vrot.slane %v4720_v3, 2 }
 0xf3e   :  { %v4688_v29 = vrot.slane %v4687_v28, 1  ;;  %v4695_v25 = vrot.slane %v4694_v14, 1  ;;  %v4727_v33 = vadd.f32 %v4726_v32, %v4725_v48  ;;  %v4733_v5 = vrot.slane %v4732_v23, 4 }
 0xf3f   :  { %v4701_v47 = vadd.f32 %v4700_v11, %v4699_v22  ;;  %v4708_v36 = vadd.f32 %v4707_v20, %v4706_v41  ;;  %v4715_v42 = vadd.f32 %v4714_v44, %v4713_v56  ;;  %v4722_v38 = vadd.f32 %v4721_v30, %v4720_v3 }
 0xf40   :  { %v4689_v46 = vadd.f32 %v4688_v29, %v4687_v28  ;;  %v4696_v21 = vadd.f32 %v4695_v25, %v4694_v14  ;;  %v4728_v60 = vrot.slane %v4727_v33, 2  ;;  %v4734_v26 = vadd.f32 %v4733_v5, %v4732_v23 }
 0xf41   :  { %v4702_v54 = vrot.slane %v4701_v47, 1  ;;  %v4709_v10 = vrot.slane %v4708_v36, 1  ;;  %v4716_v8 = vrot.slane %v4715_v42, 1  ;;  %v4723_v50 = vrot.slane %v4722_v38, 1 }
 0xf42   :  { %v4729_v0 = vadd.f32 %v4728_v60, %v4727_v33  ;;  %v4735_v2 = vrot.slane %v4734_v26, 2  ;;  %v4806_v12 = vsel %vm4747_vm4, %v4696_v21, %v4689_v46  ;;  %v4459_v18 = vmul.f32 %v7008_v24, %v7191_v1 }
 0xf43   :  { %v4703_v27 = vadd.f32 %v4702_v54, %v4701_v47  ;;  %v4710_v4 = vadd.f32 %v4709_v10, %v4708_v36  ;;  %v4717_v53 = vadd.f32 %v4716_v8, %v4715_v42  ;;  %v4724_v13 = vadd.f32 %v4723_v50, %v4722_v38 }
 0xf44   :  { %v4730_v6 = vrot.slane %v4729_v0, 1  ;;  %v4736_v40 = vadd.f32 %v4735_v2, %v4734_v26  ;;  %v4460_v35 = vmul.f32 %v7023_v34, %v7184_v55  ;;  %v4461_v57 = vmul.f32 %v7018_v15, %v7172_v52 }
 0xf45   :  { %v4807_v62 = vsel %vm4749_vm5, %v4703_v27, %v4806_v12  ;;  %v4462_v37 = vmul.f32 %v7033_v49, %v7202_v19  ;;  %v4463_v24 = vmul.f32 %v7029_v9, %v7217_v45  ;;  %v4464_v1 = vmul.f32 %v7035_v63, %v7220_v39 }
 0xf46   :  { %v4731_v58 = vadd.f32 %v4730_v6, %v4729_v0  ;;  %v4737_v16 = vrot.slane %v4736_v40, 1  ;;  %v4808_v7 = vsel %vm4751_vm6, %v4710_v4, %v4807_v62  ;;  %v4465_v34 = vmul.f32 %v7039_v61, %v7231_v43 }
 0xf47   :  { %v4809_v15 = vsel %vm4753_vm7, %v4717_v53, %v4808_v7  ;;  %v4467_v52 = vsel %vm294_vm2, %v4459_v18, 0.0  ;;  %v4474_v55 = vsel %vm294_vm2, %v4460_v35, 0.0  ;;  %v4481_v49 = vsel %vm294_vm2, %v4461_v57, 0.0 }
 0xf48   :  { %v4738_v19 = vadd.f32 %v4737_v16, %v4736_v40  ;;  %v4810_v9 = vsel %vm4755_vm8, %v4724_v13, %v4809_v15  ;;  %v4468_v45 = vrot.slane %v4467_v52, 4  ;;  %v4475_v63 = vrot.slane %v4474_v55, 4 }
 0xf49   :  { %v4811_v39 = vsel %vm4757_vm9, %v4731_v58, %v4810_v9  ;;  %v4482_v59 = vrot.slane %v4481_v49, 4  ;;  %v4488_v31 = vsel %vm294_vm2, %v4462_v37, 0.0  ;;  %v4495_v61 = vsel %vm294_vm2, %v4463_v24, 0.0 }
 0xf4a   :  { %v4812_v43 = vsel %vm4759_vm10, %v4738_v19, %v4811_v39  ;;  %v4469_v48 = vadd.f32 %v4468_v45, %v4467_v52  ;;  %v4476_v22 = vadd.f32 %v4475_v63, %v4474_v55  ;;  %v4489_v41 = vrot.slane %v4488_v31, 4 }
 0xf4b   :  { %4813 = vrot.lane.b32.xlu1 %v4812_v43, %s5962_s6  ;;  %v4483_v56 = vadd.f32 %v4482_v59, %v4481_v49  ;;  %v4496_v3 = vrot.slane %v4495_v61, 4  ;;  %v4502_v28 = vsel %vm294_vm2, %v4464_v1, 0.0  ;;  %v4509_v14 = vsel %vm294_vm2, %v4465_v34, 0.0 }
 0xf4c   :  { %v4470_v32 = vrot.slane %v4469_v48, 2  ;;  %v4477_v23 = vrot.slane %v4476_v22, 2  ;;  %v4490_v11 = vadd.f32 %v4489_v41, %v4488_v31  ;;  %v4503_v20 = vrot.slane %v4502_v28, 4 }
 0xf4d   :  { %v4484_v44 = vrot.slane %v4483_v56, 2  ;;  %v4497_v30 = vadd.f32 %v4496_v3, %v4495_v61  ;;  %v4510_v29 = vrot.slane %v4509_v14, 4  ;;  %v4466_v25 = vmul.f32 %v7043_v17, %v7238_v51 }
 0xf4e   :  { %v4471_v33 = vadd.f32 %v4470_v32, %v4469_v48  ;;  %v4478_v5 = vadd.f32 %v4477_v23, %v4476_v22  ;;  %v4491_v47 = vrot.slane %v4490_v11, 2  ;;  %v4504_v36 = vadd.f32 %v4503_v20, %v4502_v28 }
 0xf4f   :  { %v4485_v42 = vadd.f32 %v4484_v44, %v4483_v56  ;;  %v4498_v38 = vrot.slane %v4497_v30, 2  ;;  %v4511_v46 = vadd.f32 %v4510_v29, %v4509_v14  ;;  %v4516_v21 = vsel %vm294_vm2, %v4466_v25, 0.0 }
 0xf50   :  { %v4472_v60 = vrot.slane %v4471_v33, 1  ;;  %v4479_v26 = vrot.slane %v4478_v5, 1  ;;  %v4492_v54 = vadd.f32 %v4491_v47, %v4490_v11  ;;  %v4505_v10 = vrot.slane %v4504_v36, 2 }
 0xf51   :  { %v4486_v8 = vrot.slane %v4485_v42, 1  ;;  %v4499_v50 = vadd.f32 %v4498_v38, %v4497_v30  ;;  %v4512_v0 = vrot.slane %v4511_v46, 2  ;;  %v4517_v2 = vrot.slane %v4516_v21, 4 }
 0xf52   :  { %v4473_v12 = vadd.f32 %v4472_v60, %v4471_v33  ;;  %v4480_v18 = vadd.f32 %v4479_v26, %v4478_v5  ;;  %v4493_v17 = vrot.slane %v4492_v54, 1  ;;  %v4506_v51 = vadd.f32 %v4505_v10, %v4504_v36 }
 0xf53   :  { %v4487_v27 = vadd.f32 %v4486_v8, %v4485_v42  ;;  %v4500_v4 = vrot.slane %v4499_v50, 1  ;;  %v4513_v53 = vadd.f32 %v4512_v0, %v4511_v46  ;;  %v4518_v13 = vadd.f32 %v4517_v2, %v4516_v21 }
 0xf54   :  { %v4494_v6 = vadd.f32 %v4493_v17, %v4492_v54  ;;  %v4507_v40 = vrot.slane %v4506_v51, 1  ;;  %v4748_v35 = vsel %vm4747_vm4, %v4480_v18, %v4473_v12 }
 0xf55   :  { %v4501_v57 = vadd.f32 %v4500_v4, %v4499_v50  ;;  %v4514_v62 = vrot.slane %v4513_v53, 1  ;;  %v4750_v37 = vsel %vm4749_vm5, %v4487_v27, %v4748_v35  ;;  %v4519_v24 = vrot.slane %v4518_v13, 2 }
 0xf56   :  { %v4508_v1 = vadd.f32 %v4507_v40, %v4506_v51  ;;  %v4752_v58 = vsel %vm4751_vm6, %v4494_v6, %v4750_v37 }
 0xf57   :  { %v4515_v16 = vadd.f32 %v4514_v62, %v4513_v53  ;;  %v4754_v7 = vsel %vm4753_vm7, %v4501_v57, %v4752_v58  ;;  %v4520_v34 = vadd.f32 %v4519_v24, %v4518_v13 }
 0xf58   :  { %v4756_v15 = vsel %vm4755_vm8, %v4508_v1, %v4754_v7 }
 0xf59   :  { %v4758_v52 = vsel %vm4757_vm9, %v4515_v16, %v4756_v15  ;;  %v4521_v55 = vrot.slane %v4520_v34, 1 }
 0xf5b   :  { %v4522_v49 = vadd.f32 %v4521_v55, %v4520_v34 }
 0xf5d   :  { %v4760_v19 = vsel %vm4759_vm10, %v4522_v49, %v4758_v52 }
 0xfa5   :  { %v4796_v45 = vpop.permute.xlu0 %4795 }
 0xfad   :  { %v4778_v9 = vpop.permute.xlu1 %4777 }
 0xfae   :  { %v4816_v63 = vsel %vm294_vm2, %v4760_v19, %v4778_v9 }
 0xfaf   :  { %v4818_v59 = vsel %vm4817_vm11, %v4816_v63, %v4796_v45 }
 0xfbd   :  { %v4814_v39 = vpop.permute.xlu1 %4813 }
 0xfbe   :  { %v4820_v31 = vsel %vm4819_vm12, %v4818_v59, %v4814_v39 }
 0xfbf   :  { %4821 = vst.msk [vmem:[#allocation10] sm:$0xff] %vm134_vm0, %v4820_v31 }
 0xfc0   :  { %5922 = shalt.err (!%p5919_p8)
}
 0xfc1   :  { %s5923_s22 = scalar_lea.hbm %s7349_s7, 128 }
 0xfc2   :  { %p5924_p9 = scmp.ne.s32.totalorder %s7349_s7, %s5923_s22  ;;  %p5927_p10 = scmp.lt.u32.totalorder %s5923_s22, %s7349_s7 }
 0xfc4   :  { %p5929_p11 = pnand %p5927_p10, %p5924_p9 }
 0xfc6   :  { %5932 = shalt.err (!%p5929_p11)
}
 0xfc7   :  { %4831 = dma.vmem_to_hbm [thread:$0]  %s4829_s18, 128, %s7349_s7, [#allocation4]  }
 0xfc8   :  { %5939 = dma.done.wait [#allocation4], 128  }
 0xfc9   :  { %5940 = vsyncadd [#allocation4], 4294967168 }
 0xfca   :  { %4835 = vsyncpa [#allocation3], 1 }
 0xfcb   :  { %4836 = vsyncpa [#allocation6], 1 }
 0xfcc   :  { %4837 = vsyncpa [#allocation9], 1 }
 0xfcd   :  { %4838 = vsyncpa [#allocation4], 1 }

</bundles_post_ra>
